<compile_context>
chip_gen: v7x
topology: tpu7x:2x2x1
jax: 0.10.0
libtpu: 0.0.40
codegen_flags: <defaults>
</compile_context>

<pallas_src>
import numpy as np
import jax
import jax.numpy as jnp
from jax.experimental import pallas as pl
from jax.experimental.pallas import tpu as pltpu

BN_EPS = 1e-5


# ---------------------------------------------------------------------------
# One-time parameter / constant preparation (hoisted out of the forward pass)
# ---------------------------------------------------------------------------
def _pool_gather(H, W):
    """(H//2 * W//2, H*W) one-hot matrix selecting the (even h, even w) rows."""
    Hp, Wp = H // 2, W // 2
    sel = np.zeros((Hp * Wp, H * W), np.float32)
    for i in range(Hp):
        for j in range(Wp):
            sel[i * Wp + j, (2 * i) * W + 2 * j] = 1.0
    return jnp.asarray(sel)


def prepare_params(p, H, W):
    """Fold BN, reshape/cast conv weights for the K-concatenated MXU dot, build the
    pool-gather one-hots, and permute the first Linear to (h, w, c) feature order."""
    def fold(conv_w, conv_b, gamma, beta, mean, var):
        cout, cin = conv_w.shape[0], conv_w.shape[1]
        # (Cout, Cin, 3, 3) -> (3, 3, Cin, Cout) -> (9*Cin, Cout), k = (dh+1)*3+(dw+1)
        w9 = jnp.transpose(conv_w, (2, 3, 1, 0)).reshape(9 * cin, cout)
        scale = gamma / jnp.sqrt(var + BN_EPS)
        bias = (conv_b - mean) * scale + beta
        sb = jnp.stack([scale, bias], axis=0).astype(jnp.float32)   # (2, Cout)
        return w9.astype(jnp.bfloat16), sb

    w1, sb1 = fold(p["w1"], p["b1"], p["g1"], p["beta1"], p["m1"], p["v1"])
    w2, sb2 = fold(p["w2"], p["b2"], p["g2"], p["beta2"], p["m2"], p["v2"])

    sel1 = _pool_gather(H, W).astype(jnp.bfloat16)            # (HW/4,  HW)
    sel2 = _pool_gather(H // 2, W // 2).astype(jnp.bfloat16)  # (HW/16, HW/4)

    C2 = p["w2"].shape[0]
    H3, W3 = H // 4, W // 4
    hidden = p["wl1"].shape[0]
    assert p["wl1"].shape[1] == C2 * H3 * W3
    # Kernel flatten order is (h, w, c); PyTorch Flatten on NCHW is (c, h, w):
    # permute the Linear weight columns once, parameter side only.
    wl1 = p["wl1"].reshape(hidden, C2, H3, W3)
    wl1 = jnp.transpose(wl1, (0, 2, 3, 1)).reshape(hidden, H3 * W3 * C2)

    return dict(w1=w1, sb1=sb1, sel1=sel1, w2=w2, sb2=sb2, sel2=sel2,
                wl1t=wl1.T.astype(jnp.float32),
                bl1=p["bl1"].astype(jnp.float32),
                wl2=p["wl2"].astype(jnp.float32),
                bl2=p["bl2"].astype(jnp.float32))


# ---------------------------------------------------------------------------
# Fused conv blocks kernel (layer1 + layer2, one image per grid step)
# ---------------------------------------------------------------------------
def _conv_bn_relu_pool_block(x32, w_ref, sb_ref, sel_ref, H, W):
    """Conv3x3(pad=1) + folded-BN + ReLU + MaxPool2x2 on one image.

    x32     : (H*W, Cin) f32, rows ordered r = h*W + w
    w_ref   : (9*Cin, Cout) bf16, column block k = (dh+1)*3 + (dw+1)
    sb_ref  : (2, Cout) f32  (row0 = BN scale, row1 = folded bias)
    sel_ref : (H*W//4, H*W) bf16 one-hot pool gather
    returns : (H*W//4, Cout) f32
    """
    HW = H * W
    r = jax.lax.broadcasted_iota(jnp.int32, (HW, 1), 0)       # row index = h*W + w
    if (W & (W - 1)) == 0:
        ww = jnp.bitwise_and(r, W - 1)                         # w = r mod W (W pow2)
    else:
        ww = jnp.remainder(r, W)   # TODO(synk): general-W fallback (unused here)

    taps = []
    for dh in (-1, 0, 1):
        for dw in (-1, 0, 1):
            off = dh * W + dw
            xs = x32 if off == 0 else pltpu.roll(x32, shift=(-off) % HW, axis=0)
            conds = []
            if dh == -1:
                conds.append(r >= W)               # h >= 1
            elif dh == 1:
                conds.append(r < (H - 1) * W)      # h <= H-2
            if dw == -1:
                conds.append(ww >= 1)
            elif dw == 1:
                conds.append(ww < W - 1)
            if conds:
                c = conds[0]
                for extra in conds[1:]:
                    c = jnp.logical_and(c, extra)
                xs = xs * c.astype(jnp.float32)    # zero rows falling in the padding
            taps.append(xs.astype(jnp.bfloat16))

    # One K-concatenated bf16 MXU matmul for all 9 taps (K = 9*Cin), f32 accumulate.
    xs_all = jnp.concatenate(taps, axis=1)                         # (HW, 9*Cin) bf16
    acc = jnp.dot(xs_all, w_ref[...], preferred_element_type=jnp.float32)
    y = jnp.maximum(acc * sb_ref[0:1, :] + sb_ref[1:2, :], 0.0)    # BN + ReLU in f32

    # 2x2 max-pool: max with right neighbour, then with the row below, then gather
    # the (even h, even w) rows with a one-hot MXU matmul (wrap rows are discarded).
    yw = jnp.maximum(y, pltpu.roll(y, shift=HW - 1, axis=0))
    yhw = jnp.maximum(yw, pltpu.roll(yw, shift=HW - W, axis=0))
    return jnp.dot(sel_ref[...], yhw.astype(jnp.bfloat16),
                   preferred_element_type=jnp.float32)             # (HW//4, Cout) f32


def _make_fused_kernel(H, W):
    def kernel(x_ref, w1_ref, sb1_ref, sel1_ref, w2_ref, sb2_ref, sel2_ref, o_ref):
        # x_ref: (1, HW, Cin) bf16; o_ref: (1, HW/16, C2) f32.
        x32 = x_ref[0].astype(jnp.float32)
        p1 = _conv_bn_relu_pool_block(x32, w1_ref, sb1_ref, sel1_ref, H, W)
        p2 = _conv_bn_relu_pool_block(p1, w2_ref, sb2_ref, sel2_ref, H // 2, W // 2)
        o_ref[0] = p2.astype(o_ref.dtype)
    return kernel


def fused_conv_layers(x_cl, prep, H, W):
    """x_cl: (N, H*W, Cin) bf16 channels-last.  Returns (N, (H//4)*(W//4), C2) f32."""
    N, HW, Cin = x_cl.shape
    C1 = prep["w1"].shape[-1]
    C2 = prep["w2"].shape[-1]
    assert HW == H * W and H % 4 == 0 and W % 4 == 0
    H2, W2, H3, W3 = H // 2, W // 2, H // 4, W // 4
    HW2, HW3 = H2 * W2, H3 * W3

    flops = 2 * N * (HW * 9 * Cin * C1 + HW2 * HW * C1
                     + HW2 * 9 * C1 * C2 + HW3 * HW2 * C2)
    bytes_accessed = (2 * N * HW * Cin + 2 * 9 * Cin * C1 + 2 * 9 * C1 * C2
                      + 2 * HW2 * HW + 2 * HW3 * HW2
                      + 4 * 2 * (C1 + C2) + 4 * N * HW3 * C2)

    return pl.pallas_call(
        _make_fused_kernel(H, W),
        out_shape=jax.ShapeDtypeStruct((N, HW3, C2), jnp.float32),
        grid_spec=pltpu.PrefetchScalarGridSpec(
            num_scalar_prefetch=0,
            grid=(N,),
            in_specs=[
                pl.BlockSpec((1, HW, Cin), lambda n: (n, 0, 0)),      # x (one image)
                pl.BlockSpec((9 * Cin, C1), lambda n: (0, 0)),        # w1  (bf16)
                pl.BlockSpec((2, C1), lambda n: (0, 0)),              # sb1 (f32)
                pl.BlockSpec((HW2, HW), lambda n: (0, 0)),            # sel1 (bf16)
                pl.BlockSpec((9 * C1, C2), lambda n: (0, 0)),         # w2  (bf16)
                pl.BlockSpec((2, C2), lambda n: (0, 0)),              # sb2 (f32)
                pl.BlockSpec((HW3, HW2), lambda n: (0, 0)),           # sel2 (bf16)
            ],
            out_specs=pl.BlockSpec((1, HW3, C2), lambda n: (n, 0, 0)),
        ),
        compiler_params=pltpu.CompilerParams(
            dimension_semantics=("parallel",)),
        cost_estimate=pl.CostEstimate(flops=flops, transcendentals=0,
                                      bytes_accessed=bytes_accessed),
    )(x_cl, prep["w1"], prep["sb1"], prep["sel1"],
      prep["w2"], prep["sb2"], prep["sel2"])


# ---------------------------------------------------------------------------
# Full RelationNetwork forward: 1 fused Pallas call + tiny XLA head
# ---------------------------------------------------------------------------
def relation_network_forward(x_nchw, prep):
    N, C, H, W = x_nchw.shape
    # Single layout change + bf16 cast at the network boundary (fused by XLA).
    x = jnp.transpose(x_nchw, (0, 2, 3, 1)).reshape(N, H * W, C).astype(jnp.bfloat16)
    feats = fused_conv_layers(x, prep, H, W)                 # (N, HW/16, 64) f32
    flat = feats.reshape(N, -1)
    hi = jax.lax.Precision.HIGHEST
    h = jnp.maximum(jnp.dot(flat, prep["wl1t"], precision=hi) + prep["bl1"], 0.0)
    z = jnp.dot(h, prep["wl2"].T, precision=hi) + prep["bl2"]
    return jax.nn.sigmoid(z)


# ---------------------------------------------------------------------------
# Pure-JAX reference (PyTorch semantics, inference-mode BN)
# ---------------------------------------------------------------------------
def _ref_conv_block(x, w, b, gamma, beta, mean, var):
    hi = jax.lax.Precision.HIGHEST
    y = jax.lax.conv_general_dilated(
        x, w, window_strides=(1, 1), padding=((1, 1), (1, 1)),
        dimension_numbers=("NCHW", "OIHW", "NCHW"), precision=hi)
    y = y + b[None, :, None, None]
    y = (y - mean[None, :, None, None]) / jnp.sqrt(var[None, :, None, None] + BN_EPS)
    y = y * gamma[None, :, None, None] + beta[None, :, None, None]
    y = jnp.maximum(y, 0.0)
    N, C, H, W = y.shape
    return y.reshape(N, C, H // 2, 2, W // 2, 2).max(axis=(3, 5))


def reference_forward(x, p):
    hi = jax.lax.Precision.HIGHEST
    y = _ref_conv_block(x, p["w1"], p["b1"], p["g1"], p["beta1"], p["m1"], p["v1"])
    y = _ref_conv_block(y, p["w2"], p["b2"], p["g2"], p["beta2"], p["m2"], p["v2"])
    flat = y.reshape(y.shape[0], -1)                          # PyTorch (c, h, w) order
    h = jnp.maximum(jnp.dot(flat, p["wl1"].T, precision=hi) + p["bl1"], 0.0)
    z = jnp.dot(h, p["wl2"].T, precision=hi) + p["bl2"]
    return jax.nn.sigmoid(z)


if __name__ == "__main__":
    key = jax.random.PRNGKey(0)
    keys = jax.random.split(key, 20)

    # Conv2d(128, ...) hardwires 128 input channels; small batch / spatial size.
    N, Cin, H, W = 2, 128, 16, 16
    hidden = 32
    H3, W3 = H // 4, W // 4
    input_size = 64 * H3 * W3            # Flatten output feeding Linear(input_size, hidden)

    def uni(k, shape, fan_in):
        b = 1.0 / float(np.sqrt(fan_in))
        return jax.random.uniform(k, shape, jnp.float32, -b, b)

    x = jax.random.normal(keys[0], (N, Cin, H, W), jnp.float32)

    params = dict(
        w1=uni(keys[1], (64, 128, 3, 3), 128 * 9),
        b1=uni(keys[2], (64,), 128 * 9),
        g1=jax.random.uniform(keys[3], (64,), jnp.float32, 0.5, 1.5),
        beta1=0.1 * jax.random.normal(keys[4], (64,), jnp.float32),
        m1=0.1 * jax.random.normal(keys[5], (64,), jnp.float32),
        v1=jax.random.uniform(keys[6], (64,), jnp.float32, 0.5, 1.5),
        w2=uni(keys[7], (64, 64, 3, 3), 64 * 9),
        b2=uni(keys[8], (64,), 64 * 9),
        g2=jax.random.uniform(keys[9], (64,), jnp.float32, 0.5, 1.5),
        beta2=0.1 * jax.random.normal(keys[10], (64,), jnp.float32),
        m2=0.1 * jax.random.normal(keys[11], (64,), jnp.float32),
        v2=jax.random.uniform(keys[12], (64,), jnp.float32, 0.5, 1.5),
        wl1=uni(keys[13], (hidden, input_size), input_size),
        bl1=uni(keys[14], (hidden,), input_size),
        wl2=uni(keys[15], (1, hidden), hidden),
        bl2=uni(keys[16], (1,), hidden),
    )

    # One-time parameter preparation (hoisted out of the per-call forward).
    prep = prepare_params(params, H, W)

    fwd = jax.jit(relation_network_forward)
    out = jax.block_until_ready(fwd(x, prep))

    ref = reference_forward(x, params)
    assert out.shape == (N, 1), out.shape
    assert jnp.allclose(out, ref, atol=5e-3), (
        "mismatch vs reference, max abs diff = "
        + str(float(jnp.max(jnp.abs(out - ref)))))

    print("KERNEL_OK")
</pallas_src>

<mosaic_0001>
module attributes {stable_mosaic.version = 11 : i64} {
  func.func @kernel(%arg0: i32, %arg1: memref<1x256x128xbf16, #tpu.memory_space<vmem>>, %arg2: memref<1152x64xbf16, #tpu.memory_space<vmem>>, %arg3: memref<2x64xf32, #tpu.memory_space<vmem>>, %arg4: memref<64x256xbf16, #tpu.memory_space<vmem>>, %arg5: memref<576x64xbf16, #tpu.memory_space<vmem>>, %arg6: memref<2x64xf32, #tpu.memory_space<vmem>>, %arg7: memref<16x64xbf16, #tpu.memory_space<vmem>>, %arg8: memref<1x16x64xf32, #tpu.memory_space<vmem>>) attributes {dimension_semantics = [#tpu.dimension_semantics<parallel>], iteration_bounds = array<i64: 2>, scalar_prefetch = 0 : i64, scratch_operands = 0 : i64, tpu.core_type = #tpu.core_type<tc>, window_params = [{transform_indices = @transform_0, window_bounds = array<i64: 1, 256, 128>}, {pipeline_mode = #tpu.pipeline_mode<synchronous>, transform_indices = @transform_1, window_bounds = array<i64: 1152, 64>}, {pipeline_mode = #tpu.pipeline_mode<synchronous>, transform_indices = @transform_2, window_bounds = array<i64: 2, 64>}, {pipeline_mode = #tpu.pipeline_mode<synchronous>, transform_indices = @transform_3, window_bounds = array<i64: 64, 256>}, {pipeline_mode = #tpu.pipeline_mode<synchronous>, transform_indices = @transform_4, window_bounds = array<i64: 576, 64>}, {pipeline_mode = #tpu.pipeline_mode<synchronous>, transform_indices = @transform_5, window_bounds = array<i64: 2, 64>}, {pipeline_mode = #tpu.pipeline_mode<synchronous>, transform_indices = @transform_6, window_bounds = array<i64: 16, 64>}, {transform_indices = @transform_7, window_bounds = array<i64: 1, 16, 64>}]} {
    %c0 = arith.constant 0 : index
    %c0_0 = arith.constant 0 : index
    %c0_1 = arith.constant 0 : index
    %0 = vector.load %arg1[%c0, %c0_0, %c0_1] : memref<1x256x128xbf16, #tpu.memory_space<vmem>>, vector<1x256x128xbf16>
    %1 = vector.shape_cast %0 : vector<1x256x128xbf16> to vector<256x128xbf16>
    %2 = arith.extf %1 : vector<256x128xbf16> to vector<256x128xf32>
    %3 = tpu.iota {dimensions = array<i32: 0>} : vector<256x1xi32>
    %c15_i32 = arith.constant 15 : i32
    %4 = vector.broadcast %c15_i32 : i32 to vector<256x1xi32>
    %5 = arith.andi %3, %4 : vector<256x1xi32>
    %c17_i32 = arith.constant 17 : i32
    %6 = tpu.dynamic_rotate %2 by %c17_i32 dim 0 : vector<256x128xf32>, i32 -> vector<256x128xf32>
    %c16_i32 = arith.constant 16 : i32
    %7 = vector.broadcast %c16_i32 : i32 to vector<256x1xi32>
    %8 = arith.cmpi sge, %3, %7 : vector<256x1xi32>
    %c1_i32 = arith.constant 1 : i32
    %9 = vector.broadcast %c1_i32 : i32 to vector<256x1xi32>
    %10 = arith.cmpi sge, %5, %9 : vector<256x1xi32>
    %11 = arith.andi %8, %10 : vector<256x1xi1>
    %12 = arith.extui %11 : vector<256x1xi1> to vector<256x1xi32>
    %13 = arith.sitofp %12 : vector<256x1xi32> to vector<256x1xf32>
    %14 = vector.broadcast %13 : vector<256x1xf32> to vector<256x128xf32>
    %15 = arith.mulf %6, %14 : vector<256x128xf32>
    %16 = arith.truncf %15 : vector<256x128xf32> to vector<256x128xbf16>
    %c16_i32_2 = arith.constant 16 : i32
    %17 = tpu.dynamic_rotate %2 by %c16_i32_2 dim 0 : vector<256x128xf32>, i32 -> vector<256x128xf32>
    %c16_i32_3 = arith.constant 16 : i32
    %18 = vector.broadcast %c16_i32_3 : i32 to vector<256x1xi32>
    %19 = arith.cmpi sge, %3, %18 : vector<256x1xi32>
    %20 = arith.extui %19 : vector<256x1xi1> to vector<256x1xi32>
    %21 = arith.sitofp %20 : vector<256x1xi32> to vector<256x1xf32>
    %22 = vector.broadcast %21 : vector<256x1xf32> to vector<256x128xf32>
    %23 = arith.mulf %17, %22 : vector<256x128xf32>
    %24 = arith.truncf %23 : vector<256x128xf32> to vector<256x128xbf16>
    %c15_i32_4 = arith.constant 15 : i32
    %25 = tpu.dynamic_rotate %2 by %c15_i32_4 dim 0 : vector<256x128xf32>, i32 -> vector<256x128xf32>
    %c16_i32_5 = arith.constant 16 : i32
    %26 = vector.broadcast %c16_i32_5 : i32 to vector<256x1xi32>
    %27 = arith.cmpi sge, %3, %26 : vector<256x1xi32>
    %c15_i32_6 = arith.constant 15 : i32
    %28 = vector.broadcast %c15_i32_6 : i32 to vector<256x1xi32>
    %29 = arith.cmpi slt, %5, %28 : vector<256x1xi32>
    %30 = arith.andi %27, %29 : vector<256x1xi1>
    %31 = arith.extui %30 : vector<256x1xi1> to vector<256x1xi32>
    %32 = arith.sitofp %31 : vector<256x1xi32> to vector<256x1xf32>
    %33 = vector.broadcast %32 : vector<256x1xf32> to vector<256x128xf32>
    %34 = arith.mulf %25, %33 : vector<256x128xf32>
    %35 = arith.truncf %34 : vector<256x128xf32> to vector<256x128xbf16>
    %c1_i32_7 = arith.constant 1 : i32
    %36 = tpu.dynamic_rotate %2 by %c1_i32_7 dim 0 : vector<256x128xf32>, i32 -> vector<256x128xf32>
    %c1_i32_8 = arith.constant 1 : i32
    %37 = vector.broadcast %c1_i32_8 : i32 to vector<256x1xi32>
    %38 = arith.cmpi sge, %5, %37 : vector<256x1xi32>
    %39 = arith.extui %38 : vector<256x1xi1> to vector<256x1xi32>
    %40 = arith.sitofp %39 : vector<256x1xi32> to vector<256x1xf32>
    %41 = vector.broadcast %40 : vector<256x1xf32> to vector<256x128xf32>
    %42 = arith.mulf %36, %41 : vector<256x128xf32>
    %43 = arith.truncf %42 : vector<256x128xf32> to vector<256x128xbf16>
    %44 = arith.truncf %2 : vector<256x128xf32> to vector<256x128xbf16>
    %c255_i32 = arith.constant 255 : i32
    %45 = tpu.dynamic_rotate %2 by %c255_i32 dim 0 : vector<256x128xf32>, i32 -> vector<256x128xf32>
    %c15_i32_9 = arith.constant 15 : i32
    %46 = vector.broadcast %c15_i32_9 : i32 to vector<256x1xi32>
    %47 = arith.cmpi slt, %5, %46 : vector<256x1xi32>
    %48 = arith.extui %47 : vector<256x1xi1> to vector<256x1xi32>
    %49 = arith.sitofp %48 : vector<256x1xi32> to vector<256x1xf32>
    %50 = vector.broadcast %49 : vector<256x1xf32> to vector<256x128xf32>
    %51 = arith.mulf %45, %50 : vector<256x128xf32>
    %52 = arith.truncf %51 : vector<256x128xf32> to vector<256x128xbf16>
    %c241_i32 = arith.constant 241 : i32
    %53 = tpu.dynamic_rotate %2 by %c241_i32 dim 0 : vector<256x128xf32>, i32 -> vector<256x128xf32>
    %c240_i32 = arith.constant 240 : i32
    %54 = vector.broadcast %c240_i32 : i32 to vector<256x1xi32>
    %55 = arith.cmpi slt, %3, %54 : vector<256x1xi32>
    %c1_i32_10 = arith.constant 1 : i32
    %56 = vector.broadcast %c1_i32_10 : i32 to vector<256x1xi32>
    %57 = arith.cmpi sge, %5, %56 : vector<256x1xi32>
    %58 = arith.andi %55, %57 : vector<256x1xi1>
    %59 = arith.extui %58 : vector<256x1xi1> to vector<256x1xi32>
    %60 = arith.sitofp %59 : vector<256x1xi32> to vector<256x1xf32>
    %61 = vector.broadcast %60 : vector<256x1xf32> to vector<256x128xf32>
    %62 = arith.mulf %53, %61 : vector<256x128xf32>
    %63 = arith.truncf %62 : vector<256x128xf32> to vector<256x128xbf16>
    %c240_i32_11 = arith.constant 240 : i32
    %64 = tpu.dynamic_rotate %2 by %c240_i32_11 dim 0 : vector<256x128xf32>, i32 -> vector<256x128xf32>
    %c240_i32_12 = arith.constant 240 : i32
    %65 = vector.broadcast %c240_i32_12 : i32 to vector<256x1xi32>
    %66 = arith.cmpi slt, %3, %65 : vector<256x1xi32>
    %67 = arith.extui %66 : vector<256x1xi1> to vector<256x1xi32>
    %68 = arith.sitofp %67 : vector<256x1xi32> to vector<256x1xf32>
    %69 = vector.broadcast %68 : vector<256x1xf32> to vector<256x128xf32>
    %70 = arith.mulf %64, %69 : vector<256x128xf32>
    %71 = arith.truncf %70 : vector<256x128xf32> to vector<256x128xbf16>
    %c239_i32 = arith.constant 239 : i32
    %72 = tpu.dynamic_rotate %2 by %c239_i32 dim 0 : vector<256x128xf32>, i32 -> vector<256x128xf32>
    %c240_i32_13 = arith.constant 240 : i32
    %73 = vector.broadcast %c240_i32_13 : i32 to vector<256x1xi32>
    %74 = arith.cmpi slt, %3, %73 : vector<256x1xi32>
    %c15_i32_14 = arith.constant 15 : i32
    %75 = vector.broadcast %c15_i32_14 : i32 to vector<256x1xi32>
    %76 = arith.cmpi slt, %5, %75 : vector<256x1xi32>
    %77 = arith.andi %74, %76 : vector<256x1xi1>
    %78 = arith.extui %77 : vector<256x1xi1> to vector<256x1xi32>
    %79 = arith.sitofp %78 : vector<256x1xi32> to vector<256x1xf32>
    %80 = vector.broadcast %79 : vector<256x1xf32> to vector<256x128xf32>
    %81 = arith.mulf %72, %80 : vector<256x128xf32>
    %82 = arith.truncf %81 : vector<256x128xf32> to vector<256x128xbf16>
    %83 = tpu.concatenate %16, %24, %35, %43, %44, %52, %63, %71, %82 in 1 : vector<256x128xbf16>, vector<256x128xbf16>, vector<256x128xbf16>, vector<256x128xbf16>, vector<256x128xbf16>, vector<256x128xbf16>, vector<256x128xbf16>, vector<256x128xbf16>, vector<256x128xbf16> -> vector<256x1152xbf16>
    %c0_15 = arith.constant 0 : index
    %c0_16 = arith.constant 0 : index
    %84 = vector.load %arg2[%c0_15, %c0_16] : memref<1152x64xbf16, #tpu.memory_space<vmem>>, vector<1152x64xbf16>
    %cst = arith.constant dense<0.000000e+00> : vector<256x64xf32>
    %85 = tpu.matmul %83, %84, %cst {dimension_numbers = #tpu.dot_dimension_numbers<[1], [0], [0], [1], [0, 0, 1, 1], [], []>} : vector<256x1152xbf16>, vector<1152x64xbf16>, vector<256x64xf32> -> vector<256x64xf32>
    %c0_17 = arith.constant 0 : index
    %c0_18 = arith.constant 0 : index
    %86 = vector.load %arg3[%c0_17, %c0_18] : memref<2x64xf32, #tpu.memory_space<vmem>>, vector<1x64xf32>
    %87 = vector.broadcast %86 : vector<1x64xf32> to vector<256x64xf32>
    %88 = arith.mulf %85, %87 : vector<256x64xf32>
    %c1 = arith.constant 1 : index
    %c0_19 = arith.constant 0 : index
    %89 = vector.load %arg3[%c1, %c0_19] : memref<2x64xf32, #tpu.memory_space<vmem>>, vector<1x64xf32>
    %90 = vector.broadcast %89 : vector<1x64xf32> to vector<256x64xf32>
    %91 = arith.addf %88, %90 : vector<256x64xf32>
    %cst_20 = arith.constant 0.000000e+00 : f32
    %92 = vector.broadcast %cst_20 : f32 to vector<256x64xf32>
    %93 = arith.maximumf %91, %92 : vector<256x64xf32>
    %c255_i32_21 = arith.constant 255 : i32
    %94 = tpu.dynamic_rotate %93 by %c255_i32_21 dim 0 : vector<256x64xf32>, i32 -> vector<256x64xf32>
    %95 = arith.maximumf %93, %94 : vector<256x64xf32>
    %c240_i32_22 = arith.constant 240 : i32
    %96 = tpu.dynamic_rotate %95 by %c240_i32_22 dim 0 : vector<256x64xf32>, i32 -> vector<256x64xf32>
    %97 = arith.maximumf %95, %96 : vector<256x64xf32>
    %c0_23 = arith.constant 0 : index
    %c0_24 = arith.constant 0 : index
    %98 = vector.load %arg4[%c0_23, %c0_24] : memref<64x256xbf16, #tpu.memory_space<vmem>>, vector<64x256xbf16>
    %99 = arith.truncf %97 : vector<256x64xf32> to vector<256x64xbf16>
    %cst_25 = arith.constant dense<0.000000e+00> : vector<64x64xf32>
    %100 = tpu.matmul %98, %99, %cst_25 {dimension_numbers = #tpu.dot_dimension_numbers<[1], [0], [0], [1], [0, 0, 1, 1], [], []>} : vector<64x256xbf16>, vector<256x64xbf16>, vector<64x64xf32> -> vector<64x64xf32>
    %101 = tpu.iota {dimensions = array<i32: 0>} : vector<64x1xi32>
    %c7_i32 = arith.constant 7 : i32
    %102 = vector.broadcast %c7_i32 : i32 to vector<64x1xi32>
    %103 = arith.andi %101, %102 : vector<64x1xi32>
    %c9_i32 = arith.constant 9 : i32
    %104 = tpu.dynamic_rotate %100 by %c9_i32 dim 0 : vector<64x64xf32>, i32 -> vector<64x64xf32>
    %c8_i32 = arith.constant 8 : i32
    %105 = vector.broadcast %c8_i32 : i32 to vector<64x1xi32>
    %106 = arith.cmpi sge, %101, %105 : vector<64x1xi32>
    %c1_i32_26 = arith.constant 1 : i32
    %107 = vector.broadcast %c1_i32_26 : i32 to vector<64x1xi32>
    %108 = arith.cmpi sge, %103, %107 : vector<64x1xi32>
    %109 = arith.andi %106, %108 : vector<64x1xi1>
    %110 = arith.extui %109 : vector<64x1xi1> to vector<64x1xi32>
    %111 = arith.sitofp %110 : vector<64x1xi32> to vector<64x1xf32>
    %112 = vector.broadcast %111 : vector<64x1xf32> to vector<64x64xf32>
    %113 = arith.mulf %104, %112 : vector<64x64xf32>
    %114 = arith.truncf %113 : vector<64x64xf32> to vector<64x64xbf16>
    %c8_i32_27 = arith.constant 8 : i32
    %115 = tpu.dynamic_rotate %100 by %c8_i32_27 dim 0 : vector<64x64xf32>, i32 -> vector<64x64xf32>
    %c8_i32_28 = arith.constant 8 : i32
    %116 = vector.broadcast %c8_i32_28 : i32 to vector<64x1xi32>
    %117 = arith.cmpi sge, %101, %116 : vector<64x1xi32>
    %118 = arith.extui %117 : vector<64x1xi1> to vector<64x1xi32>
    %119 = arith.sitofp %118 : vector<64x1xi32> to vector<64x1xf32>
    %120 = vector.broadcast %119 : vector<64x1xf32> to vector<64x64xf32>
    %121 = arith.mulf %115, %120 : vector<64x64xf32>
    %122 = arith.truncf %121 : vector<64x64xf32> to vector<64x64xbf16>
    %c7_i32_29 = arith.constant 7 : i32
    %123 = tpu.dynamic_rotate %100 by %c7_i32_29 dim 0 : vector<64x64xf32>, i32 -> vector<64x64xf32>
    %c8_i32_30 = arith.constant 8 : i32
    %124 = vector.broadcast %c8_i32_30 : i32 to vector<64x1xi32>
    %125 = arith.cmpi sge, %101, %124 : vector<64x1xi32>
    %c7_i32_31 = arith.constant 7 : i32
    %126 = vector.broadcast %c7_i32_31 : i32 to vector<64x1xi32>
    %127 = arith.cmpi slt, %103, %126 : vector<64x1xi32>
    %128 = arith.andi %125, %127 : vector<64x1xi1>
    %129 = arith.extui %128 : vector<64x1xi1> to vector<64x1xi32>
    %130 = arith.sitofp %129 : vector<64x1xi32> to vector<64x1xf32>
    %131 = vector.broadcast %130 : vector<64x1xf32> to vector<64x64xf32>
    %132 = arith.mulf %123, %131 : vector<64x64xf32>
    %133 = arith.truncf %132 : vector<64x64xf32> to vector<64x64xbf16>
    %c1_i32_32 = arith.constant 1 : i32
    %134 = tpu.dynamic_rotate %100 by %c1_i32_32 dim 0 : vector<64x64xf32>, i32 -> vector<64x64xf32>
    %c1_i32_33 = arith.constant 1 : i32
    %135 = vector.broadcast %c1_i32_33 : i32 to vector<64x1xi32>
    %136 = arith.cmpi sge, %103, %135 : vector<64x1xi32>
    %137 = arith.extui %136 : vector<64x1xi1> to vector<64x1xi32>
    %138 = arith.sitofp %137 : vector<64x1xi32> to vector<64x1xf32>
    %139 = vector.broadcast %138 : vector<64x1xf32> to vector<64x64xf32>
    %140 = arith.mulf %134, %139 : vector<64x64xf32>
    %141 = arith.truncf %140 : vector<64x64xf32> to vector<64x64xbf16>
    %142 = arith.truncf %100 : vector<64x64xf32> to vector<64x64xbf16>
    %c63_i32 = arith.constant 63 : i32
    %143 = tpu.dynamic_rotate %100 by %c63_i32 dim 0 : vector<64x64xf32>, i32 -> vector<64x64xf32>
    %c7_i32_34 = arith.constant 7 : i32
    %144 = vector.broadcast %c7_i32_34 : i32 to vector<64x1xi32>
    %145 = arith.cmpi slt, %103, %144 : vector<64x1xi32>
    %146 = arith.extui %145 : vector<64x1xi1> to vector<64x1xi32>
    %147 = arith.sitofp %146 : vector<64x1xi32> to vector<64x1xf32>
    %148 = vector.broadcast %147 : vector<64x1xf32> to vector<64x64xf32>
    %149 = arith.mulf %143, %148 : vector<64x64xf32>
    %150 = arith.truncf %149 : vector<64x64xf32> to vector<64x64xbf16>
    %c57_i32 = arith.constant 57 : i32
    %151 = tpu.dynamic_rotate %100 by %c57_i32 dim 0 : vector<64x64xf32>, i32 -> vector<64x64xf32>
    %c56_i32 = arith.constant 56 : i32
    %152 = vector.broadcast %c56_i32 : i32 to vector<64x1xi32>
    %153 = arith.cmpi slt, %101, %152 : vector<64x1xi32>
    %c1_i32_35 = arith.constant 1 : i32
    %154 = vector.broadcast %c1_i32_35 : i32 to vector<64x1xi32>
    %155 = arith.cmpi sge, %103, %154 : vector<64x1xi32>
    %156 = arith.andi %153, %155 : vector<64x1xi1>
    %157 = arith.extui %156 : vector<64x1xi1> to vector<64x1xi32>
    %158 = arith.sitofp %157 : vector<64x1xi32> to vector<64x1xf32>
    %159 = vector.broadcast %158 : vector<64x1xf32> to vector<64x64xf32>
    %160 = arith.mulf %151, %159 : vector<64x64xf32>
    %161 = arith.truncf %160 : vector<64x64xf32> to vector<64x64xbf16>
    %c56_i32_36 = arith.constant 56 : i32
    %162 = tpu.dynamic_rotate %100 by %c56_i32_36 dim 0 : vector<64x64xf32>, i32 -> vector<64x64xf32>
    %c56_i32_37 = arith.constant 56 : i32
    %163 = vector.broadcast %c56_i32_37 : i32 to vector<64x1xi32>
    %164 = arith.cmpi slt, %101, %163 : vector<64x1xi32>
    %165 = arith.extui %164 : vector<64x1xi1> to vector<64x1xi32>
    %166 = arith.sitofp %165 : vector<64x1xi32> to vector<64x1xf32>
    %167 = vector.broadcast %166 : vector<64x1xf32> to vector<64x64xf32>
    %168 = arith.mulf %162, %167 : vector<64x64xf32>
    %169 = arith.truncf %168 : vector<64x64xf32> to vector<64x64xbf16>
    %c55_i32 = arith.constant 55 : i32
    %170 = tpu.dynamic_rotate %100 by %c55_i32 dim 0 : vector<64x64xf32>, i32 -> vector<64x64xf32>
    %c56_i32_38 = arith.constant 56 : i32
    %171 = vector.broadcast %c56_i32_38 : i32 to vector<64x1xi32>
    %172 = arith.cmpi slt, %101, %171 : vector<64x1xi32>
    %c7_i32_39 = arith.constant 7 : i32
    %173 = vector.broadcast %c7_i32_39 : i32 to vector<64x1xi32>
    %174 = arith.cmpi slt, %103, %173 : vector<64x1xi32>
    %175 = arith.andi %172, %174 : vector<64x1xi1>
    %176 = arith.extui %175 : vector<64x1xi1> to vector<64x1xi32>
    %177 = arith.sitofp %176 : vector<64x1xi32> to vector<64x1xf32>
    %178 = vector.broadcast %177 : vector<64x1xf32> to vector<64x64xf32>
    %179 = arith.mulf %170, %178 : vector<64x64xf32>
    %180 = arith.truncf %179 : vector<64x64xf32> to vector<64x64xbf16>
    %181 = tpu.concatenate %114, %122, %133, %141, %142, %150, %161, %169, %180 in 1 : vector<64x64xbf16>, vector<64x64xbf16>, vector<64x64xbf16>, vector<64x64xbf16>, vector<64x64xbf16>, vector<64x64xbf16>, vector<64x64xbf16>, vector<64x64xbf16>, vector<64x64xbf16> -> vector<64x576xbf16>
    %c0_40 = arith.constant 0 : index
    %c0_41 = arith.constant 0 : index
    %182 = vector.load %arg5[%c0_40, %c0_41] : memref<576x64xbf16, #tpu.memory_space<vmem>>, vector<576x64xbf16>
    %cst_42 = arith.constant dense<0.000000e+00> : vector<64x64xf32>
    %183 = tpu.matmul %181, %182, %cst_42 {dimension_numbers = #tpu.dot_dimension_numbers<[1], [0], [0], [1], [0, 0, 1, 1], [], []>} : vector<64x576xbf16>, vector<576x64xbf16>, vector<64x64xf32> -> vector<64x64xf32>
    %c0_43 = arith.constant 0 : index
    %c0_44 = arith.constant 0 : index
    %184 = vector.load %arg6[%c0_43, %c0_44] : memref<2x64xf32, #tpu.memory_space<vmem>>, vector<1x64xf32>
    %185 = vector.broadcast %184 : vector<1x64xf32> to vector<64x64xf32>
    %186 = arith.mulf %183, %185 : vector<64x64xf32>
    %c1_45 = arith.constant 1 : index
    %c0_46 = arith.constant 0 : index
    %187 = vector.load %arg6[%c1_45, %c0_46] : memref<2x64xf32, #tpu.memory_space<vmem>>, vector<1x64xf32>
    %188 = vector.broadcast %187 : vector<1x64xf32> to vector<64x64xf32>
    %189 = arith.addf %186, %188 : vector<64x64xf32>
    %cst_47 = arith.constant 0.000000e+00 : f32
    %190 = vector.broadcast %cst_47 : f32 to vector<64x64xf32>
    %191 = arith.maximumf %189, %190 : vector<64x64xf32>
    %c63_i32_48 = arith.constant 63 : i32
    %192 = tpu.dynamic_rotate %191 by %c63_i32_48 dim 0 : vector<64x64xf32>, i32 -> vector<64x64xf32>
    %193 = arith.maximumf %191, %192 : vector<64x64xf32>
    %c56_i32_49 = arith.constant 56 : i32
    %194 = tpu.dynamic_rotate %193 by %c56_i32_49 dim 0 : vector<64x64xf32>, i32 -> vector<64x64xf32>
    %195 = arith.maximumf %193, %194 : vector<64x64xf32>
    %c0_50 = arith.constant 0 : index
    %c0_51 = arith.constant 0 : index
    %196 = vector.load %arg7[%c0_50, %c0_51] : memref<16x64xbf16, #tpu.memory_space<vmem>>, vector<16x64xbf16>
    %197 = arith.truncf %195 : vector<64x64xf32> to vector<64x64xbf16>
    %cst_52 = arith.constant dense<0.000000e+00> : vector<16x64xf32>
    %198 = tpu.matmul %196, %197, %cst_52 {dimension_numbers = #tpu.dot_dimension_numbers<[1], [0], [0], [1], [0, 0, 1, 1], [], []>} : vector<16x64xbf16>, vector<64x64xbf16>, vector<16x64xf32> -> vector<16x64xf32>
    %c0_53 = arith.constant 0 : index
    %c0_54 = arith.constant 0 : index
    %c0_55 = arith.constant 0 : index
    %199 = vector.load %arg8[%c0_53, %c0_54, %c0_55] : memref<1x16x64xf32, #tpu.memory_space<vmem>>, vector<1x16x64xf32>
    %200 = vector.shape_cast %199 : vector<1x16x64xf32> to vector<16x64xf32>
    %201 = vector.shape_cast %198 : vector<16x64xf32> to vector<1x16x64xf32>
    tpu.vector_store %arg8[%c0_53, %c0_54, %c0_55], %201 {strides = array<i32>} : memref<1x16x64xf32, #tpu.memory_space<vmem>>, vector<1x16x64xf32>,
    return
  }
  func.func @transform_0(%arg0: i32) -> (i32, i32, i32) {
    %c0_i32 = arith.constant 0 : i32
    %c0_i32_0 = arith.constant 0 : i32
    %c0_i32_1 = arith.constant 0 : i32
    return %arg0, %c0_i32, %c0_i32_0 : i32, i32, i32
  }
  func.func @transform_1(%arg0: i32) -> (i32, i32) {
    %c0_i32 = arith.constant 0 : i32
    %c0_i32_0 = arith.constant 0 : i32
    %c0_i32_1 = arith.constant 0 : i32
    return %c0_i32, %c0_i32_0 : i32, i32
  }
  func.func @transform_2(%arg0: i32) -> (i32, i32) {
    %c0_i32 = arith.constant 0 : i32
    %c0_i32_0 = arith.constant 0 : i32
    %c0_i32_1 = arith.constant 0 : i32
    return %c0_i32, %c0_i32_0 : i32, i32
  }
  func.func @transform_3(%arg0: i32) -> (i32, i32) {
    %c0_i32 = arith.constant 0 : i32
    %c0_i32_0 = arith.constant 0 : i32
    %c0_i32_1 = arith.constant 0 : i32
    return %c0_i32, %c0_i32_0 : i32, i32
  }
  func.func @transform_4(%arg0: i32) -> (i32, i32) {
    %c0_i32 = arith.constant 0 : i32
    %c0_i32_0 = arith.constant 0 : i32
    %c0_i32_1 = arith.constant 0 : i32
    return %c0_i32, %c0_i32_0 : i32, i32
  }
  func.func @transform_5(%arg0: i32) -> (i32, i32) {
    %c0_i32 = arith.constant 0 : i32
    %c0_i32_0 = arith.constant 0 : i32
    %c0_i32_1 = arith.constant 0 : i32
    return %c0_i32, %c0_i32_0 : i32, i32
  }
  func.func @transform_6(%arg0: i32) -> (i32, i32) {
    %c0_i32 = arith.constant 0 : i32
    %c0_i32_0 = arith.constant 0 : i32
    %c0_i32_1 = arith.constant 0 : i32
    return %c0_i32, %c0_i32_0 : i32, i32
  }
  func.func @transform_7(%arg0: i32) -> (i32, i32, i32) {
    %c0_i32 = arith.constant 0 : i32
    %c0_i32_0 = arith.constant 0 : i32
    %c0_i32_1 = arith.constant 0 : i32
    return %arg0, %c0_i32, %c0_i32_0 : i32, i32, i32
  }
}

</mosaic_0001>

<bundles_post_ra>
// kernel: relation_network_forward.1
= control target key start
LH: loop header
LB: loop body
LE: loop exit
PB: predicated region body
PF: predicated region fallthrough
CT: control target
= control target key end

     0   :  { %s5867_s24 = smov 0   ;;  %s8191_s0 = inlined_call_operand.vmem [shape: bf16[2,256,128], index: 0, kind: input, shape index: {}]   ;;  %s8192_s1 = inlined_call_operand.vmem [shape: bf16[1152,64], index: 1, kind: input, shape index: {}]   ;;  %s8193_s2 = inlined_call_operand.vmem [shape: f32[2,64], index: 2, kind: input, shape index: {}]   ;;  %s8194_s3 = inlined_call_operand.vmem [shape: bf16[64,256], index: 3, kind: input, shape index: {}]   ;;  %s8195_s4 = inlined_call_operand.vmem [shape: bf16[576,64], index: 4, kind: input, shape index: {}]   ;;  %s8196_s5 = inlined_call_operand.vmem [shape: f32[2,64], index: 5, kind: input, shape index: {}]   ;;  %s8197_s6 = inlined_call_operand.vmem [shape: bf16[16,64], index: 6, kind: input, shape index: {}]   ;;  %s8198_s7 = inlined_call_operand.vmem [shape: f32[2,16,64], index: 7, kind: output, shape index: {}]  }
   0x1 LB: > { %s4649_s25 = sadd.s32 4294967295, %s5822_s24   ;;  %p4653_p0 = scmp.ge.s32.totalorder %s5822_s24, 1  ;;  %s5822_s24 = sphi %s5867_s24, %s17_s24  }
   0x2   : > { %p237_p1 = scmp.lt.s32.totalorder %s5822_s24, 3 }
   0x4   : > { %p238_p2 = pnand %p4653_p0, %p237_p1 }
   0x6   : > { %241 = sbr.rel (%p238_p2) target bundleno = 1473 (0x5c1), region = 48 }
   0xd   : > { %v5662_v0 = vld [vmem:[%s8192_s1 + $0x40] sm:$0xff]   ;;  %v344_v4 = vlaneseq  ;;  %v5666_v5 = vld [vmem:[%s8192_s1 + $0x48] sm:$0xff]   ;;  %v5670_v10 = vld [vmem:[%s8192_s1 + $0x50] sm:$0xff]   ;;  %p269_p3 = scmp.lt.s32.totalorder %s4649_s25, 1  ;;  %v8201_v25 = vmov 0.0   ;;  %s5825_s23 = smov 64  }
   0xe   : > { %v5663_v1 = vld [vmem:[%s8192_s1 + $0xc0] sm:$0xff]   ;;  %4970 = vmatprep.subr.bf16.mxu0 %v5662_v0  ;;  %v5667_v6 = vld [vmem:[%s8192_s1 + $0xc8] sm:$0xff]   ;;  %v5671_v11 = vld [vmem:[%s8192_s1 + $0xd0] sm:$0xff]  }
   0xf   : > { %v5664_v2 = vld [vmem:[%s8192_s1] sm:$0xff]   ;;  %5082 = vmatprep.subr.bf16.mxu1 %v5663_v1  ;;  %v5668_v7 = vld [vmem:[%s8192_s1 + $0x8] sm:$0xff]   ;;  %v5899_v9 = vshrl.u32 %v344_v4, 7  ;;  %v5672_v12 = vld [vmem:[%s8192_s1 + $0x10] sm:$0xff]   ;;  %s8546_s25 = smov (!%p269_p3, %s4649_s25), 1 }
  0x10   : > { %v5665_v3 = vld [vmem:[%s8192_s1 + $0x80] sm:$0xff]   ;;  %4971 = vmatpush3.bf16.msra.mxu0 %v5664_v2  ;;  %v5669_v8 = vld [vmem:[%s8192_s1 + $0x88] sm:$0xff]   ;;  %v5673_v13 = vld [vmem:[%s8192_s1 + $0x90] sm:$0xff]   ;;  %s4968_s18 = sshll.u32 %s8546_s25, 7 }
  0x11   : > { %5083 = vmatpush3.bf16.msra.mxu1 %v5665_v3  ;;  %4972 = vmatprep.subr.bf16.mxu0 %v5666_v5  ;;  %8317 = vst [vmem:[#allocation2_spill] sm:$0xff] %v5899_v9  ;;  %v377_v14 = vand.u32 15, %v5899_v9  ;;  %v5674_v15 = vld [vmem:[%s8192_s1 + $0x58] sm:$0xff]   ;;  %v5678_v19 = vld [vmem:[%s8192_s1 + $0x60] sm:$0xff]   ;;  %v5936_v20 = vadd.s32 16, %v5899_v9  ;;  %v5946_v23 = vadd.s32 24, %v5899_v9  ;;  %s6012_s27 = scalar_lea.vmem %s8191_s0, %s4968_s18 }
  0x12   : > { %5084 = vmatprep.subr.bf16.mxu1 %v5667_v6  ;;  %v5675_v16 = vld [vmem:[%s8192_s1 + $0xd8] sm:$0xff]   ;;  %v5679_v21 = vld [vmem:[%s8192_s1 + $0xe0] sm:$0xff]   ;;  %v5682_v27 = vld [vmem:[%s8192_s1 + $0x68] sm:$0xff]   ;;  %v5962_v30 = vadd.s32 32, %v5899_v9  ;;  %v5972_v34 = vadd.s32 40, %v5899_v9  ;;  %vm826_vm3 = vcmp.lt.s32.totalorder %v5899_v9, 7 }
  0x13   : > { %v5676_v17 = vld [vmem:[%s8192_s1 + $0x18] sm:$0xff]   ;;  %vm506_vm0 = vcmp.ge.s32.totalorder %v377_v14, 1  ;;  %8318 = vst [vmem:[#allocation3_spill] sm:$0xff] %v5936_v20  ;;  %v5680_v22 = vld [vmem:[%s8192_s1 + $0x20] sm:$0xff]   ;;  %8319 = vst [vmem:[#allocation4_spill] sm:$0xff] %v5946_v23  ;;  %v379_v28 = vand.u32 15, %v5936_v20 }
  0x14   : > { %4973 = vmatpush3.bf16.msra.mxu0 %v5668_v7  ;;  %v5677_v18 = vld [vmem:[%s8192_s1 + $0x98] sm:$0xff]   ;;  %v5681_v24 = vld [vmem:[%s8192_s1 + $0xa0] sm:$0xff]   ;;  %v5952_v26 = vsel %vm506_vm0, 1.0, %v8201_v25  ;;  %v5683_v29 = vld [vmem:[%s8192_s1 + $0xe8] sm:$0xff]   ;;  %8320 = vst [vmem:[#allocation5_spill] sm:$0xff] %v5962_v30  ;;  %v380_v32 = vand.u32 15, %v5946_v23 }
  0x15   : > { %5085 = vmatpush3.bf16.msra.mxu1 %v5669_v8  ;;  %4974 = vmatprep.subr.bf16.mxu0 %v5670_v10  ;;  %v5684_v31 = vld [vmem:[%s8192_s1 + $0x28] sm:$0xff]   ;;  %8321 = vst [vmem:[#allocation6_spill] sm:$0xff] %v5972_v34  ;;  %v5686_v35 = vld [vmem:[%s8192_s1 + $0x70] sm:$0xff]   ;;  %vm5977_vm1 = vcmp.ge.s32.totalorder %v379_v28, 1  ;;  %v381_v38 = vand.u32 15, %v5962_v30  ;;  %v382_v42 = vand.u32 15, %v5972_v34 }
  0x16   : > { %5086 = vmatprep.subr.bf16.mxu1 %v5671_v11  ;;  %v5685_v33 = vld [vmem:[%s8192_s1 + $0xa8] sm:$0xff]   ;;  %v5687_v37 = vld [vmem:[%s8192_s1 + $0xf0] sm:$0xff]   ;;  %vm5988_vm2 = vcmp.lt.s32.totalorder %v380_v32, 15  ;;  %v5690_v43 = vld [vmem:[%s8192_s1 + $0x78] sm:$0xff]   ;;  %vm441_vm4 = vcmp.lt.s32.totalorder %v5899_v9, 1  ;;  %v6002_v44 = vadd.s32 48, %v5899_v9 }
  0x17   : > { %v5688_v39 = vld [vmem:[%s8192_s1 + $0x30] sm:$0xff]   ;;  %v5691_v45 = vld [vmem:[%s8192_s1 + $0xf8] sm:$0xff]   ;;  %vm510_vm5 = vcmp.ge.s32.totalorder %v381_v38, 1  ;;  %v6018_v47 = vadd.s32 56, %v5899_v9  ;;  %v6026_v49 = vsel %vm5977_vm1, 1.0, %v8201_v25  ;;  %v6030_v51 = vld [vmem:[%s6012_s27] sm:$0xff]  }
  0x18   : > { %4975 = vmatpush3.bf16.msra.mxu0 %v5672_v12  ;;  %v5689_v41 = vld [vmem:[%s8192_s1 + $0xb0] sm:$0xff]   ;;  %8326 = vst [vmem:[#allocation7_spill] sm:$0xff] %v6002_v44  ;;  %v5692_v46 = vld [vmem:[%s8192_s1 + $0x38] sm:$0xff]   ;;  %8328 = vst [vmem:[#allocation9_spill] sm:$0xff] %v6026_v49  ;;  %v6038_v53 = vsel %vm5988_vm2, 1.0, %v8201_v25  ;;  %v6041_v54 = vsel %vm510_vm5, 1.0, %v8201_v25  ;;  %v6047_v58 = vunpack.c.l.bf16 %v6030_v51  ;;  %v6050_v59 = vunpack.c.h.bf16 %v6030_v51 }
  0x19   : > { %5087 = vmatpush3.bf16.msra.mxu1 %v5673_v13  ;;  %4976 = vmatprep.subr.bf16.mxu0 %v5674_v15  ;;  %8327 = vst [vmem:[#allocation8_spill] sm:$0xff] %v6018_v47  ;;  %v5693_v48 = vld [vmem:[%s8192_s1 + $0xb8] sm:$0xff]   ;;  %v6033_v52 = vld [vmem:[%s6012_s27 + $0x8] sm:$0xff]   ;;  %8329 = vst [vmem:[#allocation10_spill] sm:$0xff] %v6041_v54  ;;  %v383_v55 = vand.u32 15, %v6002_v44  ;;  %vm6055_vm6 = vcmp.lt.s32.totalorder %v382_v42, 15 }
  0x1a   : > { %5088 = vmatprep.subr.bf16.mxu1 %v5675_v16  ;;  %v310_v50 = vld [vmem:[%s6012_s27 + $0x78] sm:$0xff]   ;;  %8330 = vst [vmem:[#allocation11_spill] sm:$0xff] %v6047_v58  ;;  %8331 = vst [vmem:[#allocation12_spill] sm:$0xff] %v6050_v59  ;;  %v6053_v60 = vld [vmem:[%s6012_s27 + $0x74] sm:$0xf]  ;;  %v314_v62 = vunpack.c.l.bf16 %v6033_v52  ;;  %v315_v63 = vunpack.c.h.bf16 %v6033_v52  ;;  %v384_v1 = vand.u32 15, %v6018_v47 }
  0x1b   : > { %v6044_v56 = vunpack.c.l.bf16 %v310_v50  ;;  %v343_v57 = vunpack.c.h.bf16 %v310_v50  ;;  %v8200_v0 = vunpack.c.l.bf16 %v6053_v60  ;;  %v409_v7 = vrot.slane %v6047_v58, 7  ;;  %v5706_v15 = vld [vmem:[%s8192_s1 + $0x140] sm:$0xff]   ;;  %v6130_v38 = vld [vmem:[%s6012_s27 + $0x10] sm:$0xff]   ;;  %v6137_v42 = vld [vmem:[%s6012_s27 + $0x18] sm:$0xff]  }
  0x1c   : > { %4977 = vmatpush3.bf16.msra.mxu0 %v5676_v17  ;;  %v410_v8 = vrot.slane %v6050_v59, 7  ;;  %v411_v10 = vrot.slane %v314_v62, 7  ;;  %v412_v12 = vrot.slane %v315_v63, 7  ;;  %vm6102_vm7 = vcmp.ge.s32.totalorder %v383_v55, 1  ;;  %v5708_v28 = vld [vmem:[%s8192_s1 + $0x1c0] sm:$0xff]   ;;  %8342 = vst [vmem:[#allocation19_spill] sm:$0xff] %v6130_v38 }
  0x1d   : > { %5089 = vmatpush3.bf16.msra.mxu1 %v5677_v18  ;;  %4978 = vmatprep.subr.bf16.mxu0 %v5678_v19  ;;  %v439_v2 = vrot.slane %v6044_v56, 7  ;;  %v746_v3 = vmul.f32 0.0, %v6044_v56  ;;  %v747_v4 = vmul.f32 0.0, %v343_v57  ;;  %v8199_v5 = vrot.slane %v6044_v56, 1  ;;  %8343 = vst [vmem:[#allocation20_spill] sm:$0xff] %v6137_v42  ;;  %v5733_v44 = vld [vmem:[%s8192_s1 + $0x170] sm:$0xff]  }
  0x1e   : > { %5090 = vmatprep.subr.bf16.mxu1 %v5679_v21  ;;  %v825_v6 = vrot.slane %v343_v57, 1  ;;  %v440_v13 = vrot.slane %v343_v57, 7  ;;  %v6070_v14 = vrot.slane %v8200_v0, 7  ;;  %v6077_v16 = vsel %vm441_vm4, %v410_v8, %v411_v10 }
  0x1f   : > { %v778_v11 = vpack.c.bf16 %v747_v4, %v746_v3  ;;  %v6081_v17 = vsel %vm441_vm4, %v409_v7, %v410_v8  ;;  %v794_v18 = vrot.slane %v6047_v58, 1  ;;  %v6092_v21 = vsel %vm441_vm4, %v411_v10, %v412_v12  ;;  %v5709_v3 = vld [vmem:[%s8192_s1 + $0x180] sm:$0xff]   ;;  %v5712_v8 = vld [vmem:[%s8192_s1 + $0x1c8] sm:$0xff]  }
  0x20   : > { %4979 = vmatpush3.bf16.msra.mxu0 %v5680_v22  ;;  %8334 = vst [vmem:[#allocation13_spill] sm:$0xff] %v6081_v17  ;;  %v6088_v19 = vsel %vm826_vm3, %v8199_v5, %v825_v6  ;;  %8336 = vst [vmem:[#allocation15_spill] sm:$0xff] %v6092_v21  ;;  %v6096_v22 = vsel %vm441_vm4, %v440_v13, %v409_v7  ;;  %v6118_v32 = vsel %vm441_vm4, %v6070_v14, %v439_v2  ;;  %v5710_v7 = vld [vmem:[%s8192_s1 + $0x148] sm:$0xff]  }
  0x21   : > { %5091 = vmatpush3.bf16.msra.mxu1 %v5681_v24  ;;  %4980 = vmatprep.subr.bf16.mxu0 %v5682_v27  ;;  %8335 = vst [vmem:[#allocation14_spill] sm:$0xff] %v6088_v19  ;;  %8337 = vst [vmem:[#allocation16_spill] sm:$0xff] %v6096_v22  ;;  %v6100_v24 = vmul.f32 %v5952_v26, %v6077_v16  ;;  %v634_v36 = vmul.f32 0.0, %v6118_v32  ;;  %v316_v57 = vunpack.c.l.bf16 %v6130_v38  ;;  %v6166_v61 = vsel %vm6102_vm7, 1.0, %v8201_v25  ;;  %v5724_v27 = vld [vmem:[%s8192_s1 + $0x160] sm:$0xff]  }
  0x22   : > { %5092 = vmatprep.subr.bf16.mxu1 %v5683_v29  ;;  %2395 = vmatprep.mubr.bf16.mxu0 %v778_v11  ;;  %v1099_v29 = vmul.f32 %v5952_v26, %v6096_v22  ;;  %8346 = vst [vmem:[#allocation23_spill] sm:$0xff] %v6166_v61  ;;  %vm6179_vm8 = vcmp.lt.s32.totalorder %v384_v1, 15  ;;  %v353_v1 = vadd.s32 64, %v5899_v9  ;;  %v359_v58 = vadd.s32 112, %v5899_v9 }
  0x23   : > { %8338 = vst [vmem:[#allocation17_spill] sm:$0xff] %v6100_v24  ;;  %v413_v11 = vrot.slane %v316_v57, 7 }
  0x24   : > { %4981 = vmatpush3.bf16.msra.mxu0 %v5684_v31  ;;  %v6113_v31 = vsel %vm441_vm4, %v439_v2, %v440_v13  ;;  %v6150_v2 = vsel %vm6055_vm6, 1.0, %v8201_v25  ;;  %v797_v13 = vrot.slane %v315_v63, 1  ;;  %v5711_v63 = vld [vmem:[%s8192_s1 + $0x108] sm:$0xff]   ;;  %v385_v5 = vand.u32 15, %v353_v1 }
  0x25   : > { %5093 = vmatpush3.bf16.msra.mxu1 %v5685_v33  ;;  %4982 = vmatprep.subr.bf16.mxu0 %v5686_v35  ;;  %v6122_v33 = vsel %vm826_vm3, %v825_v6, %v794_v18  ;;  %v635_v26 = vmul.f32 0.0, %v6113_v31  ;;  %8344 = vst [vmem:[#allocation21_spill] sm:$0xff] %v6150_v2  ;;  %v317_v6 = vunpack.c.h.bf16 %v6130_v38  ;;  %v5719_v35 = vld [vmem:[%s8192_s1 + $0x158] sm:$0xff]  }
  0x26   : > { %5094 = vmatprep.subr.bf16.mxu1 %v5687_v37  ;;  %8341 = vst [vmem:[#allocation18_spill] sm:$0xff] %v6122_v33  ;;  %v987_v37 = vmul.f32 0.0, %v6088_v19  ;;  %v988_v40 = vmul.f32 0.0, %v6122_v33  ;;  %vm6260_vm9 = vcmp.ge.s32.totalorder %v385_v5, 1  ;;  %v5723_v5 = vld [vmem:[%s8192_s1 + $0x198] sm:$0xff]  }
  0x28   : > { %4983 = vmatpush3.bf16.msra.mxu0 %v5688_v39  ;;  %v1131_v39 = vpack.c.bf16 %v6081_v17, %v1099_v29  ;;  %v1019_v50 = vpack.c.bf16 %v988_v40, %v987_v37  ;;  %v414_v29 = vrot.slane %v317_v6, 7 }
  0x29   : > { %5095 = vmatpush3.bf16.msra.mxu1 %v5689_v41  ;;  %4984 = vmatprep.subr.bf16.mxu0 %v5690_v43  ;;  %v1101_v41 = vmul.f32 %v6026_v49, %v6077_v16  ;;  %v5707_v43 = vld [vmem:[%s8192_s1 + $0x100] sm:$0xff]  }
  0x2a   : > { %5096 = vmatprep.subr.bf16.mxu1 %v5691_v45  ;;  %v666_v45 = vpack.c.bf16 %v635_v26, %v634_v36  ;;  %2556 = vmatprep.mubr.bf16.mxu1 %v1131_v39  ;;  %v318_v36 = vunpack.c.l.bf16 %v6137_v42  ;;  %v6193_v26 = vsel %vm441_vm4, %v412_v12, %v413_v11  ;;  %v6202_v39 = vsel %vm441_vm4, %v413_v11, %v414_v29  ;;  %v6208_v12 = vld [vmem:[%s6012_s27 + $0x20] sm:$0xff]  }
  0x2b   : > { %v1132_v55 = vpack.c.bf16 %v6092_v21, %v1101_v41  ;;  %8350 = vst [vmem:[#allocation25_spill] sm:$0xff] %v6193_v26  ;;  %8351 = vst [vmem:[#allocation26_spill] sm:$0xff] %v6202_v39  ;;  %v1103_v40 = vmul.f32 %v6041_v54, %v6193_v26  ;;  %v319_v41 = vunpack.c.h.bf16 %v6137_v42  ;;  %v638_v11 = vmul.f32 %v6041_v54, %v6077_v16  ;;  %v5721_v16 = vld [vmem:[%s8192_s1 + $0x1d8] sm:$0xff]   ;;  %v6624_v54 = vld [vmem:[%s6012_s27 + $0x60] sm:$0xff]  }
  0x2c   : > { %4985 = vmatpush3.bf16.msra.mxu0 %v5692_v46  ;;  %v795_v46 = vrot.slane %v6050_v59, 1  ;;  %8352 = vst [vmem:[#allocation27_spill] sm:$0xff] %v6208_v12  ;;  %v640_v1 = vmul.f32 %v6166_v61, %v6193_v26 }
  0x2d   : > { %5097 = vmatpush3.bf16.msra.mxu1 %v5693_v48  ;;  %5194 = vmatprep.subr.bf16.mxu0 %v5706_v15  ;;  %v6143_v48 = vrot.slane %v314_v62, 1  ;;  %v636_v62 = vmul.f32 %v6026_v49, %v6096_v22  ;;  %v6177_v15 = vrot.slane %v316_v57, 1  ;;  %v1133_v57 = vpack.c.bf16 %v6202_v39, %v1103_v40 }
  0x2e   : > { %5306 = vmatprep.subr.bf16.mxu1 %v5708_v28  ;;  %v6185_v28 = vsel %vm826_vm3, %v794_v18, %v795_v46  ;;  %v5714_v18 = vld [vmem:[%s8192_s1 + $0x188] sm:$0xff]   ;;  %v799_v40 = vrot.slane %v317_v6, 1  ;;  %v801_v47 = vrot.slane %v319_v41, 1 }
  0x2f   : > { %2396 = vmatmul.mubr.bf16.vlgmr.msra.gmra.mrb[0].mxu0 %v666_v45  ;;  %v6160_v4 = vsel %vm826_vm3, %v795_v46, %v6143_v48  ;;  %8349 = vst [vmem:[#allocation24_spill] sm:$0xff] %v6185_v28  ;;  %v667_v37 = vpack.c.bf16 %v6081_v17, %v636_v62  ;;  %v6214_v45 = vsel %vm826_vm3, %v797_v13, %v6177_v15  ;;  %v415_v46 = vrot.slane %v318_v36, 7  ;;  %v5717_v62 = vld [vmem:[%s8192_s1 + $0x1d0] sm:$0xff]  }
  0x30   : > { %8345 = vst [vmem:[#allocation22_spill] sm:$0xff] %v6160_v4  ;;  %2557 = vmatmul.mubr.bf16.vlgmr.msra.gmra.mrb[0].mxu1 %v1019_v50  ;;  %2403 = vmatprep.mubr.bf16.mxu0 %v6030_v51  ;;  %v990_v10 = vmul.f32 %v6038_v53, %v6160_v4  ;;  %v5715_v50 = vld [vmem:[%s8192_s1 + $0x150] sm:$0xff]   ;;  %v6252_v6 = vsel %vm826_vm3, %v6143_v48, %v797_v13  ;;  %v5720_v48 = vld [vmem:[%s8192_s1 + $0x118] sm:$0xff]   ;;  %v8375_v17 = vunpack.c.h.bf16 %v6208_v12 }
  0x31   : > { %2564 = vmatprep.mubr.bf16.mxu1 %v1132_v55  ;;  %5195 = vmatpush3.bf16.msra.mxu0 %v5707_v43  ;;  %v5716_v55 = vld [vmem:[%s8192_s1 + $0x110] sm:$0xff]   ;;  %v668_v13 = vpack.c.bf16 %v6092_v21, %v638_v11  ;;  %v6329_v34 = vsel %vm826_vm3, %v6177_v15, %v799_v40  ;;  %v5729_v15 = vld [vmem:[%s8192_s1 + $0x128] sm:$0xff]  }
  0x32   : > { %5307 = vmatpush3.bf16.msra.mxu1 %v5709_v3  ;;  %5196 = vmatprep.subr.bf16.mxu0 %v5710_v7  ;;  %v1020_v43 = vpack.c.bf16 %v990_v10, %v6185_v28  ;;  %v354_v3 = vadd.s32 72, %v5899_v9  ;;  %v416_v7 = vrot.slane %v319_v41, 7  ;;  %v5718_v10 = vld [vmem:[%s8192_s1 + $0x190] sm:$0xff]   ;;  %8365 = vst [vmem:[#allocation35_spill] sm:$0xff] %v6329_v34  ;;  %v803_v19 = vrot.slane %v8375_v17, 1 }
  0x33   : > { %5308 = vmatprep.subr.bf16.mxu1 %v5712_v8  ;;  %v6229_v8 = vsel %vm441_vm4, %v414_v29, %v415_v46  ;;  %v6242_v29 = vrot.slane %v318_v36, 1 }
  0x34   : > { %8353 = vst [vmem:[#allocation28_spill] sm:$0xff] %v6229_v8  ;;  %v6258_v36 = vsel %vm441_vm4, %v415_v46, %v416_v7  ;;  %v6274_v46 = vsel %vm6179_vm8, 1.0, %v8201_v25 }
  0x35   : > { %5197 = vmatpush3.bf16.msra.mxu0 %v5711_v63  ;;  %v992_v63 = vmul.f32 %v6150_v2, %v6214_v45  ;;  %8354 = vst [vmem:[#allocation29_spill] sm:$0xff] %v6258_v36  ;;  %8358 = vst [vmem:[#allocation31_spill] sm:$0xff] %v6274_v46  ;;  %v6408_v17 = vsel %vm826_vm3, %v6242_v29, %v801_v47  ;;  %v6667_v2 = vld [vmem:[%s6012_s27 + $0x68] sm:$0xff]  }
  0x36   : > { %5309 = vmatpush3.bf16.msra.mxu1 %v5714_v18  ;;  %v320_v18 = vunpack.c.l.bf16 %v6208_v12  ;;  %5198 = vmatprep.subr.bf16.mxu0 %v5715_v50  ;;  %v386_v50 = vand.u32 15, %v354_v3  ;;  %v6294_v3 = vsel %vm6260_vm9, 1.0, %v8201_v25  ;;  %8379 = vst [vmem:[#allocation42_spill] sm:$0xff] %v6408_v17 }
  0x37   : > { %2404 = vmatmul.mubr.bf16.gmra.mrb[4].mxu0 %v667_v37  ;;  %v6265_v37 = vld [vmem:[%s6012_s27 + $0x28] sm:$0xff]   ;;  %5310 = vmatprep.subr.bf16.mxu1 %v5717_v62  ;;  %v8360_v62 = vunpack.c.h.bf16 %v6208_v12  ;;  %8361 = vst [vmem:[#allocation33_spill] sm:$0xff] %v6294_v3  ;;  %v642_v22 = vmul.f32 %v6294_v3, %v6229_v8 }
  0x38   : > { %2565 = vmatmul.mubr.bf16.gmra.mrb[4].mxu1 %v1020_v43  ;;  %2411 = vmatprep.mubr.bf16.mxu0 %v6033_v52  ;;  %v1105_v43 = vmul.f32 %v6166_v61, %v6229_v8  ;;  %v417_v0 = vrot.slane %v320_v18, 7  ;;  %8357 = vst [vmem:[#allocation30_spill] sm:$0xff] %v6265_v37  ;;  %vm6321_vm10 = vcmp.lt.s32.totalorder %v386_v50, 15  ;;  %v5730_v50 = vld [vmem:[%s8192_s1 + $0x1e8] sm:$0xff]  }
  0x39   : > { %2572 = vmatprep.mubr.bf16.mxu1 %v1133_v57  ;;  %5199 = vmatpush3.bf16.msra.mxu0 %v5716_v55  ;;  %v1021_v55 = vpack.c.bf16 %v992_v63, %v6252_v6  ;;  %v6283_v57 = vsel %vm826_vm3, %v799_v40, %v6242_v29  ;;  %v418_v11 = vrot.slane %v8360_v62, 7  ;;  %v5725_v63 = vld [vmem:[%s8192_s1 + $0x120] sm:$0xff]   ;;  %v355_v62 = vadd.s32 80, %v5899_v9  ;;  %v5737_v29 = vld [vmem:[%s8192_s1 + $0x178] sm:$0xff]  }
  0x3a   : > { %5311 = vmatpush3.bf16.msra.mxu1 %v5718_v10  ;;  %5200 = vmatprep.subr.bf16.mxu0 %v5719_v35  ;;  %8359 = vst [vmem:[#allocation32_spill] sm:$0xff] %v6283_v57  ;;  %v1134_v35 = vpack.c.bf16 %v6258_v36, %v1105_v43  ;;  %v322_v10 = vunpack.c.l.bf16 %v6265_v37  ;;  %v5726_v43 = vld [vmem:[%s8192_s1 + $0x1e0] sm:$0xff]   ;;  %v994_v25 = vmul.f32 %v6274_v46, %v6283_v57 }
  0x3b   : > { %5312 = vmatprep.subr.bf16.mxu1 %v5721_v16  ;;  %v6302_v16 = vsel %vm441_vm4, %v416_v7, %v417_v0  ;;  %v5727_v7 = vld [vmem:[%s8192_s1 + $0x1a0] sm:$0xff]   ;;  %v387_v41 = vand.u32 15, %v355_v62  ;;  %v6339_v62 = vsel %vm441_vm4, %v417_v0, %v418_v11  ;;  %v669_v40 = vpack.c.bf16 %v6202_v39, %v640_v1  ;;  %v5732_v0 = vld [vmem:[%s8192_s1 + $0x1a8] sm:$0xff]  }
  0x3c   : > { %8362 = vst [vmem:[#allocation34_spill] sm:$0xff] %v6302_v16  ;;  %v419_v30 = vrot.slane %v322_v10, 7  ;;  %8366 = vst [vmem:[#allocation36_spill] sm:$0xff] %v6339_v62  ;;  %v369_v39 = vadd.s32 192, %v5899_v9 }
  0x3d   : > { %5201 = vmatpush3.bf16.msra.mxu0 %v5720_v48  ;;  %v5728_v48 = vld [vmem:[%s8192_s1 + $0x168] sm:$0xff]   ;;  %vm6341_vm11 = vcmp.ge.s32.totalorder %v387_v41, 1  ;;  %v1022_v41 = vpack.c.bf16 %v994_v25, %v6329_v34  ;;  %v368_v34 = vadd.s32 184, %v5899_v9 }
  0x3e   : > { %5313 = vmatpush3.bf16.msra.mxu1 %v5723_v5  ;;  %v356_v5 = vadd.s32 88, %v5899_v9  ;;  %5202 = vmatprep.subr.bf16.mxu0 %v5724_v27  ;;  %v6350_v27 = vld [vmem:[%s6012_s27 + $0x30] sm:$0xff]  }
  0x3f   : > { %2412 = vmatmul.mubr.bf16.gmra.mrb[8].mxu0 %v668_v13  ;;  %v6319_v13 = vrot.slane %v320_v18, 1  ;;  %5314 = vmatprep.subr.bf16.mxu1 %v5726_v43  ;;  %8369 = vst [vmem:[#allocation37_spill] sm:$0xff] %v6350_v27  ;;  %v357_v18 = vadd.s32 96, %v5899_v9 }
  0x40   : > { %2573 = vmatmul.mubr.bf16.gmra.mrb[8].mxu1 %v1021_v55  ;;  %2419 = vmatprep.mubr.bf16.mxu0 %v6130_v38  ;;  %v1107_v55 = vmul.f32 %v6294_v3, %v6302_v16  ;;  %v388_v23 = vand.u32 15, %v356_v5  ;;  %v5734_v5 = vld [vmem:[%s8192_s1 + $0x130] sm:$0xff]  }
  0x41   : > { %2580 = vmatprep.mubr.bf16.mxu1 %v1134_v35  ;;  %5203 = vmatpush3.bf16.msra.mxu0 %v5725_v63  ;;  %v8370_v63 = vmov 0.0   ;;  %v5735_v35 = vld [vmem:[%s8192_s1 + $0x1f0] sm:$0xff]  }
  0x42   : > { %5315 = vmatpush3.bf16.msra.mxu1 %v5727_v7  ;;  %5204 = vmatprep.subr.bf16.mxu0 %v5728_v48  ;;  %v6360_v43 = vsel %vm6321_vm10, 1.0, %v8370_v63  ;;  %v1135_v1 = vpack.c.bf16 %v6339_v62, %v1107_v55  ;;  %v6366_v7 = vsel %vm826_vm3, %v801_v47, %v6319_v13  ;;  %v8373_v48 = vunpack.c.h.bf16 %v6265_v37 }
  0x43   : > { %8371 = vst [vmem:[#allocation38_spill] sm:$0xff] %v6360_v43  ;;  %5316 = vmatprep.subr.bf16.mxu1 %v5730_v50  ;;  %8372 = vst [vmem:[#allocation39_spill] sm:$0xff] %v6366_v7  ;;  %v6373_v25 = vsel %vm6341_vm11, 1.0, %v8370_v63  ;;  %v6383_v55 = vsel %vm441_vm4, %v418_v11, %v419_v30  ;;  %v324_v50 = vunpack.c.l.bf16 %v6350_v27  ;;  %v996_v11 = vmul.f32 %v6360_v43, %v6366_v7 }
  0x44   : > { %v420_v20 = vrot.slane %v8373_v48, 7  ;;  %8374 = vst [vmem:[#allocation40_spill] sm:$0xff] %v6383_v55  ;;  %v389_v48 = vand.u32 15, %v357_v18  ;;  %v6396_v18 = vrot.slane %v322_v10, 1  ;;  %vm6398_vm12 = vcmp.lt.s32.totalorder %v388_v23, 15  ;;  %v5736_v23 = vld [vmem:[%s8192_s1 + $0x1b0] sm:$0xff]  }
  0x45   : > { %5205 = vmatpush3.bf16.msra.mxu0 %v5729_v15  ;;  %v421_v59 = vrot.slane %v324_v50, 7 }
  0x46   : > { %5317 = vmatpush3.bf16.msra.mxu1 %v5732_v0  ;;  %v1109_v0 = vmul.f32 %v6373_v25, %v6383_v55  ;;  %5206 = vmatprep.subr.bf16.mxu0 %v5733_v44  ;;  %v6418_v10 = vsel %vm441_vm4, %v419_v30, %v420_v20  ;;  %vm6421_vm13 = vcmp.ge.s32.totalorder %v389_v48, 1  ;;  %v5738_v44 = vld [vmem:[%s8192_s1 + $0x138] sm:$0xff]   ;;  %v670_v30 = vpack.c.bf16 %v6258_v36, %v642_v22 }
  0x47   : > { %2420 = vmatmul.mubr.bf16.gmra.mrb[12].mxu0 %v669_v40  ;;  %v6403_v40 = vld [vmem:[%s6012_s27 + $0x38] sm:$0xff]   ;;  %8380 = vst [vmem:[#allocation43_spill] sm:$0xff] %v6418_v10  ;;  %5318 = vmatprep.subr.bf16.mxu1 %v5735_v35  ;;  %v6440_v35 = vsel %vm6398_vm12, 1.0, %v8370_v63  ;;  %v6446_v22 = vsel %vm826_vm3, %v803_v19, %v6396_v18  ;;  %v6454_v15 = vsel %vm441_vm4, %v420_v20, %v421_v59 }
  0x48   : > { %2581 = vmatmul.mubr.bf16.gmra.mrb[12].mxu1 %v1022_v41  ;;  %2427 = vmatprep.mubr.bf16.mxu0 %v6137_v42  ;;  %8378 = vst [vmem:[#allocation41_spill] sm:$0xff] %v6403_v40  ;;  %v358_v41 = vadd.s32 104, %v5899_v9  ;;  %v5739_v48 = vld [vmem:[%s8192_s1 + $0x1f8] sm:$0xff]   ;;  %8383 = vst [vmem:[#allocation44_spill] sm:$0xff] %v6440_v35  ;;  %v1136_v33 = vpack.c.bf16 %v6418_v10, %v1109_v0  ;;  %v326_v3 = vunpack.c.l.bf16 %v6403_v40  ;;  %v6459_v0 = vsel %vm6421_vm13, 1.0, %v8370_v63 }
  0x49   : > { %2588 = vmatprep.mubr.bf16.mxu1 %v1135_v1  ;;  %v325_v1 = vunpack.c.h.bf16 %v6350_v27  ;;  %5207 = vmatpush3.bf16.msra.mxu0 %v5734_v5  ;;  %v1023_v5 = vpack.c.bf16 %v996_v11, %v6408_v17  ;;  %8384 = vst [vmem:[#allocation45_spill] sm:$0xff] %v6446_v22  ;;  %v5740_v11 = vld [vmem:[%s8192_s1 + $0x1b8] sm:$0xff]   ;;  %v6467_v20 = vsel %vm826_vm3, %v6319_v13, %v803_v19  ;;  %v360_v13 = vadd.s32 120, %v5899_v9 }
  0x4a   : > { %5319 = vmatpush3.bf16.msra.mxu1 %v5736_v23  ;;  %5208 = vmatprep.subr.bf16.mxu0 %v5737_v29  ;;  %v390_v23 = vand.u32 15, %v358_v41  ;;  %v644_v41 = vmul.f32 %v6373_v25, %v6302_v16  ;;  %v391_v29 = vand.u32 15, %v359_v58  ;;  %8385 = vst [vmem:[#allocation46_spill] sm:$0xff] %v6467_v20  ;;  %v998_v47 = vmul.f32 %v6440_v35, %v6446_v22 }
  0x4b   : > { %5320 = vmatprep.subr.bf16.mxu1 %v5739_v48  ;;  %v422_v43 = vrot.slane %v325_v1, 7  ;;  %v1111_v58 = vmul.f32 %v6459_v0, %v6454_v15  ;;  %v6751_v21 = vmul.f32 %v6373_v25, %v6454_v15 }
  0x4c   : > { %vm872_vm14 = vcmp.lt.s32.totalorder %v390_v23, 15  ;;  %v671_v35 = vpack.c.bf16 %v6339_v62, %v644_v41  ;;  %vm520_vm15 = vcmp.ge.s32.totalorder %v391_v29, 1  ;;  %v392_v29 = vand.u32 15, %v360_v13 }
  0x4d   : > { %5209 = vmatpush3.bf16.msra.mxu0 %v5738_v44  ;;  %v8386_v44 = vunpack.c.h.bf16 %v6265_v37  ;;  %v6481_v19 = vsel %vm441_vm4, %v421_v59, %v422_v43  ;;  %v6493_v22 = vsel %vm872_vm14, 1.0, %v8370_v63  ;;  %v6500_v41 = vsel %vm520_vm15, 1.0, %v8370_v63 }
  0x4e   : > { %5321 = vmatpush3.bf16.msra.mxu1 %v5740_v11  ;;  %v423_v11 = vrot.slane %v326_v3, 7  ;;  %v1137_v23 = vpack.c.bf16 %v6481_v19, %v1111_v58  ;;  %8389 = vst [vmem:[#allocation49_spill] sm:$0xff] %v6493_v22  ;;  %v646_v58 = vmul.f32 %v6459_v0, %v6383_v55  ;;  %v808_v13 = vrot.slane %v326_v3, 1 }
  0x4f   : > { %2428 = vmatmul.mubr.bf16.gmra.mrb[16].mxu0 %v670_v30  ;;  %v805_v48 = vrot.slane %v8386_v44, 1  ;;  %v806_v30 = vrot.slane %v324_v50, 1  ;;  %v1024_v50 = vpack.c.bf16 %v998_v47, %v6467_v20  ;;  %v362_v55 = vadd.s32 136, %v5899_v9 }
  0x50   : > { %2589 = vmatmul.mubr.bf16.gmra.mrb[16].mxu1 %v1023_v5  ;;  %2435 = vmatprep.mubr.bf16.mxu0 %v6208_v12  ;;  %v327_v5 = vunpack.c.h.bf16 %v6403_v40  ;;  %v6477_v12 = vld [vmem:[%s6012_s27 + $0x40] sm:$0xff]   ;;  %v6497_v61 = vsel %vm441_vm4, %v422_v43, %v423_v11  ;;  %v807_v43 = vrot.slane %v325_v1, 1  ;;  %vm874_vm0 = vcmp.lt.s32.totalorder %v392_v29, 15 }
  0x51   : > { %2596 = vmatprep.mubr.bf16.mxu1 %v1136_v33  ;;  %8387 = vst [vmem:[#allocation47_spill] sm:$0xff] %v6477_v12  ;;  %v361_v33 = vadd.s32 128, %v5899_v9  ;;  %v6490_v44 = vsel %vm826_vm3, %v805_v48, %v806_v30  ;;  %v328_v47 = vunpack.c.l.bf16 %v6477_v12  ;;  %v6511_v16 = vsel %vm826_vm3, %v6396_v18, %v805_v48 }
  0x52   : > { %8388 = vst [vmem:[#allocation48_spill] sm:$0xff] %v6490_v44  ;;  %v424_v59 = vrot.slane %v327_v5, 7  ;;  %v1000_v62 = vmul.f32 %v6493_v22, %v6490_v44  ;;  %8390 = vst [vmem:[#allocation50_spill] sm:$0xff] %v6511_v16  ;;  %v329_v1 = vunpack.c.h.bf16 %v6477_v12  ;;  %v672_v22 = vpack.c.bf16 %v6418_v10, %v646_v58 }
  0x53   : > { %v393_v20 = vand.u32 15, %v361_v33  ;;  %v6517_v33 = vld [vmem:[%s6012_s27 + $0x48] sm:$0xff]   ;;  %v363_v18 = vadd.s32 144, %v5899_v9  ;;  %v394_v29 = vand.u32 15, %v362_v55  ;;  %v648_v58 = vmul.f32 %v6500_v41, %v6454_v15 }
  0x54   : > { %8391 = vst [vmem:[#allocation51_spill] sm:$0xff] %v6517_v33  ;;  %v1025_v48 = vpack.c.bf16 %v1000_v62, %v6511_v16  ;;  %v426_v44 = vrot.slane %v329_v1, 7  ;;  %v330_v62 = vunpack.c.l.bf16 %v6517_v33  ;;  %v6548_v55 = vsel %vm826_vm3, %v806_v30, %v807_v43 }
  0x55   : > { %vm522_vm1 = vcmp.ge.s32.totalorder %v393_v20, 1  ;;  %8394 = vst [vmem:[#allocation54_spill] sm:$0xff] %v6548_v55  ;;  %v809_v16 = vrot.slane %v327_v5, 1  ;;  %vm876_vm2 = vcmp.lt.s32.totalorder %v394_v29, 15  ;;  %v331_v36 = vunpack.c.h.bf16 %v6517_v33 }
  0x56   : > { %v6540_v20 = vsel %vm522_vm1, 1.0, %v8370_v63  ;;  %v427_v30 = vrot.slane %v330_v62, 7  ;;  %v365_v5 = vadd.s32 160, %v5899_v9  ;;  %v812_v46 = vrot.slane %v330_v62, 1 }
  0x57   : > { %2436 = vmatmul.mubr.bf16.gmra.mrb[20].mxu0 %v671_v35  ;;  %v1113_v35 = vmul.f32 %v6500_v41, %v6497_v61  ;;  %v6587_v42 = vsel %vm826_vm3, %v808_v13, %v809_v16  ;;  %v813_v8 = vrot.slane %v331_v36, 1 }
  0x58   : > { %2597 = vmatmul.mubr.bf16.gmra.mrb[20].mxu1 %v1024_v50  ;;  %2443 = vmatprep.mubr.bf16.mxu0 %v6265_v37  ;;  %v6521_v50 = vsel %vm441_vm4, %v423_v11, %v424_v59  ;;  %v6530_v37 = vsel %vm826_vm3, %v807_v43, %v808_v13  ;;  %v6533_v11 = vsel %vm874_vm0, 1.0, %v8370_v63  ;;  %v364_v43 = vadd.s32 152, %v5899_v9  ;;  %8398 = vst [vmem:[#allocation58_spill] sm:$0xff] %v6587_v42  ;;  %v6600_v13 = vld [vmem:[%s6012_s27 + $0x58] sm:$0xff]  }
  0x59   : > { %2604 = vmatprep.mubr.bf16.mxu1 %v1137_v23  ;;  %v425_v23 = vrot.slane %v328_v47, 7  ;;  %v1138_v3 = vpack.c.bf16 %v6521_v50, %v1113_v35  ;;  %8392 = vst [vmem:[#allocation52_spill] sm:$0xff] %v6530_v37  ;;  %8393 = vst [vmem:[#allocation53_spill] sm:$0xff] %v6533_v11  ;;  %v395_v35 = vand.u32 15, %v363_v18  ;;  %v6556_v18 = vld [vmem:[%s6012_s27 + $0x50] sm:$0xff]  }
  0x5a   : > { %8395 = vst [vmem:[#allocation55_spill] sm:$0xff] %v6556_v18  ;;  %v333_v7 = vunpack.c.h.bf16 %v6556_v18 }
  0x5b   : > { %v6537_v17 = vsel %vm441_vm4, %v424_v59, %v425_v23  ;;  %v1002_v59 = vmul.f32 %v6533_v11, %v6530_v37  ;;  %v673_v11 = vpack.c.bf16 %v6481_v19, %v648_v58  ;;  %vm524_vm5 = vcmp.ge.s32.totalorder %v395_v35, 1 }
  0x5c   : > { %v1115_v10 = vmul.f32 %v6540_v20, %v6537_v17  ;;  %v6576_v37 = vsel %vm441_vm4, %v426_v44, %v427_v30  ;;  %v6579_v58 = vsel %vm524_vm5, 1.0, %v8370_v63  ;;  %v396_v35 = vand.u32 15, %v364_v43 }
  0x5d   : > { %v1117_v43 = vmul.f32 %v6579_v58, %v6576_v37 }
  0x5e   : > { %vm878_vm6 = vcmp.lt.s32.totalorder %v396_v35, 15 }
  0x5f   : > { %2444 = vmatmul.mubr.bf16.gmra.mrb[24].mxu0 %v672_v22  ;;  %v810_v22 = vrot.slane %v328_v47, 1  ;;  %v6611_v35 = vsel %vm878_vm6, 1.0, %v8370_v63 }
  0x60   : > { %2605 = vmatmul.mubr.bf16.gmra.mrb[24].mxu1 %v1025_v48  ;;  %2451 = vmatprep.mubr.bf16.mxu0 %v6350_v27  ;;  %v6560_v48 = vsel %vm441_vm4, %v425_v23, %v426_v44  ;;  %v6572_v27 = vsel %vm876_vm2, 1.0, %v8370_v63  ;;  %v428_v23 = vrot.slane %v331_v36, 7  ;;  %8400 = vst [vmem:[#allocation60_spill] sm:$0xff] %v6611_v35  ;;  %v335_v36 = vunpack.c.h.bf16 %v6600_v13 }
  0x61   : > { %2612 = vmatprep.mubr.bf16.mxu1 %v1138_v3  ;;  %v1026_v3 = vpack.c.bf16 %v1002_v59, %v6548_v55  ;;  %v1139_v47 = vpack.c.bf16 %v6560_v48, %v1115_v10  ;;  %v6569_v29 = vsel %vm826_vm3, %v809_v16, %v810_v22  ;;  %8397 = vst [vmem:[#allocation57_spill] sm:$0xff] %v6572_v27  ;;  %v332_v59 = vunpack.c.l.bf16 %v6556_v18 }
  0x62   : > { %8396 = vst [vmem:[#allocation56_spill] sm:$0xff] %v6569_v29  ;;  %v650_v10 = vmul.f32 %v6540_v20, %v6497_v61  ;;  %v397_v55 = vand.u32 15, %v365_v5  ;;  %v1004_v44 = vmul.f32 %v6572_v27, %v6569_v29  ;;  %v6596_v5 = vsel %vm441_vm4, %v427_v30, %v428_v23 }
  0x63   : > { %v366_v16 = vadd.s32 168, %v5899_v9  ;;  %v367_v27 = vadd.s32 176, %v5899_v9  ;;  %v1140_v62 = vpack.c.bf16 %v6596_v5, %v1117_v43  ;;  %v652_v43 = vmul.f32 %v6579_v58, %v6537_v17 }
  0x64   : > { %vm526_vm7 = vcmp.ge.s32.totalorder %v397_v55, 1  ;;  %v432_v38 = vrot.slane %v335_v36, 7 }
  0x65   : > { %v6618_v55 = vsel %vm526_vm7, 1.0, %v8370_v63 }
  0x67   : > { %2452 = vmatmul.mubr.bf16.gmra.mrb[28].mxu0 %v673_v11  ;;  %v811_v11 = vrot.slane %v329_v1, 1  ;;  %v1027_v1 = vpack.c.bf16 %v1004_v44, %v6587_v42  ;;  %v334_v44 = vunpack.c.l.bf16 %v6600_v13  ;;  %v399_v42 = vand.u32 15, %v367_v27 }
  0x68   : > { %2613 = vmatmul.mubr.bf16.gmra.mrb[28].mxu1 %v1026_v3  ;;  %2459 = vmatprep.mubr.bf16.mxu0 %v6403_v40  ;;  %v429_v3 = vrot.slane %v332_v59, 7  ;;  %v430_v40 = vrot.slane %v333_v7, 7  ;;  %v814_v27 = vrot.slane %v332_v59, 1 }
  0x69   : > { %2620 = vmatprep.mubr.bf16.mxu1 %v1139_v47  ;;  %v674_v47 = vpack.c.bf16 %v6521_v50, %v650_v10  ;;  %v6608_v30 = vsel %vm826_vm3, %v811_v11, %v812_v46  ;;  %v398_v10 = vand.u32 15, %v366_v16  ;;  %v6632_v16 = vsel %vm826_vm3, %v810_v22, %v811_v11 }
  0x6a   : > { %8399 = vst [vmem:[#allocation59_spill] sm:$0xff] %v6608_v30  ;;  %v6615_v29 = vsel %vm441_vm4, %v428_v23, %v429_v3  ;;  %v1006_v23 = vmul.f32 %v6611_v35, %v6608_v30  ;;  %8401 = vst [vmem:[#allocation61_spill] sm:$0xff] %v6632_v16  ;;  %v431_v35 = vrot.slane %v334_v44, 7  ;;  %vm528_vm9 = vcmp.ge.s32.totalorder %v399_v42, 1 }
  0x6b   : > { %vm880_vm8 = vcmp.lt.s32.totalorder %v398_v10, 15  ;;  %v400_v11 = vand.u32 15, %v368_v34  ;;  %v6648_v30 = vsel %vm826_vm3, %v813_v8, %v814_v27  ;;  %v401_v10 = vand.u32 15, %v369_v39 }
  0x6c   : > { %v1028_v22 = vpack.c.bf16 %v1006_v23, %v6632_v16  ;;  %8402 = vst [vmem:[#allocation62_spill] sm:$0xff] %v6648_v30  ;;  %v6655_v42 = vsel %vm441_vm4, %v430_v40, %v431_v35  ;;  %v6658_v34 = vsel %vm528_vm9, 1.0, %v8370_v63  ;;  %v815_v23 = vrot.slane %v333_v7, 1 }
  0x6d   : > { %vm882_vm10 = vcmp.lt.s32.totalorder %v400_v11, 15  ;;  %v337_v16 = vunpack.c.h.bf16 %v6624_v54  ;;  %v1121_v7 = vmul.f32 %v6658_v34, %v6655_v42  ;;  %vm530_vm11 = vcmp.ge.s32.totalorder %v401_v10, 1 }
  0x6f   : > { %2460 = vmatmul.mubr.bf16.gmra.mrb[32].mxu0 %v674_v47  ;;  %v1119_v47 = vmul.f32 %v6618_v55, %v6615_v29  ;;  %v434_v10 = vrot.slane %v337_v16, 7 }
  0x70   : > { %2621 = vmatmul.mubr.bf16.gmra.mrb[32].mxu1 %v1027_v1  ;;  %2467 = vmatprep.mubr.bf16.mxu0 %v6477_v12  ;;  %v6639_v1 = vsel %vm441_vm4, %v429_v3, %v430_v40  ;;  %v336_v12 = vunpack.c.l.bf16 %v6624_v54  ;;  %v6651_v3 = vsel %vm880_vm8, 1.0, %v8370_v63 }
  0x71   : > { %2628 = vmatprep.mubr.bf16.mxu1 %v1140_v62  ;;  %v675_v62 = vpack.c.bf16 %v6560_v48, %v652_v43  ;;  %v1141_v59 = vpack.c.bf16 %v6639_v1, %v1119_v47  ;;  %8403 = vst [vmem:[#allocation63_spill] sm:$0xff] %v6651_v3  ;;  %v654_v43 = vmul.f32 %v6618_v55, %v6576_v37  ;;  %v816_v47 = vrot.slane %v334_v44, 1 }
  0x72   : > { %v1008_v39 = vmul.f32 %v6651_v3, %v6648_v30  ;;  %v433_v40 = vrot.slane %v336_v12, 7  ;;  %v370_v44 = vadd.s32 200, %v5899_v9  ;;  %v371_v3 = vadd.s32 208, %v5899_v9 }
  0x73   : > { %v676_v11 = vpack.c.bf16 %v6596_v5, %v654_v43  ;;  %v6692_v30 = vsel %vm530_vm11, 1.0, %v8370_v63  ;;  %v338_v43 = vunpack.c.l.bf16 %v6667_v2  ;;  %v6708_v26 = vrot.slane %v336_v12, 1 }
  0x74   : > { %v6697_v57 = vsel %vm441_vm4, %v432_v38, %v433_v40  ;;  %v403_v49 = vand.u32 15, %v371_v3  ;;  %v372_v3 = vadd.s32 216, %v5899_v9  ;;  %v658_v12 = vmul.f32 %v6692_v30, %v6655_v42 }
  0x75   : > { %v6765_v25 = vrot.slane %v338_v43, 1 }
  0x76   : > { %vm532_vm13 = vcmp.ge.s32.totalorder %v403_v49, 1 }
  0x77   : > { %2468 = vmatmul.mubr.bf16.gmra.mrb[36].mxu0 %v675_v62  ;;  %v6671_v62 = vsel %vm826_vm3, %v812_v46, %v813_v8  ;;  %v6685_v8 = vsel %vm826_vm3, %v815_v23, %v816_v47  ;;  %v6688_v46 = vsel %vm882_vm10, 1.0, %v8370_v63 }
  0x78   : > { %2629 = vmatmul.mubr.bf16.gmra.mrb[36].mxu1 %v1028_v22  ;;  %2475 = vmatprep.mubr.bf16.mxu0 %v6517_v33  ;;  %8404 = vst [vmem:[#allocation64_spill] sm:$0xff] %v6671_v62  ;;  %v6678_v22 = vsel %vm441_vm4, %v431_v35, %v432_v38  ;;  %8405 = vst [vmem:[#allocation65_spill] sm:$0xff] %v6685_v8  ;;  %v402_v35 = vand.u32 15, %v370_v44  ;;  %v817_v44 = vrot.slane %v335_v36, 1  ;;  %v6722_v36 = vld [vmem:[%s6012_s27 + $0x70] sm:$0xf] }
  0x79   : > { %2636 = vmatprep.mubr.bf16.mxu1 %v1141_v59  ;;  %v1029_v59 = vpack.c.bf16 %v1008_v39, %v6671_v62  ;;  %8406 = vst [vmem:[#allocation66_spill] sm:$0xff] %v6688_v46  ;;  %v1142_v33 = vpack.c.bf16 %v6678_v22, %v1121_v7  ;;  %v656_v39 = vmul.f32 %v6658_v34, %v6615_v29  ;;  %v340_v24 = vunpack.c.l.bf16 %v6722_v36 }
  0x7a   : > { %v6703_v62 = vsel %vm826_vm3, %v814_v27, %v815_v23  ;;  %v1010_v7 = vmul.f32 %v6688_v46, %v6685_v8  ;;  %vm884_vm12 = vcmp.lt.s32.totalorder %v402_v35, 15  ;;  %v435_v27 = vrot.slane %v338_v43, 7 }
  0x7b   : > { %8407 = vst [vmem:[#allocation67_spill] sm:$0xff] %v6703_v62  ;;  %v6716_v23 = vsel %vm441_vm4, %v433_v40, %v434_v10  ;;  %v6729_v35 = vsel %vm826_vm3, %v817_v44, %v6708_v26  ;;  %v6732_v40 = vsel %vm884_vm12, 1.0, %v8370_v63  ;;  %v6739_v49 = vsel %vm826_vm3, %v816_v47, %v817_v44 }
  0x7c   : > { %v1030_v38 = vpack.c.bf16 %v1010_v7, %v6703_v62  ;;  %8409 = vst [vmem:[#allocation68_spill] sm:$0xff] %v6739_v49  ;;  %v6743_v7 = vsel %vm441_vm4, %v434_v10, %v435_v27  ;;  %v404_v62 = vand.u32 15, %v372_v3  ;;  %v6746_v8 = vsel %vm532_vm13, 1.0, %v8370_v63 }
  0x7d   : > { %v678_v47 = vpack.c.bf16 %v6678_v22, %v658_v12  ;;  %v1012_v10 = vmul.f32 %v6732_v40, %v6729_v35  ;;  %v819_v44 = vrot.slane %v337_v16, 1  ;;  %v6783_v43 = vmul.f32 %v6540_v20, %v6576_v37 }
  0x7e   : > { %vm6773_vm14 = vcmp.lt.s32.totalorder %v404_v62, 15  ;;  %v6792_v62 = vmul.f32 %v6618_v55, %v6655_v42  ;;  %v375_v12 = vadd.s32 240, %v5899_v9  ;;  %v6831_v16 = vmul.f32 %v6692_v30, %v6743_v7 }
  0x7f   : > { %2476 = vmatmul.mubr.bf16.gmra.mrb[40].mxu0 %v676_v11  ;;  %v1123_v11 = vmul.f32 %v6692_v30, %v6697_v57  ;;  %v6808_v55 = vsel %vm826_vm3, %v819_v44, %v6765_v25  ;;  %v6813_v42 = vsel %vm6773_vm14, 1.0, %v8370_v63  ;;  %v6845_v30 = vsel %vm826_vm3, %v6708_v26, %v819_v44 }
  0x80   : > { %2637 = vmatmul.mubr.bf16.gmra.mrb[40].mxu1 %v1029_v59  ;;  %2483 = vmatprep.mubr.bf16.mxu0 %v6556_v18  ;;  %v677_v59 = vpack.c.bf16 %v6639_v1, %v656_v39  ;;  %v8408_v39 = vunpack.c.h.bf16 %v6667_v2  ;;  %v407_v20 = vand.u32 15, %v375_v12  ;;  %v6858_v37 = vadd.s32 8, %v5899_v9 }
  0x81   : > { %2644 = vmatprep.mubr.bf16.mxu1 %v1142_v33  ;;  %v373_v33 = vadd.s32 224, %v5899_v9  ;;  %v1143_v18 = vpack.c.bf16 %v6716_v23, %v1123_v11  ;;  %v6755_v11 = vmul.f32 %v6459_v0, %v6497_v61  ;;  %v1125_v0 = vmul.f32 %v6746_v8, %v6743_v7  ;;  %v5814_v61 = vld [vmem:[%s6012_s27 + $0x74] sm:$0xf] }
  0x82   : > { %v436_v46 = vrot.slane %v8408_v39, 7  ;;  %8413 = vst [vmem:[#allocation69_spill] sm:$0xff] %v6858_v37  ;;  %vm536_vm1 = vcmp.ge.s32.totalorder %v407_v20, 1 }
  0x83   : > { %v405_v3 = vand.u32 15, %v373_v33  ;;  %v6817_v33 = vmul.f32 %v6658_v34, %v6697_v57  ;;  %v660_v34 = vmul.f32 %v6746_v8, %v6697_v57 }
  0x84   : > { %v6763_v39 = vsel %vm441_vm4, %v435_v27, %v436_v46  ;;  %v437_v27 = vrot.slane %v340_v24, 7 }
  0x85   : > { %vm534_vm15 = vcmp.ge.s32.totalorder %v405_v3, 1  ;;  %v679_v26 = vpack.c.bf16 %v6716_v23, %v660_v34 }
  0x86   : > { %v6822_v3 = vsel %vm534_vm15, 1.0, %v8370_v63 }
  0x87   : > { %2484 = vmatmul.mubr.bf16.gmra.mrb[44].mxu0 %v677_v59  ;;  %v374_v59 = vadd.s32 232, %v5899_v9  ;;  %v662_v20 = vmul.f32 %v6822_v3, %v6743_v7 }
  0x88   : > { %2645 = vmatmul.mubr.bf16.gmra.mrb[44].mxu1 %v1030_v38  ;;  %2491 = vmatprep.mubr.bf16.mxu0 %v6600_v13  ;;  %v6779_v38 = vmul.f32 %v6500_v41, %v6537_v17  ;;  %v1031_v41 = vpack.c.bf16 %v1012_v10, %v6739_v49  ;;  %v445_v10 = vsel %vm441_vm4, %v436_v46, %v437_v27  ;;  %v378_v17 = vand.u32 15, %v6858_v37  ;;  %v8430_v37 = vld [vmem:[#allocation20_spill] sm:$0xff] }
  0x89   : > { %2652 = vmatprep.mubr.bf16.mxu1 %v1143_v18  ;;  %v6788_v18 = vmul.f32 %v6579_v58, %v6615_v29  ;;  %v1144_v58 = vpack.c.bf16 %v6763_v39, %v1125_v0  ;;  %v406_v0 = vand.u32 15, %v374_v59  ;;  %v6827_v29 = vld [vmem:[%s8192_s1 + $0x200] sm:$0xff]   ;;  %v1014_v59 = vmul.f32 %v6813_v42, %v6808_v55 }
  0x8a   : > { %v1127_v57 = vmul.f32 %v6822_v3, %v445_v10  ;;  %5575 = vmatprep.subr.bf16.mxu0 %v6827_v29  ;;  %v6854_v46 = vsel %vm441_vm4, %v437_v27, %v6070_v14  ;;  %v4672_v27 = vsel %vm536_vm1, 1.0, %v8370_v63  ;;  %v6873_v34 = vmul.f32 %v6746_v8, %v445_v10 }
  0x8b   : > { %vm888_vm0 = vcmp.lt.s32.totalorder %v406_v0, 15  ;;  %v1032_v44 = vpack.c.bf16 %v1014_v59, %v6845_v30  ;;  %v1129_v8 = vmul.f32 %v4672_v27, %v6118_v32  ;;  %vm860_vm5 = vcmp.lt.s32.totalorder %v378_v17, 15 }
  0x8c   : > { %v6868_v14 = vsel %vm888_vm0, 1.0, %v8370_v63  ;;  %v6907_v17 = vsel %vm860_vm5, 1.0, %v8370_v63 }
  0x8f   : > { %2492 = vmatmul.mubr.bf16.gmra.mrb[48].mxu0 %v678_v47  ;;  %v8412_v47 = vunpack.c.h.bf16 %v6667_v2 }
  0x90   : > { %2653 = vmatmul.mubr.bf16.gmra.mrb[48].mxu1 %v1031_v41  ;;  %2499 = vmatprep.mubr.bf16.mxu0 %v6624_v54  ;;  %v822_v41 = vrot.slane %v340_v24, 1  ;;  %v1145_v24 = vpack.c.bf16 %v6854_v46, %v1127_v57  ;;  %v6894_v57 = vcombine.low %v6722_v36, %v5814_v61 }
  0x91   : > { %2660 = vmatprep.mubr.bf16.mxu1 %v1144_v58  ;;  %v821_v12 = vrot.slane %v8412_v47, 1  ;;  %v376_v58 = vadd.s32 248, %v5899_v9  ;;  %v8436_v9 = vld [vmem:[#allocation38_spill] sm:$0xff] }
  0x93   : > { %v6865_v47 = vsel %vm826_vm3, %v821_v12, %v822_v41  ;;  %v408_v0 = vand.u32 15, %v376_v58  ;;  %v6885_v58 = vsel %vm826_vm3, %v6765_v25, %v821_v12  ;;  %v8415_v25 = vrot.slane %v6044_v56, 1 }
  0x94   : > { %v1016_v59 = vmul.f32 %v6868_v14, %v6865_v47  ;;  %v1212_v56 = vmul.f32 %v6907_v17, %v6160_v4 }
  0x95   : > { %vm890_vm2 = vcmp.lt.s32.totalorder %v408_v0, 15  ;;  %v664_v0 = vmul.f32 %v4672_v27, %v445_v10 }
  0x96   : > { %v1033_v15 = vpack.c.bf16 %v1016_v59, %v6885_v58  ;;  %v1243_v10 = vpack.c.bf16 %v1212_v56, %v6185_v28  ;;  %v8437_v28 = vld [vmem:[#allocation27_spill] sm:$0xff] }
  0x97   : > { %2500 = vmatmul.mubr.bf16.gmra.mrb[52].mxu0 %v679_v26  ;;  %v8414_v26 = vunpack.c.l.bf16 %v6053_v60  ;;  %v6904_v60 = vsel %vm890_vm2, 1.0, %v8370_v63 }
  0x98   : > { %2661 = vmatmul.mubr.bf16.gmra.mrb[52].mxu1 %v1032_v44  ;;  %2507 = vmatprep.mubr.bf16.mxu0 %v6667_v2  ;;  %v680_v44 = vpack.c.bf16 %v6763_v39, %v662_v20  ;;  %v681_v20 = vpack.c.bf16 %v6854_v46, %v664_v0  ;;  %v8421_v0 = vld [vmem:[#allocation32_spill] sm:$0xff] }
  0x99   : > { %2668 = vmatprep.mubr.bf16.mxu1 %v1145_v24  ;;  %v823_v7 = vrot.slane %v8414_v26, 1  ;;  %v1146_v24 = vpack.c.bf16 %v6113_v31, %v1129_v8  ;;  %v8416_v8 = vld [vmem:[#allocation15_spill] sm:$0xff]  ;;  %v8417_v26 = vld [vmem:[#allocation17_spill] sm:$0xff] }
  0x9b   : > { %v6901_v12 = vsel %vm826_vm3, %v823_v7, %v8415_v25  ;;  %v6916_v61 = vsel %vm826_vm3, %v822_v41, %v823_v7  ;;  %v5742_v41 = vld [vmem:[%s8192_s1 + $0x208] sm:$0xff]   ;;  %v8418_v7 = vpack.c.bf16 %v8416_v8, %v8417_v26  ;;  %v8427_v26 = vld [vmem:[#allocation10_spill] sm:$0xff] }
  0x9c   : > { %v1018_v36 = vmul.f32 %v6904_v60, %v6901_v12 }
  0x9e   : > { %v1034_v59 = vpack.c.bf16 %v1018_v36, %v6916_v61  ;;  %v8422_v36 = vld [vmem:[#allocation21_spill] sm:$0xff] }
  0x9f   : > { %2508 = vmatmul.mubr.bf16.gmra.mrb[56].mxu0 %v680_v44  ;;  %v8419_v44 = vld [vmem:[#allocation25_spill] sm:$0xff]  ;;  %v1216_v56 = vmul.f32 %v8422_v36, %v8421_v0 }
  0xa0   : > { %2669 = vmatmul.mubr.bf16.gmra.mrb[56].mxu1 %v1033_v15  ;;  %2515 = vmatprep.mubr.bf16.mxu0 %v6894_v57  ;;  %v1214_v15 = vmul.f32 %v6038_v53, %v6214_v45 }
  0xa1   : > { %2676 = vmatprep.mubr.bf16.mxu1 %v1146_v24  ;;  %v8420_v24 = vld [vmem:[#allocation9_spill] sm:$0xff] }
  0xa2   : > { %v1244_v27 = vpack.c.bf16 %v1214_v15, %v6252_v6  ;;  %v1389_v25 = vmul.f32 %v8420_v24, %v8419_v44  ;;  %v8425_v15 = vld [vmem:[#allocation35_spill] sm:$0xff] }
  0xa3   : > { %v1245_v8 = vpack.c.bf16 %v1216_v56, %v8425_v15  ;;  %v8428_v44 = vld [vmem:[#allocation39_spill] sm:$0xff] }
  0xa4   : > { %v8429_v24 = vld [vmem:[#allocation31_spill] sm:$0xff] }
  0xa5   : > { %v1218_v63 = vmul.f32 %v8429_v24, %v8428_v44 }
  0xa7   : > { %2516 = vmatmul.mubr.bf16.gmra.mrb[60].mxu0 %v681_v20  ;;  %v8423_v20 = vld [vmem:[#allocation19_spill] sm:$0xff] }
  0xa8   : > { %2677 = vmatmul.mubr.bf16.gmra.mrb[60].mxu1 %v1034_v59  ;;  %2717 = vmatprep.mubr.bf16.mxu0 %v1243_v10  ;;  %v8424_v59 = vld [vmem:[#allocation26_spill] sm:$0xff] }
  0xa9   : > { %2878 = vmatprep.mubr.bf16.mxu1 %v6033_v52  ;;  %v1420_v10 = vpack.c.bf16 %v8424_v59, %v1389_v25  ;;  %v8431_v25 = vld [vmem:[#allocation29_spill] sm:$0xff]  ;;  %v8432_v59 = vld [vmem:[#allocation42_spill] sm:$0xff] }
  0xaf   : > { %2718 = vmatmul.mubr.bf16.vlgmr.msra.gmra.mrb[64].mxu0 %v6030_v51  ;;  %v5743_v51 = vld [vmem:[%s8192_s1 + $0x210] sm:$0xff]  }
  0xb0   : > { %2879 = vmatmul.mubr.bf16.vlgmr.msra.gmra.mrb[64].mxu1 %v8418_v7  ;;  %2725 = vmatprep.mubr.bf16.mxu0 %v1244_v27  ;;  %v5744_v27 = vld [vmem:[%s8192_s1 + $0x218] sm:$0xff]  }
  0xb1   : > { %2886 = vmatprep.mubr.bf16.mxu1 %v8423_v20  ;;  %5576 = vmatpush3.bf16.msra.mxu0 %v6827_v29  ;;  %v8426_v29 = vld [vmem:[#allocation28_spill] sm:$0xff] }
  0xb2   : > { %5577 = vmatprep.subr.bf16.mxu0 %v5742_v41  ;;  %v1391_v7 = vmul.f32 %v8427_v26, %v8426_v29  ;;  %v8435_v26 = vld [vmem:[#allocation45_spill] sm:$0xff] }
  0xb3   : > { %v1220_v4 = vmul.f32 %v8436_v9, %v8435_v26  ;;  %v8443_v9 = vld [vmem:[#allocation44_spill] sm:$0xff]  ;;  %v8444_v26 = vld [vmem:[#allocation30_spill] sm:$0xff] }
  0xb4   : > { %v1421_v56 = vpack.c.bf16 %v8431_v25, %v1391_v7  ;;  %v8439_v25 = vld [vmem:[#allocation46_spill] sm:$0xff] }
  0xb5   : > { %5578 = vmatpush3.bf16.msra.mxu0 %v5742_v41  ;;  %v5745_v41 = vld [vmem:[%s8192_s1 + $0x220] sm:$0xff]  }
  0xb6   : > { %5579 = vmatprep.subr.bf16.mxu0 %v5743_v51 }
  0xb7   : > { %2726 = vmatmul.mubr.bf16.gmra.mrb[68].mxu0 %v6033_v52  ;;  %v1246_v52 = vpack.c.bf16 %v1218_v63, %v8432_v59  ;;  %v5748_v63 = vld [vmem:[%s8192_s1 + $0x230] sm:$0xff]  }
  0xb8   : > { %2887 = vmatmul.mubr.bf16.gmra.mrb[68].mxu1 %v1420_v10  ;;  %2733 = vmatprep.mubr.bf16.mxu0 %v1245_v8  ;;  %v5747_v10 = vld [vmem:[%s8192_s1 + $0x228] sm:$0xff]  }
  0xb9   : > { %2894 = vmatprep.mubr.bf16.mxu1 %v8430_v37  ;;  %5580 = vmatpush3.bf16.msra.mxu0 %v5743_v51  ;;  %v8433_v51 = vld [vmem:[#allocation34_spill] sm:$0xff]  ;;  %v8434_v8 = vld [vmem:[#allocation23_spill] sm:$0xff] }
  0xba   : > { %5581 = vmatprep.subr.bf16.mxu0 %v5744_v27  ;;  %v1393_v29 = vmul.f32 %v8434_v8, %v8433_v51  ;;  %v8442_v8 = vld [vmem:[#allocation48_spill] sm:$0xff] }
  0xbb   : > { %v1222_v24 = vmul.f32 %v8443_v9, %v8442_v8 }
  0xbd   : > { %5582 = vmatpush3.bf16.msra.mxu0 %v5744_v27  ;;  %v8438_v27 = vld [vmem:[#allocation36_spill] sm:$0xff] }
  0xbe   : > { %5583 = vmatprep.subr.bf16.mxu0 %v5745_v41  ;;  %v1422_v7 = vpack.c.bf16 %v8438_v27, %v1393_v29  ;;  %v8446_v29 = vld [vmem:[#allocation50_spill] sm:$0xff] }
  0xbf   : > { %2734 = vmatmul.mubr.bf16.gmra.mrb[72].mxu0 %v8423_v20  ;;  %v1247_v20 = vpack.c.bf16 %v1220_v4, %v8439_v25  ;;  %v8445_v4 = vld [vmem:[#allocation43_spill] sm:$0xff]  ;;  %v1248_v27 = vpack.c.bf16 %v1222_v24, %v8446_v29  ;;  %v8452_v24 = vld [vmem:[#allocation56_spill] sm:$0xff] }
  0xc0   : > { %2895 = vmatmul.mubr.bf16.gmra.mrb[72].mxu1 %v1421_v56  ;;  %2741 = vmatprep.mubr.bf16.mxu0 %v1246_v52  ;;  %v5749_v56 = vld [vmem:[%s8192_s1 + $0x238] sm:$0xff]  }
  0xc1   : > { %2902 = vmatprep.mubr.bf16.mxu1 %v8437_v28  ;;  %5584 = vmatpush3.bf16.msra.mxu0 %v5745_v41  ;;  %v8440_v41 = vld [vmem:[#allocation40_spill] sm:$0xff]  ;;  %v8441_v52 = vld [vmem:[#allocation33_spill] sm:$0xff] }
  0xc2   : > { %5585 = vmatprep.subr.bf16.mxu0 %v5747_v10  ;;  %v1395_v51 = vmul.f32 %v8441_v52, %v8440_v41  ;;  %v8449_v41 = vld [vmem:[#allocation37_spill] sm:$0xff]  ;;  %v8450_v52 = vld [vmem:[#allocation54_spill] sm:$0xff] }
  0xc5   : > { %5586 = vmatpush3.bf16.msra.mxu0 %v5747_v10  ;;  %v1423_v10 = vpack.c.bf16 %v8445_v4, %v1395_v51  ;;  %v8455_v4 = vld [vmem:[#allocation58_spill] sm:$0xff] }
  0xc6   : > { %5587 = vmatprep.subr.bf16.mxu0 %v5748_v63 }
  0xc7   : > { %2742 = vmatmul.mubr.bf16.gmra.mrb[76].mxu0 %v8430_v37  ;;  %v8447_v37 = vld [vmem:[#allocation52_spill] sm:$0xff] }
  0xc8   : > { %2903 = vmatmul.mubr.bf16.gmra.mrb[76].mxu1 %v1422_v7  ;;  %2749 = vmatprep.mubr.bf16.mxu0 %v1247_v20  ;;  %v8448_v7 = vld [vmem:[#allocation49_spill] sm:$0xff] }
  0xc9   : > { %2910 = vmatprep.mubr.bf16.mxu1 %v8444_v26  ;;  %5588 = vmatpush3.bf16.msra.mxu0 %v5748_v63  ;;  %v1224_v20 = vmul.f32 %v8448_v7, %v8447_v37  ;;  %v8451_v63 = vpack.c.bf16 %v6481_v19, %v6751_v21  ;;  %v8459_v21 = vld [vmem:[#allocation47_spill] sm:$0xff] }
  0xca   : > { %5589 = vmatprep.subr.bf16.mxu0 %v5749_v56 }
  0xcb   : > { %v1249_v9 = vpack.c.bf16 %v1224_v20, %v8450_v52  ;;  %v8458_v20 = vld [vmem:[#allocation57_spill] sm:$0xff] }
  0xcd   : > { %5590 = vmatpush3.bf16.msra.mxu0 %v5749_v56  ;;  %v8453_v56 = vld [vmem:[#allocation53_spill] sm:$0xff] }
  0xce   : > { %v1226_v51 = vmul.f32 %v8453_v56, %v8452_v24 }
  0xcf   : > { %2750 = vmatmul.mubr.bf16.gmra.mrb[80].mxu0 %v8437_v28  ;;  %v8454_v28 = vld [vmem:[#allocation41_spill] sm:$0xff] }
  0xd0   : > { %2911 = vmatmul.mubr.bf16.gmra.mrb[80].mxu1 %v1423_v10  ;;  %2757 = vmatprep.mubr.bf16.mxu0 %v1248_v27  ;;  %v1250_v10 = vpack.c.bf16 %v1226_v51, %v8455_v4  ;;  %v8456_v27 = vpack.c.bf16 %v6521_v50, %v6755_v11  ;;  %v8463_v51 = vld [vmem:[#allocation60_spill] sm:$0xff]  ;;  %v8464_v50 = vld [vmem:[#allocation51_spill] sm:$0xff] }
  0xd1   : > { %2918 = vmatprep.mubr.bf16.mxu1 %v8449_v41  ;;  %v8465_v11 = vld [vmem:[#allocation64_spill] sm:$0xff] }
  0xd7   : > { %2758 = vmatmul.mubr.bf16.gmra.mrb[84].mxu0 %v8444_v26  ;;  %v8457_v26 = vld [vmem:[#allocation59_spill] sm:$0xff] }
  0xd8   : > { %2919 = vmatmul.mubr.bf16.gmra.mrb[84].mxu1 %v8451_v63  ;;  %2765 = vmatprep.mubr.bf16.mxu0 %v1249_v9  ;;  %v1228_v52 = vmul.f32 %v8458_v20, %v8457_v26  ;;  %v8460_v9 = vld [vmem:[#allocation61_spill] sm:$0xff]  ;;  %v8461_v63 = vpack.c.bf16 %v6560_v48, %v6779_v38  ;;  %v8469_v48 = vld [vmem:[#allocation55_spill] sm:$0xff] }
  0xd9   : > { %2926 = vmatprep.mubr.bf16.mxu1 %v8454_v28  ;;  %v8470_v38 = vld [vmem:[#allocation67_spill] sm:$0xff] }
  0xda   : > { %v1251_v19 = vpack.c.bf16 %v1228_v52, %v8460_v9  ;;  %v8467_v52 = vld [vmem:[#allocation65_spill] sm:$0xff] }
  0xdf   : > { %2766 = vmatmul.mubr.bf16.gmra.mrb[88].mxu0 %v8449_v41  ;;  %v8462_v41 = vld [vmem:[#allocation62_spill] sm:$0xff] }
  0xe0   : > { %2927 = vmatmul.mubr.bf16.gmra.mrb[88].mxu1 %v8456_v27  ;;  %2773 = vmatprep.mubr.bf16.mxu0 %v1250_v10  ;;  %v1230_v56 = vmul.f32 %v8463_v51, %v8462_v41  ;;  %v8466_v27 = vpack.c.bf16 %v6596_v5, %v6783_v43  ;;  %v8473_v43 = vpack.c.bf16 %v6678_v22, %v6792_v62 }
  0xe1   : > { %2934 = vmatprep.mubr.bf16.mxu1 %v8459_v21 }
  0xe2   : > { %v1252_v10 = vpack.c.bf16 %v1230_v56, %v8465_v11  ;;  %v8472_v56 = vld [vmem:[#allocation66_spill] sm:$0xff] }
  0xe7   : > { %2774 = vmatmul.mubr.bf16.gmra.mrb[92].mxu0 %v8454_v28  ;;  %v8468_v28 = vld [vmem:[#allocation63_spill] sm:$0xff] }
  0xe8   : > { %2935 = vmatmul.mubr.bf16.gmra.mrb[92].mxu1 %v8461_v63  ;;  %2781 = vmatprep.mubr.bf16.mxu0 %v1251_v19  ;;  %v1232_v9 = vmul.f32 %v8468_v28, %v8467_v52  ;;  %v8471_v63 = vpack.c.bf16 %v6639_v1, %v6788_v18 }
  0xe9   : > { %2942 = vmatprep.mubr.bf16.mxu1 %v8464_v50 }
  0xea   : > { %v1253_v19 = vpack.c.bf16 %v1232_v9, %v8470_v38  ;;  %v1236_v9 = vmul.f32 %v6732_v40, %v6808_v55 }
  0xef   : > { %2782 = vmatmul.mubr.bf16.gmra.mrb[96].mxu0 %v8459_v21  ;;  %v1234_v21 = vmul.f32 %v8472_v56, %v6729_v35 }
  0xf0   : > { %2943 = vmatmul.mubr.bf16.gmra.mrb[96].mxu1 %v8466_v27  ;;  %2789 = vmatprep.mubr.bf16.mxu0 %v1252_v10 }
  0xf1   : > { %2950 = vmatprep.mubr.bf16.mxu1 %v8469_v48  ;;  %v1254_v5 = vpack.c.bf16 %v1234_v21, %v6739_v49 }
  0xf7   : > { %2790 = vmatmul.mubr.bf16.gmra.mrb[100].mxu0 %v8464_v50 }
  0xf8   : > { %2951 = vmatmul.mubr.bf16.gmra.mrb[100].mxu1 %v8471_v63  ;;  %2797 = vmatprep.mubr.bf16.mxu0 %v1253_v19  ;;  %v1255_v63 = vpack.c.bf16 %v1236_v9, %v6845_v30 }
  0xf9   : > { %2958 = vmatprep.mubr.bf16.mxu1 %v6600_v13 }
  0xff   : > { %2798 = vmatmul.mubr.bf16.gmra.mrb[104].mxu0 %v8469_v48 }
 0x100   : > { %2959 = vmatmul.mubr.bf16.gmra.mrb[104].mxu1 %v8473_v43  ;;  %2805 = vmatprep.mubr.bf16.mxu0 %v1254_v5  ;;  %v8474_v43 = vpack.c.bf16 %v6716_v23, %v6817_v33 }
 0x101   : > { %2966 = vmatprep.mubr.bf16.mxu1 %v6624_v54 }
 0x102   : > { %v4986_v1 = vpop.f32.mrb[0].mxu0 }
 0x103   : > { %v5098_v18 = vpop.f32.mrb[0].mxu1  ;;  %v4987_v50 = vpop.f32.mrb[1].mxu0 }
 0x104   : > { %v4988_v10 = vadd.f32 %v4987_v50, %v4986_v1  ;;  %v5099_v27 = vpop.f32.mrb[1].mxu1  ;;  %v4989_v19 = vpop.f32.mrb[2].mxu0  ;;  %v1238_v1 = vmul.f32 %v6813_v42, %v6865_v47 }
 0x105   : > { %v5100_v21 = vadd.f32 %v5099_v27, %v5098_v18  ;;  %v5101_v48 = vpop.f32.mrb[2].mxu1  ;;  %v4990_v56 = vpop.f32.mrb[3].mxu0 }
 0x106   : > { %v4991_v49 = vadd.f32 %v4990_v56, %v4989_v19  ;;  %v5102_v22 = vpop.f32.mrb[3].mxu1 }
 0x107   : > { %v7035_v62 = vadd.f32 %v5100_v21, %v4988_v10  ;;  %v5103_v5 = vadd.f32 %v5102_v22, %v5101_v48  ;;  %2806 = vmatmul.mubr.bf16.gmra.mrb[108].mxu0 %v6600_v13  ;;  %v1256_v13 = vpack.c.bf16 %v1238_v1, %v6885_v58 }
 0x108   : > { %2967 = vmatmul.mubr.bf16.gmra.mrb[108].mxu1 %v8474_v43  ;;  %2813 = vmatprep.mubr.bf16.mxu0 %v1255_v63 }
 0x109   : > { %v7043_v50 = vadd.f32 %v5103_v5, %v4991_v49  ;;  %2974 = vmatprep.mubr.bf16.mxu1 %v6667_v2  ;;  %v8475_v49 = vpack.c.bf16 %v6763_v39, %v6831_v16  ;;  %v1240_v5 = vmul.f32 %v6868_v14, %v6901_v12 }
 0x10a   : > { %v4992_v9 = vpop.f32.mrb[4].mxu0 }
 0x10b   : > { %v5104_v56 = vpop.f32.mrb[4].mxu1  ;;  %v4993_v18 = vpop.f32.mrb[5].mxu0 }
 0x10c   : > { %v4994_v10 = vadd.f32 %v4993_v18, %v4992_v9  ;;  %v5105_v27 = vpop.f32.mrb[5].mxu1  ;;  %v4995_v19 = vpop.f32.mrb[6].mxu0 }
 0x10d   : > { %v5106_v21 = vadd.f32 %v5105_v27, %v5104_v56  ;;  %v5107_v48 = vpop.f32.mrb[6].mxu1  ;;  %v4996_v23 = vpop.f32.mrb[7].mxu0 }
 0x10e   : > { %v4997_v33 = vadd.f32 %v4996_v23, %v4995_v19  ;;  %v5108_v63 = vpop.f32.mrb[7].mxu1 }
 0x10f   : > { %v7047_v22 = vadd.f32 %v5106_v21, %v4994_v10  ;;  %v5109_v43 = vadd.f32 %v5108_v63, %v5107_v48  ;;  %2814 = vmatmul.mubr.bf16.gmra.mrb[112].mxu0 %v6624_v54  ;;  %v1257_v54 = vpack.c.bf16 %v1240_v5, %v6916_v61  ;;  %v5815_v48 = vld [vmem:[%s6012_s27 + $0x78] sm:$0xff]   ;;  %v8479_v5 = vld [vmem:[#allocation18_spill] sm:$0xff] }
 0x110   : > { %2975 = vmatmul.mubr.bf16.gmra.mrb[112].mxu1 %v8475_v49  ;;  %2821 = vmatprep.mubr.bf16.mxu0 %v1256_v13  ;;  %v1415_v49 = vmul.f32 %v6822_v3, %v6118_v32 }
 0x111   : > { %v7055_v1 = vadd.f32 %v5109_v43, %v4997_v33  ;;  %2982 = vmatprep.mubr.bf16.mxu1 %v6894_v57  ;;  %v8478_v43 = vpack.c.bf16 %v6854_v46, %v6873_v34 }
 0x112   : > { %v4998_v9 = vpop.f32.mrb[8].mxu0 }
 0x113   : > { %8476 = vst [vmem:[#allocation15_spill] sm:$0xff] %v7055_v1  ;;  %v5110_v56 = vpop.f32.mrb[8].mxu1  ;;  %v4999_v18 = vpop.f32.mrb[9].mxu0 }
 0x114   : > { %v5000_v10 = vadd.f32 %v4999_v18, %v4998_v9  ;;  %v5111_v27 = vpop.f32.mrb[9].mxu1  ;;  %v5001_v19 = vpop.f32.mrb[10].mxu0  ;;  %v1242_v9 = vmul.f32 %v6904_v60, %v8479_v5  ;;  %v8481_v18 = vld [vmem:[#allocation11_spill] sm:$0xff] }
 0x115   : > { %v5112_v21 = vadd.f32 %v5111_v27, %v5110_v56  ;;  %v5113_v39 = vpop.f32.mrb[10].mxu1  ;;  %v5002_v16 = vpop.f32.mrb[11].mxu0  ;;  %v8482_v27 = vld [vmem:[#allocation12_spill] sm:$0xff] }
 0x116   : > { %v5003_v13 = vadd.f32 %v5002_v16, %v5001_v19  ;;  %v5114_v23 = vpop.f32.mrb[11].mxu1  ;;  %v1530_v19 = vmul.f32 0.0, %v8482_v27  ;;  %v8484_v27 = vld [vmem:[#allocation13_spill] sm:$0xff] }
 0x117   : > { %v7060_v63 = vadd.f32 %v5112_v21, %v5000_v10  ;;  %v5115_v33 = vadd.f32 %v5114_v23, %v5113_v39  ;;  %2822 = vmatmul.mubr.bf16.gmra.mrb[116].mxu0 %v6667_v2  ;;  %v1529_v10 = vmul.f32 0.0, %v8481_v18  ;;  %v8483_v23 = vld [vmem:[#allocation14_spill] sm:$0xff]  ;;  %v1418_v1 = vmul.f32 0.0, %v8484_v27 }
 0x118   : > { %2983 = vmatmul.mubr.bf16.gmra.mrb[116].mxu1 %v8478_v43  ;;  %2829 = vmatprep.mubr.bf16.mxu0 %v1257_v54  ;;  %v1433_v54 = vpack.c.bf16 %v6113_v31, %v1415_v49  ;;  %v1258_v32 = vpack.c.bf16 %v1242_v9, %v8483_v23  ;;  %v1644_v31 = vmul.f32 %v6907_v17, %v6214_v45 }
 0x119   : > { %8477 = vst [vmem:[#allocation17_spill] sm:$0xff] %v7060_v63  ;;  %v7070_v56 = vadd.f32 %v5115_v33, %v5003_v13  ;;  %2990 = vmatprep.mubr.bf16.mxu1 %v5815_v48  ;;  %v1546_v13 = vpack.c.bf16 %v1530_v19, %v1529_v10  ;;  %v1646_v45 = vmul.f32 %v6038_v53, %v8421_v0 }
 0x11a   : > { %v5004_v21 = vpop.f32.mrb[12].mxu0 }
 0x11b   : > { %8480 = vst [vmem:[#allocation25_spill] sm:$0xff] %v7070_v56  ;;  %v5116_v2 = vpop.f32.mrb[12].mxu1  ;;  %v5005_v39 = vpop.f32.mrb[13].mxu0 }
 0x11c   : > { %v5006_v16 = vadd.f32 %v5005_v39, %v5004_v21  ;;  %v5117_v46 = vpop.f32.mrb[13].mxu1  ;;  %v5007_v34 = vpop.f32.mrb[14].mxu0  ;;  %v8485_v21 = vld [vmem:[#allocation16_spill] sm:$0xff] }
 0x11d   : > { %v5118_v3 = vadd.f32 %v5117_v46, %v5116_v2  ;;  %v5119_v43 = vpop.f32.mrb[14].mxu1  ;;  %v5008_v60 = vpop.f32.mrb[15].mxu0  ;;  %v1417_v39 = vmul.f32 0.0, %v8485_v21 }
 0x11e   : > { %v5009_v33 = vadd.f32 %v5008_v60, %v5007_v34  ;;  %v5120_v56 = vpop.f32.mrb[15].mxu1 }
 0x11f   : > { %v7076_v63 = vadd.f32 %v5118_v3, %v5006_v16  ;;  %v5121_v18 = vadd.f32 %v5120_v56, %v5119_v43  ;;  %2830 = vmatmul.mubr.bf16.gmra.mrb[120].mxu0 %v6894_v57  ;;  %v1434_v46 = vpack.c.bf16 %v1418_v1, %v1417_v39  ;;  %v1675_v57 = vpack.c.bf16 %v1644_v31, %v6252_v6 }
 0x120   : > { %2991 = vmatmul.mubr.bf16.gmra.mrb[120].mxu1 %v1433_v54  ;;  %2837 = vmatprep.mubr.bf16.mxu0 %v1258_v32 }
 0x121   : > { %v7083_v49 = vadd.f32 %v5121_v18, %v5009_v33  ;;  %2998 = vmatprep.mubr.bf16.mxu1 %v1546_v13  ;;  %v1648_v13 = vmul.f32 %v8422_v36, %v8428_v44  ;;  %v1676_v33 = vpack.c.bf16 %v1646_v45, %v8425_v15  ;;  %v8486_v44 = vld [vmem:[#allocation45_spill] sm:$0xff]  ;;  %v8488_v15 = vld [vmem:[#allocation38_spill] sm:$0xff] }
 0x122   : > { %v5010_v9 = vpop.f32.mrb[16].mxu0 }
 0x123   : > { %v5122_v10 = vpop.f32.mrb[16].mxu1  ;;  %v5011_v19 = vpop.f32.mrb[17].mxu0  ;;  %v1677_v53 = vpack.c.bf16 %v1648_v13, %v8432_v59 }
 0x124   : > { %v5012_v2 = vadd.f32 %v5011_v19, %v5010_v9  ;;  %v5123_v16 = vpop.f32.mrb[17].mxu1  ;;  %v5013_v56 = vpop.f32.mrb[18].mxu0 }
 0x125   : > { %v5124_v34 = vadd.f32 %v5123_v16, %v5122_v10  ;;  %v5125_v54 = vpop.f32.mrb[18].mxu1  ;;  %v5014_v32 = vpop.f32.mrb[19].mxu0  ;;  %v8487_v16 = vld [vmem:[#allocation31_spill] sm:$0xff] }
 0x126   : > { %v5015_v3 = vadd.f32 %v5014_v32, %v5013_v56  ;;  %v5126_v43 = vpop.f32.mrb[19].mxu1  ;;  %v1650_v56 = vmul.f32 %v8487_v16, %v8486_v44 }
 0x127   : > { %v7088_v17 = vadd.f32 %v5124_v34, %v5012_v2  ;;  %v5127_v60 = vadd.f32 %v5126_v43, %v5125_v54  ;;  %2838 = vmatmul.mubr.bf16.gmra.mrb[124].mxu0 %v5815_v48 }
 0x128   : > { %2999 = vmatmul.mubr.bf16.gmra.mrb[124].mxu1 %v1434_v46  ;;  %5591 = vmatprep.mubr.bf16.mxu0 %v1675_v57  ;;  %v1652_v46 = vmul.f32 %v8488_v15, %v8442_v8  ;;  %v1678_v32 = vpack.c.bf16 %v1650_v56, %v8439_v25  ;;  %v1656_v25 = vmul.f32 %v8448_v7, %v8452_v24  ;;  %v8491_v24 = vld [vmem:[#allocation53_spill] sm:$0xff] }
 0x129   : > { %v7092_v1 = vadd.f32 %v5127_v60, %v5015_v3 }
 0x12a   : > { %v5016_v6 = vpop.f32.mrb[20].mxu0  ;;  %v1679_v60 = vpack.c.bf16 %v1652_v46, %v8446_v29  ;;  %v1681_v16 = vpack.c.bf16 %v1656_v25, %v8455_v4 }
 0x12b   : > { %v5128_v18 = vpop.f32.mrb[20].mxu1  ;;  %v5017_v27 = vpop.f32.mrb[21].mxu0 }
 0x12c   : > { %v5018_v21 = vadd.f32 %v5017_v27, %v5016_v6  ;;  %v5129_v39 = vpop.f32.mrb[21].mxu1  ;;  %v5019_v31 = vpop.f32.mrb[22].mxu0 }
 0x12d   : > { %v5130_v0 = vadd.f32 %v5129_v39, %v5128_v18  ;;  %v5131_v9 = vpop.f32.mrb[22].mxu1  ;;  %v5020_v48 = vpop.f32.mrb[23].mxu0  ;;  %v8489_v39 = vld [vmem:[#allocation44_spill] sm:$0xff] }
 0x12e   : > { %v5021_v10 = vadd.f32 %v5020_v48, %v5019_v31  ;;  %v5132_v19 = vpop.f32.mrb[23].mxu1  ;;  %v1654_v31 = vmul.f32 %v8489_v39, %v8447_v37  ;;  %v8490_v48 = vld [vmem:[#allocation54_spill] sm:$0xff] }
 0x12f   : > { %v7096_v2 = vadd.f32 %v5130_v0, %v5018_v21  ;;  %v5133_v36 = vadd.f32 %v5132_v19, %v5131_v9  ;;  %5592 = vmatmul.mubr.bf16.vlgmr.msra.gmra.mrb[128].mxu0 %v1676_v33 }
 0x130   : > { %5595 = vmatprep.mubr.bf16.mxu0 %v1677_v53 }
 0x131   : > { %v7102_v57 = vadd.f32 %v5133_v36, %v5021_v10  ;;  %v1680_v10 = vpack.c.bf16 %v1654_v31, %v8490_v48 }
 0x132   : > { %v5022_v34 = vpop.f32.mrb[24].mxu0 }
 0x133   : > { %v5134_v59 = vpop.f32.mrb[24].mxu1  ;;  %v5023_v54 = vpop.f32.mrb[25].mxu0 }
 0x134   : > { %v5024_v3 = vadd.f32 %v5023_v54, %v5022_v34  ;;  %v5135_v43 = vpop.f32.mrb[25].mxu1  ;;  %v5025_v45 = vpop.f32.mrb[26].mxu0  ;;  %v1658_v54 = vmul.f32 %v8491_v24, %v8457_v26 }
 0x135   : > { %v5136_v13 = vadd.f32 %v5135_v43, %v5134_v59  ;;  %v5137_v6 = vpop.f32.mrb[26].mxu1  ;;  %v5026_v33 = vpop.f32.mrb[27].mxu0 }
 0x136   : > { %v5027_v18 = vadd.f32 %v5026_v33, %v5025_v45  ;;  %v5138_v27 = vpop.f32.mrb[27].mxu1 }
 0x137   : > { %v7106_v21 = vadd.f32 %v5136_v13, %v5024_v3  ;;  %v5139_v8 = vadd.f32 %v5138_v27, %v5137_v6  ;;  %5596 = vmatmul.mubr.bf16.gmra.mrb[132].mxu0 %v1678_v32  ;;  %v1660_v32 = vmul.f32 %v8458_v20, %v8462_v41  ;;  %v1662_v41 = vmul.f32 %v8463_v51, %v8467_v52 }
 0x138   : > { %5599 = vmatprep.mubr.bf16.mxu0 %v1679_v60  ;;  %v8492_v60 = vld [vmem:[#allocation61_spill] sm:$0xff] }
 0x139   : > { %v7112_v53 = vadd.f32 %v5139_v8, %v5027_v18  ;;  %v1682_v13 = vpack.c.bf16 %v1658_v54, %v8492_v60  ;;  %v1683_v27 = vpack.c.bf16 %v1660_v32, %v8465_v11 }
 0x13a   : > { %v5028_v0 = vpop.f32.mrb[28].mxu0 }
 0x13b   : > { %v5140_v29 = vpop.f32.mrb[28].mxu1  ;;  %v5029_v9 = vpop.f32.mrb[29].mxu0 }
 0x13c   : > { %v5030_v19 = vadd.f32 %v5029_v9, %v5028_v0  ;;  %v5141_v36 = vpop.f32.mrb[29].mxu1  ;;  %v5031_v44 = vpop.f32.mrb[30].mxu0 }
 0x13d   : > { %v5142_v56 = vadd.f32 %v5141_v36, %v5140_v29  ;;  %v5143_v15 = vpop.f32.mrb[30].mxu1  ;;  %v5032_v46 = vpop.f32.mrb[31].mxu0  ;;  %v1664_v29 = vmul.f32 %v8468_v28, %v6729_v35  ;;  %v8494_v28 = vld [vmem:[#allocation66_spill] sm:$0xff] }
 0x13e   : > { %v5033_v37 = vadd.f32 %v5032_v46, %v5031_v44  ;;  %v5144_v34 = vpop.f32.mrb[31].mxu1  ;;  %v1666_v24 = vmul.f32 %v8494_v28, %v6808_v55 }
 0x13f   : > { %v7116_v59 = vadd.f32 %v5142_v56, %v5030_v19  ;;  %v5145_v7 = vadd.f32 %v5144_v34, %v5143_v15  ;;  %5600 = vmatmul.mubr.bf16.gmra.mrb[136].mxu0 %v1680_v10  ;;  %v1684_v19 = vpack.c.bf16 %v1662_v41, %v8470_v38  ;;  %v8493_v56 = vld [vmem:[#allocation68_spill] sm:$0xff]  ;;  %v1668_v38 = vmul.f32 %v6732_v40, %v6865_v47 }
 0x140   : > { %5603 = vmatprep.mubr.bf16.mxu0 %v1681_v16  ;;  %v1685_v15 = vpack.c.bf16 %v1664_v29, %v8493_v56  ;;  %v1670_v47 = vmul.f32 %v6813_v42, %v6901_v12 }
 0x141   : > { %v7122_v3 = vadd.f32 %v5145_v7, %v5033_v37 }
 0x142   : > { %v5034_v43 = vpop.f32.mrb[32].mxu0  ;;  %v1688_v41 = vpack.c.bf16 %v1670_v47, %v6916_v61 }
 0x143   : > { %v5146_v4 = vpop.f32.mrb[32].mxu1  ;;  %v5035_v45 = vpop.f32.mrb[33].mxu0 }
 0x144   : > { %v5036_v6 = vadd.f32 %v5035_v45, %v5034_v43  ;;  %v5147_v33 = vpop.f32.mrb[33].mxu1  ;;  %v5037_v18 = vpop.f32.mrb[34].mxu0  ;;  %v1686_v45 = vpack.c.bf16 %v1666_v24, %v6845_v30  ;;  %v1672_v30 = vmul.f32 %v6868_v14, %v8479_v5  ;;  %v8495_v5 = vld [vmem:[#allocation24_spill] sm:$0xff] }
 0x145   : > { %v5148_v8 = vadd.f32 %v5147_v33, %v5146_v4  ;;  %v5149_v39 = vpop.f32.mrb[34].mxu1  ;;  %v5038_v31 = vpop.f32.mrb[35].mxu0  ;;  %v1687_v33 = vpack.c.bf16 %v1668_v38, %v6885_v58  ;;  %v1673_v56 = vmul.f32 0.0, %v8495_v5 }
 0x146   : > { %v5039_v26 = vadd.f32 %v5038_v31, %v5037_v18  ;;  %v5150_v25 = vpop.f32.mrb[35].mxu1 }
 0x147   : > { %v7126_v0 = vadd.f32 %v5148_v8, %v5036_v6  ;;  %v5151_v20 = vadd.f32 %v5150_v25, %v5149_v39  ;;  %5604 = vmatmul.mubr.bf16.gmra.mrb[140].mxu0 %v1682_v13 }
 0x148   : > { %5607 = vmatprep.mubr.bf16.mxu0 %v1683_v27 }
 0x149   : > { %v7132_v9 = vadd.f32 %v5151_v20, %v5039_v26 }
 0x14a   : > { %v5040_v48 = vpop.f32.mrb[36].mxu0 }
 0x14b   : > { %v5152_v11 = vpop.f32.mrb[36].mxu1  ;;  %v5041_v10 = vpop.f32.mrb[37].mxu0 }
 0x14c   : > { %v5042_v36 = vadd.f32 %v5041_v10, %v5040_v48  ;;  %v5153_v44 = vpop.f32.mrb[37].mxu1  ;;  %v5043_v16 = vpop.f32.mrb[38].mxu0  ;;  %v1689_v10 = vpack.c.bf16 %v1672_v30, %v8483_v23 }
 0x14d   : > { %v5154_v46 = vadd.f32 %v5153_v44, %v5152_v11  ;;  %v5155_v37 = vpop.f32.mrb[38].mxu1  ;;  %v5044_v34 = vpop.f32.mrb[39].mxu0 }
 0x14e   : > { %v5045_v51 = vadd.f32 %v5044_v34, %v5043_v16  ;;  %v5156_v52 = vpop.f32.mrb[39].mxu1 }
 0x14f   : > { %v7136_v7 = vadd.f32 %v5154_v46, %v5042_v36  ;;  %v5157_v35 = vadd.f32 %v5156_v52, %v5155_v37  ;;  %5608 = vmatmul.mubr.bf16.gmra.mrb[144].mxu0 %v1684_v19 }
 0x150   : > { %5611 = vmatprep.mubr.bf16.mxu0 %v1685_v15  ;;  %v8496_v15 = vld [vmem:[#allocation22_spill] sm:$0xff] }
 0x151   : > { %v7142_v54 = vadd.f32 %v5157_v35, %v5045_v51  ;;  %v1674_v46 = vmul.f32 0.0, %v8496_v15 }
 0x152   : > { %v5046_v32 = vpop.f32.mrb[40].mxu0 }
 0x153   : > { %v5158_v43 = vpop.f32.mrb[40].mxu1  ;;  %v5047_v4 = vpop.f32.mrb[41].mxu0  ;;  %v1690_v23 = vpack.c.bf16 %v1674_v46, %v1673_v56 }
 0x154   : > { %v5048_v60 = vadd.f32 %v5047_v4, %v5046_v32  ;;  %v5159_v13 = vpop.f32.mrb[41].mxu1  ;;  %v5049_v6 = vpop.f32.mrb[42].mxu0 }
 0x155   : > { %v5160_v18 = vadd.f32 %v5159_v13, %v5158_v43  ;;  %v5161_v27 = vpop.f32.mrb[42].mxu1  ;;  %v5050_v8 = vpop.f32.mrb[43].mxu0 }
 0x156   : > { %v5051_v55 = vadd.f32 %v5050_v8, %v5049_v6  ;;  %v5162_v39 = vpop.f32.mrb[43].mxu1 }
 0x157   : > { %v7146_v31 = vadd.f32 %v5160_v18, %v5048_v60  ;;  %v5163_v40 = vadd.f32 %v5162_v39, %v5161_v27  ;;  %5612 = vmatmul.mubr.bf16.gmra.mrb[148].mxu0 %v1686_v45 }
 0x158   : > { %5615 = vmatprep.mubr.bf16.mxu0 %v1687_v33 }
 0x159   : > { %v7152_v26 = vadd.f32 %v5163_v40, %v5051_v55 }
 0x15a   : > { %v5052_v25 = vpop.f32.mrb[44].mxu0 }
 0x15b   : > { %v5164_v58 = vpop.f32.mrb[44].mxu1  ;;  %v5053_v20 = vpop.f32.mrb[45].mxu0 }
 0x15c   : > { %v5054_v29 = vadd.f32 %v5053_v20, %v5052_v25  ;;  %v5165_v48 = vpop.f32.mrb[45].mxu1  ;;  %v5055_v11 = vpop.f32.mrb[46].mxu0 }
 0x15d   : > { %v5166_v19 = vadd.f32 %v5165_v48, %v5164_v58  ;;  %v5167_v36 = vpop.f32.mrb[46].mxu1  ;;  %v5056_v44 = vpop.f32.mrb[47].mxu0 }
 0x15e   : > { %v5057_v42 = vadd.f32 %v5056_v44, %v5055_v11  ;;  %v5168_v12 = vpop.f32.mrb[47].mxu1 }
 0x15f   : > { %v7156_v16 = vadd.f32 %v5166_v19, %v5054_v29  ;;  %v5169_v14 = vadd.f32 %v5168_v12, %v5167_v36  ;;  %5616 = vmatmul.mubr.bf16.gmra.mrb[152].mxu0 %v1688_v41 }
 0x160   : > { %5619 = vmatprep.mubr.bf16.mxu0 %v1689_v10 }
 0x161   : > { %v7160_v61 = vadd.f32 %v5169_v14, %v5057_v42 }
 0x162   : > { %v5058_v37 = vpop.f32.mrb[48].mxu0 }
 0x163   : > { %v5170_v34 = vpop.f32.mrb[48].mxu1  ;;  %v5059_v51 = vpop.f32.mrb[49].mxu0 }
 0x164   : > { %v5060_v52 = vadd.f32 %v5059_v51, %v5058_v37  ;;  %v5171_v35 = vpop.f32.mrb[49].mxu1  ;;  %v5061_v28 = vpop.f32.mrb[50].mxu0 }
 0x165   : > { %v5172_v24 = vadd.f32 %v5171_v35, %v5170_v34  ;;  %v5173_v38 = vpop.f32.mrb[50].mxu1  ;;  %v5062_v32 = vpop.f32.mrb[51].mxu0 }
 0x166   : > { %v5063_v43 = vadd.f32 %v5062_v32, %v5061_v28  ;;  %v5174_v4 = vpop.f32.mrb[51].mxu1 }
 0x167   : > { %v7162_v45 = vadd.f32 %v5172_v24, %v5060_v52  ;;  %v5175_v60 = vadd.f32 %v5174_v4, %v5173_v38  ;;  %5620 = vmatmul.mubr.bf16.gmra.mrb[156].mxu0 %v1690_v23 }
 0x169   : > { %v7164_v13 = vadd.f32 %v5175_v60, %v5063_v43 }
 0x16a   : > { %v5064_v6 = vpop.f32.mrb[52].mxu0 }
 0x16b   : > { %v5176_v33 = vpop.f32.mrb[52].mxu1  ;;  %v5065_v18 = vpop.f32.mrb[53].mxu0 }
 0x16c   : > { %v5066_v27 = vadd.f32 %v5065_v18, %v5064_v6  ;;  %v5177_v8 = vpop.f32.mrb[53].mxu1  ;;  %v5067_v55 = vpop.f32.mrb[54].mxu0 }
 0x16d   : > { %v5178_v39 = vadd.f32 %v5177_v8, %v5176_v33  ;;  %v5179_v40 = vpop.f32.mrb[54].mxu1  ;;  %v5068_v47 = vpop.f32.mrb[55].mxu0 }
 0x16e   : > { %v5069_v30 = vadd.f32 %v5068_v47, %v5067_v55  ;;  %v5180_v25 = vpop.f32.mrb[55].mxu1 }
 0x16f   : > { %v7166_v58 = vadd.f32 %v5178_v39, %v5066_v27  ;;  %v5181_v20 = vadd.f32 %v5180_v25, %v5179_v40 }
 0x171   : > { %v7168_v41 = vadd.f32 %v5181_v20, %v5069_v30 }
 0x172   : > { %v5070_v29 = vpop.f32.mrb[56].mxu0 }
 0x173   : > { %v5182_v48 = vpop.f32.mrb[56].mxu1  ;;  %v5071_v11 = vpop.f32.mrb[57].mxu0 }
 0x174   : > { %v5072_v10 = vadd.f32 %v5071_v11, %v5070_v29  ;;  %v5183_v19 = vpop.f32.mrb[57].mxu1  ;;  %v5073_v36 = vpop.f32.mrb[58].mxu0 }
 0x175   : > { %v5184_v44 = vadd.f32 %v5183_v19, %v5182_v48  ;;  %v5185_v42 = vpop.f32.mrb[58].mxu1  ;;  %v5074_v12 = vpop.f32.mrb[59].mxu0 }
 0x176   : > { %v5075_v14 = vadd.f32 %v5074_v12, %v5073_v36  ;;  %v5186_v5 = vpop.f32.mrb[59].mxu1 }
 0x177   : > { %v7170_v56 = vadd.f32 %v5184_v44, %v5072_v10  ;;  %v5187_v15 = vadd.f32 %v5186_v5, %v5185_v42 }
 0x179   : > { %v7172_v46 = vadd.f32 %v5187_v15, %v5075_v14 }
 0x17a   : > { %v5076_v37 = vpop.f32.mrb[60].mxu0 }
 0x17b   : > { %v5188_v34 = vpop.f32.mrb[60].mxu1  ;;  %v5077_v51 = vpop.f32.mrb[61].mxu0 }
 0x17c   : > { %v5078_v23 = vadd.f32 %v5077_v51, %v5076_v37  ;;  %v5189_v52 = vpop.f32.mrb[61].mxu1  ;;  %v5079_v35 = vpop.f32.mrb[62].mxu0 }
 0x17d   : > { %v5190_v28 = vadd.f32 %v5189_v52, %v5188_v34  ;;  %v5191_v24 = vpop.f32.mrb[62].mxu1  ;;  %v5080_v38 = vpop.f32.mrb[63].mxu0 }
 0x17e   : > { %v5081_v32 = vadd.f32 %v5080_v38, %v5079_v35  ;;  %v5192_v43 = vpop.f32.mrb[63].mxu1  ;;  %v8497_v35 = vld [vmem:[#allocation15_spill] sm:$0xff] }
 0x17f   : > { %v7174_v4 = vadd.f32 %v5190_v28, %v5078_v23  ;;  %v5193_v60 = vadd.f32 %v5192_v43, %v5191_v24 }
 0x181   : > { %v7176_v6 = vadd.f32 %v5193_v60, %v5081_v32 }
 0x182   : > { %v5210_v33 = vpop.f32.mrb[64].mxu0 }
 0x183   : > { %v5211_v18 = vpop.f32.mrb[65].mxu0  ;;  %v5322_v27 = vpop.f32.mrb[64].mxu1 }
 0x184   : > { %v5212_v8 = vadd.f32 %v5211_v18, %v5210_v33  ;;  %v5213_v55 = vpop.f32.mrb[66].mxu0  ;;  %v5323_v39 = vpop.f32.mrb[65].mxu1 }
 0x185   : > { %v5214_v40 = vpop.f32.mrb[67].mxu0  ;;  %v5324_v47 = vadd.f32 %v5323_v39, %v5322_v27  ;;  %v5325_v30 = vpop.f32.mrb[66].mxu1  ;;  %v8498_v39 = vld [vmem:[#allocation17_spill] sm:$0xff] }
 0x186   : > { %v2720_v25 = vadd.f32 %v5212_v8, %v7035_v62  ;;  %v5215_v20 = vadd.f32 %v5214_v40, %v5213_v55  ;;  %v5326_v29 = vpop.f32.mrb[67].mxu1 }
 0x187   : > { %v5327_v48 = vadd.f32 %v5326_v29, %v5325_v30 }
 0x188   : > { %v2723_v11 = vadd.f32 %v5215_v20, %v7043_v50  ;;  %v7180_v10 = vadd.f32 %v5324_v47, %v2720_v25  ;;  %v8499_v25 = vld [vmem:[#allocation25_spill] sm:$0xff] }
 0x18a   : > { %v5216_v19 = vpop.f32.mrb[68].mxu0  ;;  %v7182_v36 = vadd.f32 %v5327_v48, %v2723_v11 }
 0x18b   : > { %v5217_v44 = vpop.f32.mrb[69].mxu0  ;;  %v5328_v42 = vpop.f32.mrb[68].mxu1 }
 0x18c   : > { %v5218_v12 = vadd.f32 %v5217_v44, %v5216_v19  ;;  %v5219_v14 = vpop.f32.mrb[70].mxu0  ;;  %v5329_v5 = vpop.f32.mrb[69].mxu1 }
 0x18d   : > { %v5220_v15 = vpop.f32.mrb[71].mxu0  ;;  %v5330_v37 = vadd.f32 %v5329_v5, %v5328_v42  ;;  %v5331_v34 = vpop.f32.mrb[70].mxu1 }
 0x18e   : > { %v2728_v62 = vadd.f32 %v5218_v12, %v7047_v22  ;;  %v5221_v51 = vadd.f32 %v5220_v15, %v5219_v14  ;;  %v5332_v23 = vpop.f32.mrb[71].mxu1 }
 0x18f   : > { %v5333_v52 = vadd.f32 %v5332_v23, %v5331_v34 }
 0x190   : > { %v2731_v50 = vadd.f32 %v5221_v51, %v8497_v35  ;;  %v7186_v28 = vadd.f32 %v5330_v37, %v2728_v62 }
 0x192   : > { %v5222_v24 = vpop.f32.mrb[72].mxu0  ;;  %v7188_v38 = vadd.f32 %v5333_v52, %v2731_v50 }
 0x193   : > { %v5223_v32 = vpop.f32.mrb[73].mxu0  ;;  %v5334_v43 = vpop.f32.mrb[72].mxu1 }
 0x194   : > { %v5224_v60 = vadd.f32 %v5223_v32, %v5222_v24  ;;  %v5225_v33 = vpop.f32.mrb[74].mxu0  ;;  %v5335_v18 = vpop.f32.mrb[73].mxu1 }
 0x195   : > { %v5226_v27 = vpop.f32.mrb[75].mxu0  ;;  %v5336_v8 = vadd.f32 %v5335_v18, %v5334_v43  ;;  %v5337_v55 = vpop.f32.mrb[74].mxu1 }
 0x196   : > { %v2736_v22 = vadd.f32 %v5224_v60, %v8498_v39  ;;  %v5227_v40 = vadd.f32 %v5226_v27, %v5225_v33  ;;  %v5338_v47 = vpop.f32.mrb[75].mxu1 }
 0x197   : > { %v5339_v30 = vadd.f32 %v5338_v47, %v5337_v55 }
 0x198   : > { %v2739_v20 = vadd.f32 %v5227_v40, %v8499_v25  ;;  %v7192_v29 = vadd.f32 %v5336_v8, %v2736_v22 }
 0x19a   : > { %v5228_v48 = vpop.f32.mrb[76].mxu0  ;;  %v7194_v11 = vadd.f32 %v5339_v30, %v2739_v20 }
 0x19b   : > { %v5229_v19 = vpop.f32.mrb[77].mxu0  ;;  %v5340_v44 = vpop.f32.mrb[76].mxu1 }
 0x19c   : > { %v5230_v42 = vadd.f32 %v5229_v19, %v5228_v48  ;;  %v5231_v12 = vpop.f32.mrb[78].mxu0  ;;  %v5341_v14 = vpop.f32.mrb[77].mxu1 }
 0x19d   : > { %v5232_v5 = vpop.f32.mrb[79].mxu0  ;;  %v5342_v15 = vadd.f32 %v5341_v14, %v5340_v44  ;;  %v5343_v37 = vpop.f32.mrb[78].mxu1 }
 0x19e   : > { %v2744_v34 = vadd.f32 %v5230_v42, %v7076_v63  ;;  %v5233_v62 = vadd.f32 %v5232_v5, %v5231_v12  ;;  %v5344_v51 = vpop.f32.mrb[79].mxu1 }
 0x19f   : > { %v5345_v23 = vadd.f32 %v5344_v51, %v5343_v37 }
 0x1a0   : > { %v2747_v52 = vadd.f32 %v5233_v62, %v7083_v49  ;;  %v7198_v35 = vadd.f32 %v5342_v15, %v2744_v34 }
 0x1a2   : > { %v5234_v50 = vpop.f32.mrb[80].mxu0  ;;  %v7200_v24 = vadd.f32 %v5345_v23, %v2747_v52 }
 0x1a3   : > { %v5235_v32 = vpop.f32.mrb[81].mxu0  ;;  %v5346_v43 = vpop.f32.mrb[80].mxu1 }
 0x1a4   : > { %v5236_v60 = vadd.f32 %v5235_v32, %v5234_v50  ;;  %v5237_v33 = vpop.f32.mrb[82].mxu0  ;;  %v5347_v18 = vpop.f32.mrb[81].mxu1 }
 0x1a5   : > { %v5238_v27 = vpop.f32.mrb[83].mxu0  ;;  %v5348_v8 = vadd.f32 %v5347_v18, %v5346_v43  ;;  %v5349_v55 = vpop.f32.mrb[82].mxu1 }
 0x1a6   : > { %v2752_v63 = vadd.f32 %v5236_v60, %v7088_v17  ;;  %v5239_v39 = vadd.f32 %v5238_v27, %v5237_v33  ;;  %v5350_v22 = vpop.f32.mrb[83].mxu1 }
 0x1a7   : > { %v5351_v40 = vadd.f32 %v5350_v22, %v5349_v55 }
 0x1a8   : > { %v2755_v49 = vadd.f32 %v5239_v39, %v7092_v1  ;;  %v7204_v47 = vadd.f32 %v5348_v8, %v2752_v63 }
 0x1aa   : > { %v5240_v30 = vpop.f32.mrb[84].mxu0  ;;  %v7206_v25 = vadd.f32 %v5351_v40, %v2755_v49 }
 0x1ab   : > { %v5241_v20 = vpop.f32.mrb[85].mxu0  ;;  %v5352_v48 = vpop.f32.mrb[84].mxu1 }
 0x1ac   : > { %v5242_v19 = vadd.f32 %v5241_v20, %v5240_v30  ;;  %v5243_v44 = vpop.f32.mrb[86].mxu0  ;;  %v5353_v42 = vpop.f32.mrb[85].mxu1 }
 0x1ad   : > { %v5244_v12 = vpop.f32.mrb[87].mxu0  ;;  %v5354_v14 = vadd.f32 %v5353_v42, %v5352_v48  ;;  %v5355_v5 = vpop.f32.mrb[86].mxu1 }
 0x1ae   : > { %v2760_v17 = vadd.f32 %v5242_v19, %v7096_v2  ;;  %v5245_v15 = vadd.f32 %v5244_v12, %v5243_v44  ;;  %v5356_v37 = vpop.f32.mrb[87].mxu1 }
 0x1af   : > { %v5357_v34 = vadd.f32 %v5356_v37, %v5355_v5 }
 0x1b0   : > { %v2763_v1 = vadd.f32 %v5245_v15, %v7102_v57  ;;  %v7210_v62 = vadd.f32 %v5354_v14, %v2760_v17 }
 0x1b2   : > { %v5246_v51 = vpop.f32.mrb[88].mxu0  ;;  %v7212_v23 = vadd.f32 %v5357_v34, %v2763_v1 }
 0x1b3   : > { %v5247_v52 = vpop.f32.mrb[89].mxu0  ;;  %v5358_v50 = vpop.f32.mrb[88].mxu1 }
 0x1b4   : > { %v5248_v32 = vadd.f32 %v5247_v52, %v5246_v51  ;;  %v5249_v43 = vpop.f32.mrb[90].mxu0  ;;  %v5359_v60 = vpop.f32.mrb[89].mxu1 }
 0x1b5   : > { %v5250_v33 = vpop.f32.mrb[91].mxu0  ;;  %v5360_v18 = vadd.f32 %v5359_v60, %v5358_v50  ;;  %v5361_v27 = vpop.f32.mrb[90].mxu1 }
 0x1b6   : > { %v2768_v2 = vadd.f32 %v5248_v32, %v7106_v21  ;;  %v5251_v8 = vadd.f32 %v5250_v33, %v5249_v43  ;;  %v5362_v55 = vpop.f32.mrb[91].mxu1 }
 0x1b7   : > { %v5363_v63 = vadd.f32 %v5362_v55, %v5361_v27 }
 0x1b8   : > { %v2771_v57 = vadd.f32 %v5251_v8, %v7112_v53  ;;  %v7216_v39 = vadd.f32 %v5360_v18, %v2768_v2 }
 0x1ba   : > { %v5252_v22 = vpop.f32.mrb[92].mxu0  ;;  %v7218_v40 = vadd.f32 %v5363_v63, %v2771_v57 }
 0x1bb   : > { %v5253_v49 = vpop.f32.mrb[93].mxu0  ;;  %v5364_v30 = vpop.f32.mrb[92].mxu1 }
 0x1bc   : > { %v5254_v20 = vadd.f32 %v5253_v49, %v5252_v22  ;;  %v5255_v48 = vpop.f32.mrb[94].mxu0  ;;  %v5365_v19 = vpop.f32.mrb[93].mxu1 }
 0x1bd   : > { %v5256_v44 = vpop.f32.mrb[95].mxu0  ;;  %v5366_v42 = vadd.f32 %v5365_v19, %v5364_v30  ;;  %v5367_v12 = vpop.f32.mrb[94].mxu1 }
 0x1be   : > { %v2776_v21 = vadd.f32 %v5254_v20, %v7116_v59  ;;  %v5257_v14 = vadd.f32 %v5256_v44, %v5255_v48  ;;  %v5368_v5 = vpop.f32.mrb[95].mxu1 }
 0x1bf   : > { %v5369_v17 = vadd.f32 %v5368_v5, %v5367_v12 }
 0x1c0   : > { %v2779_v53 = vadd.f32 %v5257_v14, %v7122_v3  ;;  %v7222_v15 = vadd.f32 %v5366_v42, %v2776_v21 }
 0x1c2   : > { %v5258_v37 = vpop.f32.mrb[96].mxu0  ;;  %v7224_v34 = vadd.f32 %v5369_v17, %v2779_v53 }
 0x1c3   : > { %v5259_v1 = vpop.f32.mrb[97].mxu0  ;;  %v5370_v51 = vpop.f32.mrb[96].mxu1 }
 0x1c4   : > { %v5260_v52 = vadd.f32 %v5259_v1, %v5258_v37  ;;  %v5261_v50 = vpop.f32.mrb[98].mxu0  ;;  %v5371_v32 = vpop.f32.mrb[97].mxu1 }
 0x1c5   : > { %v5262_v43 = vpop.f32.mrb[99].mxu0  ;;  %v5372_v60 = vadd.f32 %v5371_v32, %v5370_v51  ;;  %v5373_v33 = vpop.f32.mrb[98].mxu1 }
 0x1c6   : > { %v2784_v59 = vadd.f32 %v5260_v52, %v7126_v0  ;;  %v5263_v18 = vadd.f32 %v5262_v43, %v5261_v50  ;;  %v5374_v27 = vpop.f32.mrb[99].mxu1 }
 0x1c7   : > { %v5375_v2 = vadd.f32 %v5374_v27, %v5373_v33 }
 0x1c8   : > { %v2787_v3 = vadd.f32 %v5263_v18, %v7132_v9  ;;  %v7228_v8 = vadd.f32 %v5372_v60, %v2784_v59 }
 0x1ca   : > { %v5264_v55 = vpop.f32.mrb[100].mxu0  ;;  %v7230_v63 = vadd.f32 %v5375_v2, %v2787_v3  ;;  %v5752_v3 = vld [vmem:[%s8194_s3 + $0x4] ss:$8 sps:$4 sm:$0xff]  }
 0x1cb   : > { %v5265_v57 = vpop.f32.mrb[101].mxu0  ;;  %v5376_v22 = vpop.f32.mrb[100].mxu1  ;;  %3498 = vmatprep.mubr.bf16.mxu1 %v5752_v3 }
 0x1cc   : > { %v5266_v49 = vadd.f32 %v5265_v57, %v5264_v55  ;;  %v5267_v30 = vpop.f32.mrb[102].mxu0  ;;  %v5377_v20 = vpop.f32.mrb[101].mxu1 }
 0x1cd   : > { %v5268_v48 = vpop.f32.mrb[103].mxu0  ;;  %v5378_v19 = vadd.f32 %v5377_v20, %v5376_v22  ;;  %v5379_v44 = vpop.f32.mrb[102].mxu1 }
 0x1ce   : > { %v2792_v0 = vadd.f32 %v5266_v49, %v7136_v7  ;;  %v5269_v42 = vadd.f32 %v5268_v48, %v5267_v30  ;;  %v5380_v12 = vpop.f32.mrb[103].mxu1 }
 0x1cf   : > { %v5381_v21 = vadd.f32 %v5380_v12, %v5379_v44 }
 0x1d0   : > { %v2795_v9 = vadd.f32 %v5269_v42, %v7142_v54  ;;  %v7234_v14 = vadd.f32 %v5378_v19, %v2792_v0 }
 0x1d2   : > { %v5270_v5 = vpop.f32.mrb[104].mxu0  ;;  %v7236_v17 = vadd.f32 %v5381_v21, %v2795_v9 }
 0x1d3   : > { %v5271_v53 = vpop.f32.mrb[105].mxu0  ;;  %v5382_v37 = vpop.f32.mrb[104].mxu1 }
 0x1d4   : > { %v5272_v1 = vadd.f32 %v5271_v53, %v5270_v5  ;;  %v5273_v51 = vpop.f32.mrb[106].mxu0  ;;  %v5383_v52 = vpop.f32.mrb[105].mxu1 }
 0x1d5   : > { %v5274_v50 = vpop.f32.mrb[107].mxu0  ;;  %v5384_v32 = vadd.f32 %v5383_v52, %v5382_v37  ;;  %v5385_v43 = vpop.f32.mrb[106].mxu1 }
 0x1d6   : > { %v2800_v7 = vadd.f32 %v5272_v1, %v7146_v31  ;;  %v5275_v60 = vadd.f32 %v5274_v50, %v5273_v51  ;;  %v5386_v33 = vpop.f32.mrb[107].mxu1 }
 0x1d7   : > { %v5387_v59 = vadd.f32 %v5386_v33, %v5385_v43 }
 0x1d8   : > { %v2803_v54 = vadd.f32 %v5275_v60, %v7152_v26  ;;  %v7240_v18 = vadd.f32 %v5384_v32, %v2800_v7 }
 0x1da   : > { %v5276_v27 = vpop.f32.mrb[108].mxu0  ;;  %v7242_v2 = vadd.f32 %v5387_v59, %v2803_v54 }
 0x1db   : > { %v5277_v55 = vpop.f32.mrb[109].mxu0  ;;  %v5388_v57 = vpop.f32.mrb[108].mxu1 }
 0x1dc   : > { %v5278_v22 = vadd.f32 %v5277_v55, %v5276_v27  ;;  %v5279_v49 = vpop.f32.mrb[110].mxu0  ;;  %v5389_v30 = vpop.f32.mrb[109].mxu1 }
 0x1dd   : > { %v5280_v31 = vpop.f32.mrb[111].mxu0  ;;  %v5390_v20 = vadd.f32 %v5389_v30, %v5388_v57  ;;  %v5391_v48 = vpop.f32.mrb[110].mxu1 }
 0x1de   : > { %v2808_v26 = vadd.f32 %v5278_v22, %v7156_v16  ;;  %v5281_v19 = vadd.f32 %v5280_v31, %v5279_v49  ;;  %v5392_v44 = vpop.f32.mrb[111].mxu1 }
 0x1df   : > { %v5393_v0 = vadd.f32 %v5392_v44, %v5391_v48 }
 0x1e0   : > { %v2811_v42 = vadd.f32 %v5281_v19, %v7160_v61  ;;  %v7249_v12 = vadd.f32 %v5390_v20, %v2808_v26 }
 0x1e2   : > { %v5282_v21 = vpop.f32.mrb[112].mxu0  ;;  %v7251_v9 = vadd.f32 %v5393_v0, %v2811_v42 }
 0x1e3   : > { %v5283_v5 = vpop.f32.mrb[113].mxu0  ;;  %v5394_v53 = vpop.f32.mrb[112].mxu1 }
 0x1e4   : > { %v5284_v37 = vadd.f32 %v5283_v5, %v5282_v21  ;;  %v5285_v1 = vpop.f32.mrb[114].mxu0  ;;  %v5395_v51 = vpop.f32.mrb[113].mxu1 }
 0x1e5   : > { %v5286_v52 = vpop.f32.mrb[115].mxu0  ;;  %v5396_v50 = vadd.f32 %v5395_v51, %v5394_v53  ;;  %v5397_v32 = vpop.f32.mrb[114].mxu1 }
 0x1e6   : > { %v2816_v16 = vadd.f32 %v5284_v37, %v7162_v45  ;;  %v5287_v43 = vadd.f32 %v5286_v52, %v5285_v1  ;;  %v5398_v7 = vpop.f32.mrb[115].mxu1 }
 0x1e7   : > { %v5399_v60 = vadd.f32 %v5398_v7, %v5397_v32 }
 0x1e8   : > { %v2819_v61 = vadd.f32 %v5287_v43, %v7164_v13  ;;  %v7255_v33 = vadd.f32 %v5396_v50, %v2816_v16 }
 0x1ea   : > { %v5288_v59 = vpop.f32.mrb[116].mxu0  ;;  %v7257_v54 = vadd.f32 %v5399_v60, %v2819_v61 }
 0x1eb   : > { %v5289_v27 = vpop.f32.mrb[117].mxu0  ;;  %v5400_v3 = vpop.f32.mrb[116].mxu1 }
 0x1ec   : > { %v5290_v55 = vadd.f32 %v5289_v27, %v5288_v59  ;;  %v5291_v57 = vpop.f32.mrb[118].mxu0  ;;  %v5401_v22 = vpop.f32.mrb[117].mxu1 }
 0x1ed   : > { %v5292_v49 = vpop.f32.mrb[119].mxu0  ;;  %v5402_v30 = vadd.f32 %v5401_v22, %v5400_v3  ;;  %v5403_v31 = vpop.f32.mrb[118].mxu1 }
 0x1ee   : > { %v2824_v45 = vadd.f32 %v5290_v55, %v7166_v58  ;;  %v5293_v20 = vadd.f32 %v5292_v49, %v5291_v57  ;;  %v5404_v48 = vpop.f32.mrb[119].mxu1 }
 0x1ef   : > { %v5405_v26 = vadd.f32 %v5404_v48, %v5403_v31 }
 0x1f0   : > { %v2827_v13 = vadd.f32 %v5293_v20, %v7168_v41  ;;  %v7261_v19 = vadd.f32 %v5402_v30, %v2824_v45 }
 0x1f2   : > { %v5294_v44 = vpop.f32.mrb[120].mxu0  ;;  %v7263_v0 = vadd.f32 %v5405_v26, %v2827_v13  ;;  %v7278_v26 = vld [vmem:[%s8193_s2] ss:$0 sm:$0xff] }
 0x1f3   : > { %v5295_v42 = vpop.f32.mrb[121].mxu0  ;;  %v5406_v21 = vpop.f32.mrb[120].mxu1 }
 0x1f4   : > { %v5296_v5 = vadd.f32 %v5295_v42, %v5294_v44  ;;  %v5297_v53 = vpop.f32.mrb[122].mxu0  ;;  %v5407_v37 = vpop.f32.mrb[121].mxu1 }
 0x1f5   : > { %v5298_v1 = vpop.f32.mrb[123].mxu0  ;;  %v5408_v51 = vadd.f32 %v5407_v37, %v5406_v21  ;;  %v5409_v52 = vpop.f32.mrb[122].mxu1 }
 0x1f6   : > { %v2832_v58 = vadd.f32 %v5296_v5, %v7170_v56  ;;  %v5299_v50 = vadd.f32 %v5298_v1, %v5297_v53  ;;  %v5410_v32 = vpop.f32.mrb[123].mxu1 }
 0x1f7   : > { %v5411_v16 = vadd.f32 %v5410_v32, %v5409_v52 }
 0x1f8   : > { %v2835_v41 = vadd.f32 %v5299_v50, %v7172_v46  ;;  %v7267_v43 = vadd.f32 %v5408_v51, %v2832_v58 }
 0x1fa   : > { %v5300_v7 = vpop.f32.mrb[124].mxu0  ;;  %v7269_v60 = vadd.f32 %v5411_v16, %v2835_v41 }
 0x1fb   : > { %v5301_v61 = vpop.f32.mrb[125].mxu0  ;;  %v5412_v59 = vpop.f32.mrb[124].mxu1 }
 0x1fc   : > { %v5302_v27 = vadd.f32 %v5301_v61, %v5300_v7  ;;  %v5303_v3 = vpop.f32.mrb[126].mxu0  ;;  %v5413_v55 = vpop.f32.mrb[125].mxu1 }
 0x1fd   : > { %v5304_v57 = vpop.f32.mrb[127].mxu0  ;;  %v5414_v22 = vadd.f32 %v5413_v55, %v5412_v59  ;;  %v5415_v49 = vpop.f32.mrb[126].mxu1 }
 0x1fe   : > { %v2840_v56 = vadd.f32 %v5302_v27, %v7174_v4  ;;  %v5305_v30 = vadd.f32 %v5304_v57, %v5303_v3  ;;  %v5416_v31 = vpop.f32.mrb[127].mxu1  ;;  %v7286_v4 = vld [vmem:[%s8193_s2 + $0x1] ss:$0 sm:$0xff] }
 0x1ff   : > { %v5417_v45 = vadd.f32 %v5416_v31, %v5415_v49 }
 0x200   : > { %v2843_v46 = vadd.f32 %v5305_v30, %v7176_v6  ;;  %v7273_v20 = vadd.f32 %v5414_v22, %v2840_v56 }
 0x202   : > { %v5593_v48 = vpop.f32.mrb[128].mxu0  ;;  %v7280_v13 = vadd.f32 %v5417_v45, %v2843_v46 }
 0x203   : > { %v3050_v44 = vadd.f32 %v5593_v48, %v7186_v28  ;;  %v3041_v42 = vpop.f32.mrb[129].mxu0 }
 0x204   : > { %v3042_v6 = vadd.f32 %v3041_v42, %v7180_v10  ;;  %v5594_v21 = vpop.f32.mrb[130].mxu0 }
 0x205   : > { %v3175_v5 = vmul.f32 %v7278_v26, %v3050_v44  ;;  %v3053_v53 = vadd.f32 %v5594_v21, %v7188_v38  ;;  %v3044_v37 = vpop.f32.mrb[131].mxu0 }
 0x206   : > { %v3173_v1 = vmul.f32 %v7278_v26, %v3042_v6  ;;  %v3045_v51 = vadd.f32 %v3044_v37, %v7182_v36 }
 0x207   : > { %v3212_v28 = vadd.f32 %v7286_v4, %v3175_v5  ;;  %v3176_v52 = vmul.f32 %v7278_v26, %v3053_v53 }
 0x208   : > { %v3210_v58 = vadd.f32 %v7286_v4, %v3173_v1  ;;  %v3174_v50 = vmul.f32 %v7278_v26, %v3045_v51 }
 0x209   : > { %v3244_v32 = vmax.f32 %v3212_v28, 0.0  ;;  %v3213_v10 = vadd.f32 %v7286_v4, %v3176_v52 }
 0x20a   : > { %v3242_v16 = vmax.f32 %v3210_v58, 0.0  ;;  %v3211_v41 = vadd.f32 %v7286_v4, %v3174_v50  ;;  %v5597_v38 = vpop.f32.mrb[132].mxu0 }
 0x20b   : > { %v3245_v7 = vmax.f32 %v3213_v10, 0.0  ;;  %v3066_v61 = vadd.f32 %v5597_v38, %v7198_v35  ;;  %v3057_v59 = vpop.f32.mrb[133].mxu0  ;;  %v3276_v55 = vrot.slane %v3244_v32, 1  ;;  %v8500_v35 = vld [vmem:[#allocation2_spill] sm:$0xff] }
 0x20c   : > { %v3243_v36 = vmax.f32 %v3211_v41, 0.0  ;;  %v3058_v27 = vadd.f32 %v3057_v59, %v7192_v29  ;;  %v5598_v3 = vpop.f32.mrb[134].mxu0  ;;  %v7303_v30 = vrot.slane %v3242_v16, 1 }
 0x20d   : > { %v3277_v57 = vrot.slane %v3245_v7, 1  ;;  %v3179_v22 = vmul.f32 %v7278_v26, %v3066_v61  ;;  %v3069_v49 = vadd.f32 %v5598_v3, %v7200_v24  ;;  %v3060_v56 = vpop.f32.mrb[135].mxu0 }
 0x20e   : > { %v3275_v31 = vrot.slane %v3243_v36, 1  ;;  %v3177_v45 = vmul.f32 %v7278_v26, %v3058_v27  ;;  %v3061_v46 = vadd.f32 %v3060_v56, %v7194_v11 }
 0x20f   : > { %v3334_v48 = vsel %vm826_vm3, %v3276_v55, %v3277_v57  ;;  %v3216_v29 = vadd.f32 %v7286_v4, %v3179_v22  ;;  %v3180_v44 = vmul.f32 %v7278_v26, %v3069_v49 }
 0x210   : > { %v3335_v42 = vsel %vm826_vm3, %v3275_v31, %v3276_v55  ;;  %v3336_v24 = vsel %vm826_vm3, %v7303_v30, %v3275_v31  ;;  %v3214_v6 = vadd.f32 %v7286_v4, %v3177_v45  ;;  %v3178_v21 = vmul.f32 %v7278_v26, %v3061_v46 }
 0x211   : > { %v7318_v5 = vmax.f32 %v3243_v36, %v3335_v42  ;;  %v3248_v11 = vmax.f32 %v3216_v29, 0.0  ;;  %v3217_v53 = vadd.f32 %v7286_v4, %v3180_v44  ;;  %v7321_v37 = vmax.f32 %v3242_v16, %v3336_v24 }
 0x212   : > { %v3246_v1 = vmax.f32 %v3214_v6, 0.0  ;;  %v3215_v51 = vadd.f32 %v7286_v4, %v3178_v21  ;;  %v5601_v28 = vpop.f32.mrb[136].mxu0  ;;  %v7324_v52 = vmax.f32 %v3244_v32, %v3334_v48 }
 0x213   : > { %v3249_v58 = vmax.f32 %v3217_v53, 0.0  ;;  %v3082_v50 = vadd.f32 %v5601_v28, %v7210_v62  ;;  %v3073_v10 = vpop.f32.mrb[137].mxu0  ;;  %v3280_v16 = vrot.slane %v3248_v11, 1 }
 0x214   : > { %v3278_v41 = vrot.slane %v3246_v1, 1  ;;  %v3247_v38 = vmax.f32 %v3215_v51, 0.0  ;;  %v3074_v61 = vadd.f32 %v3073_v10, %v7204_v47  ;;  %v5602_v59 = vpop.f32.mrb[138].mxu0  ;;  %v3370_v36 = vmax.f32 %v7321_v37, %v7324_v52 }
 0x215   : > { %v3281_v27 = vrot.slane %v3249_v58, 1  ;;  %v3183_v3 = vmul.f32 %v7278_v26, %v3082_v50  ;;  %v3085_v55 = vadd.f32 %v5602_v59, %v7212_v23  ;;  %v3076_v32 = vpop.f32.mrb[139].mxu0 }
 0x216   : > { %v3333_v22 = vsel %vm826_vm3, %v3277_v57, %v3278_v41  ;;  %v3279_v62 = vrot.slane %v3247_v38, 1  ;;  %v3181_v49 = vmul.f32 %v7278_v26, %v3074_v61  ;;  %v3077_v56 = vadd.f32 %v3076_v32, %v7206_v25 }
 0x217   : > { %v3330_v47 = vsel %vm826_vm3, %v3280_v16, %v3281_v27  ;;  %v3341_v31 = vmax.f32 %v3245_v7, %v3333_v22  ;;  %v7339_v45 = vadd.f32 %v7286_v4, %v3183_v3  ;;  %v3184_v46 = vmul.f32 %v7278_v26, %v3085_v55 }
 0x218   : > { %v3331_v23 = vsel %vm826_vm3, %v3279_v62, %v3280_v16  ;;  %v3332_v57 = vsel %vm826_vm3, %v3278_v41, %v3279_v62  ;;  %v3218_v48 = vadd.f32 %v7286_v4, %v3181_v49  ;;  %v3182_v29 = vmul.f32 %v7278_v26, %v3077_v56 }
 0x219   : > { %v3343_v25 = vmax.f32 %v3247_v38, %v3331_v23  ;;  %v3252_v44 = vmax.f32 %v7339_v45, 0.0  ;;  %v7350_v7 = vadd.f32 %v7286_v4, %v3184_v46  ;;  %v3371_v42 = vmax.f32 %v7318_v5, %v3341_v31 }
 0x21a   : > { %v3250_v24 = vmax.f32 %v3218_v48, 0.0  ;;  %v3219_v6 = vadd.f32 %v7286_v4, %v3182_v29  ;;  %v5605_v21 = vpop.f32.mrb[140].mxu0  ;;  %v3342_v53 = vmax.f32 %v3246_v1, %v3332_v57  ;;  %v7354_v51 = vmax.f32 %v3248_v11, %v3330_v47 }
 0x21b   : > { %v3373_v28 = vmax.f32 %v3341_v31, %v3343_v25  ;;  %v3284_v50 = vrot.slane %v3252_v44, 1  ;;  %v3253_v10 = vmax.f32 %v7350_v7, 0.0  ;;  %v3098_v41 = vadd.f32 %v5605_v21, %v7222_v15  ;;  %v3089_v38 = vpop.f32.mrb[141].mxu0 }
 0x21c   : > { %v3282_v61 = vrot.slane %v3250_v24, 1  ;;  %v3251_v59 = vmax.f32 %v3219_v6, 0.0  ;;  %v3090_v16 = vadd.f32 %v3089_v38, %v7216_v39  ;;  %v5606_v3 = vpop.f32.mrb[142].mxu0  ;;  %v7361_v55 = vpack.c.bf16 %v3371_v42, %v3370_v36 }
 0x21d   : > { %v3285_v32 = vrot.slane %v3253_v10, 1  ;;  %v3187_v11 = vmul.f32 %v7278_v26, %v3098_v41  ;;  %v3101_v1 = vadd.f32 %v5606_v3, %v7224_v34  ;;  %v3092_v22 = vpop.f32.mrb[143].mxu0  ;;  %v3372_v62 = vmax.f32 %v7324_v52, %v3342_v53 }
 0x21e   : > { %v3329_v49 = vsel %vm826_vm3, %v3281_v27, %v3282_v61  ;;  %v3283_v15 = vrot.slane %v3251_v59, 1  ;;  %v3185_v56 = vmul.f32 %v7278_v26, %v3090_v16  ;;  %v3093_v47 = vadd.f32 %v3092_v22, %v7218_v40 }
 0x21f   : > { %v3326_v39 = vsel %vm826_vm3, %v3284_v50, %v3285_v32  ;;  %v3345_v36 = vmax.f32 %v3249_v58, %v3329_v49  ;;  %v7373_v31 = vadd.f32 %v7286_v4, %v3187_v11  ;;  %v3188_v34 = vmul.f32 %v7278_v26, %v3101_v1 }
 0x220   : > { %v3327_v52 = vsel %vm826_vm3, %v3283_v15, %v3284_v50  ;;  %v3328_v27 = vsel %vm826_vm3, %v3282_v61, %v3283_v15  ;;  %v7381_v46 = vadd.f32 %v7286_v4, %v3185_v56  ;;  %v3186_v40 = vmul.f32 %v7278_v26, %v3093_v47 }
 0x221   : > { %v7384_v23 = vmax.f32 %v3251_v59, %v3327_v52  ;;  %v3256_v58 = vmax.f32 %v7373_v31, 0.0  ;;  %v7388_v57 = vadd.f32 %v7286_v4, %v3188_v34  ;;  %v7390_v48 = vpack.c.bf16 %v3373_v28, %v3372_v62 }
 0x222   : > { %v3254_v29 = vmax.f32 %v7381_v46, 0.0  ;;  %v3223_v7 = vadd.f32 %v7286_v4, %v3186_v40  ;;  %v5609_v42 = vpop.f32.mrb[144].mxu0  ;;  %v3374_v6 = vmax.f32 %v3342_v53, %v7354_v51  ;;  %v3375_v21 = vmax.f32 %v3343_v25, %v3345_v36 }
 0x223   : > { %v3377_v50 = vmax.f32 %v3345_v36, %v7384_v23  ;;  %v3288_v41 = vrot.slane %v3256_v58, 1  ;;  %v3257_v38 = vmax.f32 %v7388_v57, 0.0  ;;  %v3114_v61 = vadd.f32 %v5609_v42, %v7234_v14  ;;  %v3105_v59 = vpop.f32.mrb[145].mxu0 }
 0x224   : > { %v3286_v28 = vrot.slane %v3254_v29, 1  ;;  %v3255_v16 = vmax.f32 %v3223_v7, 0.0  ;;  %v3106_v3 = vadd.f32 %v3105_v59, %v7228_v8  ;;  %v5610_v11 = vpop.f32.mrb[146].mxu0  ;;  %v7403_v1 = vpack.c.bf16 %v3375_v21, %v3374_v6 }
 0x225   : > { %v3289_v25 = vrot.slane %v3257_v38, 1  ;;  %v3191_v53 = vmul.f32 %v7278_v26, %v3114_v61  ;;  %v3117_v22 = vadd.f32 %v5610_v11, %v7236_v17  ;;  %v3108_v62 = vpop.f32.mrb[147].mxu0  ;;  %v3346_v49 = vmax.f32 %v3250_v24, %v3328_v27 }
 0x226   : > { %v3325_v14 = vsel %vm826_vm3, %v3285_v32, %v3286_v28  ;;  %v3287_v15 = vrot.slane %v3255_v16, 1  ;;  %v3189_v56 = vmul.f32 %v7278_v26, %v3106_v3  ;;  %v3109_v47 = vadd.f32 %v3108_v62, %v7230_v63 }
 0x227   : > { %v7413_v8 = vsel %vm826_vm3, %v3288_v41, %v3289_v25  ;;  %v7415_v36 = vmax.f32 %v3253_v10, %v3325_v14  ;;  %v3228_v34 = vadd.f32 %v7286_v4, %v3191_v53  ;;  %v3192_v17 = vmul.f32 %v7278_v26, %v3117_v22 }
 0x228   : > { %v3323_v24 = vsel %vm826_vm3, %v3287_v15, %v3288_v41  ;;  %v3324_v32 = vsel %vm826_vm3, %v3286_v28, %v3287_v15  ;;  %v3226_v52 = vadd.f32 %v7286_v4, %v3189_v56  ;;  %v3190_v63 = vmul.f32 %v7278_v26, %v3109_v47 }
 0x229   : > { %v7425_v27 = vmax.f32 %v3255_v16, %v3323_v24  ;;  %v3260_v40 = vmax.f32 %v3228_v34, 0.0  ;;  %v7428_v10 = vadd.f32 %v7286_v4, %v3192_v17  ;;  %v3376_v57 = vmax.f32 %v7354_v51, %v3346_v49 }
 0x22a   : > { %v3258_v7 = vmax.f32 %v3226_v52, 0.0  ;;  %v3227_v42 = vadd.f32 %v7286_v4, %v3190_v63  ;;  %v5613_v6 = vpop.f32.mrb[148].mxu0  ;;  %v7434_v21 = vmax.f32 %v3252_v44, %v3326_v39  ;;  %v3379_v41 = vmax.f32 %v7384_v23, %v7415_v36 }
 0x22b   : > { %v3381_v61 = vmax.f32 %v7415_v36, %v7425_v27  ;;  %v3292_v59 = vrot.slane %v3260_v40, 1  ;;  %v3261_v28 = vmax.f32 %v7428_v10, 0.0  ;;  %v3130_v16 = vadd.f32 %v5613_v6, %v7249_v12  ;;  %v3121_v51 = vpop.f32.mrb[149].mxu0 }
 0x22c   : > { %v3290_v3 = vrot.slane %v3258_v7, 1  ;;  %v3259_v11 = vmax.f32 %v3227_v42, 0.0  ;;  %v3122_v53 = vadd.f32 %v3121_v51, %v7240_v18  ;;  %v5614_v22 = vpop.f32.mrb[150].mxu0  ;;  %v7443_v45 = vpack.c.bf16 %v3377_v50, %v3376_v57 }
 0x22d   : > { %v3293_v44 = vrot.slane %v3261_v28, 1  ;;  %v3195_v39 = vmul.f32 %v7278_v26, %v3130_v16  ;;  %v3133_v23 = vadd.f32 %v5614_v22, %v7251_v9  ;;  %v3124_v62 = vpop.f32.mrb[151].mxu0  ;;  %v3378_v14 = vmax.f32 %v3346_v49, %v7434_v21 }
 0x22e   : > { %v3321_v15 = vsel %vm826_vm3, %v3289_v25, %v3290_v3  ;;  %v3291_v12 = vrot.slane %v3259_v11, 1  ;;  %v3193_v56 = vmul.f32 %v7278_v26, %v3122_v53  ;;  %v3125_v47 = vadd.f32 %v3124_v62, %v7242_v2 }
 0x22f   : > { %v7452_v18 = vmax.f32 %v3257_v38, %v3321_v15  ;;  %v3232_v50 = vadd.f32 %v7286_v4, %v3195_v39  ;;  %v3196_v34 = vmul.f32 %v7278_v26, %v3133_v23  ;;  %v3318_v9 = vsel %vm826_vm3, %v3292_v59, %v3293_v44 }
 0x230   : > { %v3319_v49 = vsel %vm826_vm3, %v3291_v12, %v3292_v59  ;;  %v3230_v17 = vadd.f32 %v7286_v4, %v3193_v56  ;;  %v3194_v25 = vmul.f32 %v7278_v26, %v3125_v47  ;;  %v3320_v24 = vsel %vm826_vm3, %v3290_v3, %v3291_v12 }
 0x231   : > { %v7464_v2 = vmax.f32 %v3259_v11, %v3319_v49  ;;  %v3264_v38 = vmax.f32 %v3232_v50, 0.0  ;;  %v7467_v52 = vadd.f32 %v7286_v4, %v3196_v34  ;;  %v7469_v63 = vmax.f32 %v3258_v7, %v3320_v24 }
 0x232   : > { %v3262_v10 = vmax.f32 %v3230_v17, 0.0  ;;  %v3231_v57 = vadd.f32 %v7286_v4, %v3194_v25  ;;  %v5617_v42 = vpop.f32.mrb[152].mxu0  ;;  %v3356_v6 = vmax.f32 %v3260_v40, %v3318_v9  ;;  %v7472_v59 = vpack.c.bf16 %v3379_v41, %v3378_v14 }
 0x233   : > { %v3385_v16 = vmax.f32 %v7452_v18, %v7464_v2  ;;  %v3296_v51 = vrot.slane %v3264_v38, 1  ;;  %v3265_v3 = vmax.f32 %v7467_v52, 0.0  ;;  %v3146_v11 = vadd.f32 %v5617_v42, %v7261_v19  ;;  %v3137_v53 = vpop.f32.mrb[153].mxu0 }
 0x234   : > { %v3294_v22 = vrot.slane %v3262_v10, 1  ;;  %v3263_v39 = vmax.f32 %v3231_v57, 0.0  ;;  %v3138_v7 = vadd.f32 %v3137_v53, %v7255_v33  ;;  %v5618_v23 = vpop.f32.mrb[154].mxu0  ;;  %v3386_v62 = vmax.f32 %v7469_v63, %v3356_v6 }
 0x235   : > { %v3297_v15 = vrot.slane %v3265_v3, 1  ;;  %v3199_v40 = vmul.f32 %v7278_v26, %v3146_v11  ;;  %v3149_v41 = vadd.f32 %v5618_v23, %v7263_v0  ;;  %v3140_v14 = vpop.f32.mrb[155].mxu0  ;;  %v7484_v12 = vmax.f32 %v3254_v29, %v3324_v32 }
 0x236   : > { %v3295_v56 = vrot.slane %v3263_v39, 1  ;;  %v3197_v19 = vmul.f32 %v7278_v26, %v3138_v7  ;;  %v3141_v47 = vadd.f32 %v3140_v14, %v7257_v54  ;;  %v3317_v33 = vsel %vm826_vm3, %v3293_v44, %v3294_v22 }
 0x237   : > { %v7491_v50 = vadd.f32 %v7286_v4, %v3199_v40  ;;  %v3200_v34 = vmul.f32 %v7278_v26, %v3149_v41  ;;  %v3357_v9 = vmax.f32 %v3261_v28, %v3317_v33  ;;  %v3314_v0 = vsel %vm826_vm3, %v3296_v51, %v3297_v15 }
 0x238   : > { %v3315_v46 = vsel %vm826_vm3, %v3295_v56, %v3296_v51  ;;  %v3234_v29 = vadd.f32 %v7286_v4, %v3197_v19  ;;  %v3198_v32 = vmul.f32 %v7278_v26, %v3141_v47  ;;  %v3316_v54 = vsel %vm826_vm3, %v3294_v22, %v3295_v56 }
 0x239   : > { %v3359_v44 = vmax.f32 %v3263_v39, %v3315_v46  ;;  %v3268_v49 = vmax.f32 %v7491_v50, 0.0  ;;  %v7504_v17 = vadd.f32 %v7286_v4, %v3200_v34  ;;  %v3387_v28 = vmax.f32 %v7464_v2, %v3357_v9  ;;  %v5756_v2 = vld [vmem:[%s8194_s3 + $0x24] ss:$8 sps:$4 sm:$0xff]  }
 0x23a   : > { %v3266_v25 = vmax.f32 %v3234_v29, 0.0  ;;  %v3235_v24 = vadd.f32 %v7286_v4, %v3198_v32  ;;  %v5621_v52 = vpop.f32.mrb[156].mxu0  ;;  %v3358_v57 = vmax.f32 %v3262_v10, %v3316_v54  ;;  %v3360_v42 = vmax.f32 %v3264_v38, %v3314_v0 }
 0x23b   : > { %v3300_v51 = vrot.slane %v3268_v49, 1  ;;  %v3269_v11 = vmax.f32 %v7504_v17, 0.0  ;;  %v3162_v53 = vadd.f32 %v5621_v52, %v7273_v20  ;;  %v3153_v22 = vpop.f32.mrb[157].mxu0  ;;  %v3418_v39 = vpack.c.bf16 %v3387_v28, %v3386_v62 }
 0x23c   : > { %v3298_v7 = vrot.slane %v3266_v25, 1  ;;  %v3267_v23 = vmax.f32 %v3235_v24, 0.0  ;;  %v3154_v40 = vadd.f32 %v3153_v22, %v7267_v43  ;;  %v5622_v41 = vpop.f32.mrb[158].mxu0  ;;  %v3388_v14 = vmax.f32 %v3356_v6, %v3358_v57 }
 0x23d   : > { %v3301_v56 = vrot.slane %v3269_v11, 1  ;;  %v3203_v19 = vmul.f32 %v7278_v26, %v3162_v53  ;;  %v3165_v47 = vadd.f32 %v5622_v41, %v7280_v13  ;;  %v3156_v10 = vpop.f32.mrb[159].mxu0  ;;  %5442 = vmatprep.subr.bf16.mxu1 %v3418_v39  ;;  %v3389_v38 = vmax.f32 %v3357_v9, %v3359_v44 }
 0x23e   : > { %v3299_v33 = vrot.slane %v3267_v23, 1  ;;  %v3201_v50 = vmul.f32 %v7278_v26, %v3154_v40  ;;  %v3157_v20 = vadd.f32 %v3156_v10, %v7269_v60  ;;  %5443 = vmatpush3.bf16.msra.mxu1 %v7361_v55  ;;  %v3313_v43 = vsel %vm826_vm3, %v3297_v15, %v3298_v7 }
 0x23f   : > { %v3240_v6 = vadd.f32 %v7286_v4, %v3203_v19  ;;  %v3204_v62 = vmul.f32 %v7278_v26, %v3165_v47  ;;  %v3419_v34 = vpack.c.bf16 %v3389_v38, %v3388_v14  ;;  %v3361_v0 = vmax.f32 %v3265_v3, %v3313_v43 }
 0x240   : > { %v3311_v13 = vsel %vm826_vm3, %v3299_v33, %v3300_v51  ;;  %v3238_v9 = vadd.f32 %v7286_v4, %v3201_v50  ;;  %v3202_v46 = vmul.f32 %v7278_v26, %v3157_v20  ;;  %v3390_v29 = vmax.f32 %v3358_v57, %v3360_v42 }
 0x241   : > { %v3363_v60 = vmax.f32 %v3267_v23, %v3311_v13  ;;  %v3272_v32 = vmax.f32 %v3240_v6, 0.0  ;;  %v3241_v55 = vadd.f32 %v7286_v4, %v3204_v62  ;;  %5444 = vmatprep.subr.bf16.mxu1 %v3419_v34  ;;  %v3391_v15 = vmax.f32 %v3359_v44, %v3361_v0  ;;  %v5761_v62 = vld [vmem:[%s8194_s3 + $0x30] ss:$8 sps:$4 sm:$0xff]   ;;  %v5762_v34 = vld [vmem:[%s8195_s4 + $0xc0] sm:$0xff]   ;;  %v5764_v13 = vld [vmem:[%s8195_s4 + $0xc8] sm:$0xff]  }
 0x242   : > { %v3270_v54 = vmax.f32 %v3238_v9, 0.0  ;;  %v3239_v17 = vadd.f32 %v7286_v4, %v3202_v46  ;;  %5445 = vmatpush3.bf16.msra.mxu1 %v7390_v48  ;;  %v3312_v3 = vsel %vm826_vm3, %v3298_v7, %v3299_v33  ;;  %v3310_v28 = vsel %vm826_vm3, %v3300_v51, %v3301_v56  ;;  %v5766_v9 = vld [vmem:[%s8195_s4 + $0x40] sm:$0xff]   ;;  %5522 = vmatprep.subr.bf16.mxu0 %v5762_v34 }
 0x243   : > { %v3304_v24 = vrot.slane %v3272_v32, 1  ;;  %v3273_v26 = vmax.f32 %v3241_v55, 0.0  ;;  %v3420_v52 = vpack.c.bf16 %v3391_v15, %v3390_v29  ;;  %v3362_v57 = vmax.f32 %v3266_v25, %v3312_v3  ;;  %v5768_v46 = vld [vmem:[%s8195_s4] sm:$0xff]   ;;  %v5770_v29 = vld [vmem:[%s8195_s4 + $0x48] sm:$0xff]   ;;  %v5774_v15 = vld [vmem:[%s8195_s4 + $0x50] sm:$0xff]  }
 0x244   : > { %v3302_v53 = vrot.slane %v3270_v54, 1  ;;  %v3271_v22 = vmax.f32 %v3239_v17, 0.0  ;;  %v3393_v39 = vmax.f32 %v3361_v0, %v3363_v60  ;;  %v3364_v23 = vmax.f32 %v3268_v49, %v3310_v28  ;;  %v5763_v0 = vld [vmem:[%s8195_s4 + $0x80] sm:$0xff]   ;;  %v5772_v55 = vld [vmem:[%s8195_s4 + $0x8] sm:$0xff]   ;;  %v5771_v17 = vld [vmem:[%s8195_s4 + $0xd8] sm:$0xff]  }
 0x245   : > { %v3305_v44 = vrot.slane %v3273_v26, 1  ;;  %5446 = vmatprep.subr.bf16.mxu1 %v3420_v52  ;;  %v3392_v40 = vmax.f32 %v3360_v42, %v3362_v57  ;;  %v3380_v4 = vmax.f32 %v7434_v21, %v7484_v12  ;;  %v3352_v48 = vmax.f32 %v3256_v58, %v7413_v8  ;;  %5523 = vmatpush3.bf16.msra.mxu0 %v5763_v0  ;;  %v5776_v3 = vld [vmem:[%s8195_s4 + $0x10] sm:$0xff]   ;;  %v5773_v28 = vld [vmem:[%s8195_s4 + $0x98] sm:$0xff]   ;;  %v8501_v52 = vld [vmem:[#allocation3_spill] sm:$0xff] }
 0x246   : > { %v3303_v7 = vrot.slane %v3271_v22, 1  ;;  %5447 = vmatpush3.bf16.msra.mxu1 %v7403_v1  ;;  %v3309_v25 = vsel %vm826_vm3, %v3301_v56, %v3302_v53  ;;  %v3394_v51 = vmax.f32 %v3362_v57, %v3364_v23  ;;  %v3383_v49 = vmax.f32 %v7425_v27, %v7452_v18  ;;  %v5755_v18 = vld [vmem:[%s8194_s3 + $0x10] ss:$8 sps:$4 sm:$0xff]   ;;  %5524 = vmatprep.subr.bf16.mxu0 %v5764_v13 }
 0x247   : > { %v3337_v42 = vsel %vm826_vm3, %v3305_v44, %v7303_v30  ;;  %v3421_v41 = vpack.c.bf16 %v3393_v39, %v3392_v40  ;;  %v3365_v21 = vmax.f32 %v3269_v11, %v3309_v25  ;;  %v3415_v31 = vpack.c.bf16 %v3381_v61, %v3380_v4  ;;  %v8503_v39 = vld [vmem:[#allocation5_spill] sm:$0xff] }
 0x248   : > { %v3369_v58 = vmax.f32 %v3273_v26, %v3337_v42  ;;  %v3307_v1 = vsel %vm826_vm3, %v3303_v7, %v3304_v24  ;;  %v3308_v8 = vsel %vm826_vm3, %v3302_v53, %v3303_v7  ;;  %v3306_v14 = vsel %vm826_vm3, %v3304_v24, %v3305_v44  ;;  %v5775_v24 = vld [vmem:[%s8195_s4 + $0xe0] sm:$0xff]   ;;  %v8502_v53 = vld [vmem:[#allocation4_spill] sm:$0xff]  ;;  %v8504_v40 = vld [vmem:[#allocation69_spill] sm:$0xff] }
 0x249   : > { %v3367_v56 = vmax.f32 %v3271_v22, %v3307_v1  ;;  %5448 = vmatprep.subr.bf16.mxu1 %v3421_v41  ;;  %v3395_v19 = vmax.f32 %v3363_v60, %v3365_v21  ;;  %v3366_v30 = vmax.f32 %v3270_v54, %v3308_v8  ;;  %v3368_v47 = vmax.f32 %v3272_v32, %v3306_v14  ;;  %v5765_v60 = vld [vmem:[%s8195_s4 + $0x88] sm:$0xff]   ;;  %v5767_v32 = vld [vmem:[%s8195_s4 + $0xd0] sm:$0xff]   ;;  %v5777_v26 = vld [vmem:[%s8195_s4 + $0xa0] sm:$0xff]  }
 0x24a   : > { %5449 = vmatpush3.bf16.msra.mxu1 %v7443_v45  ;;  %v3382_v36 = vmax.f32 %v7484_v12, %v3352_v48  ;;  %v3401_v27 = vmax.f32 %v3369_v58, %v7318_v5  ;;  %v3384_v61 = vmax.f32 %v3352_v48, %v7469_v63  ;;  %v5750_v63 = vld [vmem:[%s8194_s3] ss:$8 sps:$4 sm:$0xff]   ;;  %5525 = vmatpush3.bf16.msra.mxu0 %v5765_v60  ;;  %v5769_v54 = vld [vmem:[%s8195_s4 + $0x90] sm:$0xff]   ;;  %v3533_v57 = vand.u32 7, %v8501_v52 }
 0x24b   : > { %v3422_v11 = vpack.c.bf16 %v3395_v19, %v3394_v51  ;;  %v3396_v10 = vmax.f32 %v3364_v23, %v3366_v30  ;;  %v3397_v38 = vmax.f32 %v3365_v21, %v3367_v56  ;;  %v3398_v33 = vmax.f32 %v3366_v30, %v3368_v47  ;;  %5526 = vmatprep.subr.bf16.mxu0 %v5767_v32 }
 0x24c   : > { %v3399_v50 = vmax.f32 %v3367_v56, %v3369_v58  ;;  %v3416_v20 = vpack.c.bf16 %v3383_v49, %v3382_v36  ;;  %v3400_v43 = vmax.f32 %v3368_v47, %v7321_v37  ;;  %v3417_v6 = vpack.c.bf16 %v3385_v16, %v3384_v61  ;;  %v5753_v37 = vld [vmem:[%s8194_s3 + $0x14] ss:$8 sps:$4 sm:$0xff]   ;;  %v8506_v56 = vld [vmem:[#allocation6_spill] sm:$0xff] }
 0x24d   : > { %5450 = vmatprep.subr.bf16.mxu1 %v3422_v11  ;;  %v3423_v45 = vpack.c.bf16 %v3397_v38, %v3396_v10  ;;  %v5759_v16 = vld [vmem:[%s8194_s3 + $0x34] ss:$8 sps:$4 sm:$0xff]   ;;  %v3534_v22 = vand.u32 7, %v8502_v53  ;;  %v3535_v23 = vand.u32 7, %v8503_v39  ;;  %v3531_v44 = vand.u32 7, %v8500_v35  ;;  %v5798_v35 = vld [vmem:[%s8197_s6] sm:$0xff]  }
 0x24e   : > { %5451 = vmatpush3.bf16.msra.mxu1 %v7472_v59  ;;  %v3424_v12 = vpack.c.bf16 %v3399_v50, %v3398_v33  ;;  %v3425_v5 = vpack.c.bf16 %v3401_v27, %v3400_v43  ;;  %v5758_v59 = vld [vmem:[%s8194_s3 + $0x20] ss:$8 sps:$4 sm:$0xff]   ;;  %5527 = vmatpush3.bf16.msra.mxu0 %v5769_v54  ;;  %v3532_v4 = vand.u32 7, %v8504_v40  ;;  %vm3565_vm6 = vcmp.ge.s32.totalorder %v3533_v57, 1 }
 0x24f   : > { %5452 = vmatprep.subr.bf16.mxu1 %v3423_v45  ;;  %5528 = vmatprep.subr.bf16.mxu0 %v5771_v17  ;;  %vm3566_vm7 = vcmp.ge.s32.totalorder %v3534_v22, 1  ;;  %vm3567_vm8 = vcmp.ge.s32.totalorder %v3535_v23, 1  ;;  %vm3651_vm9 = vcmp.lt.s32.totalorder %v3531_v44, 7  ;;  %v8505_v49 = vmov 0.0   ;;  %v8509_v27 = vld [vmem:[#allocation7_spill] sm:$0xff] }
 0x250   : > { %vm3652_vm10 = vcmp.lt.s32.totalorder %v3532_v4, 7  ;;  %vm3564_vm11 = vcmp.ge.s32.totalorder %v3532_v4, 1  ;;  %v7639_v42 = vsel %vm3565_vm6, 1.0, %v8505_v49  ;;  %v7642_v41 = vsel %vm3566_vm7, 1.0, %v8505_v49  ;;  %v5779_v45 = vld [vmem:[%s8195_s4 + $0xe8] sm:$0xff]  }
 0x251   : > { %vm3563_vm12 = vcmp.ge.s32.totalorder %v3531_v44, 1  ;;  %v7648_v58 = vsel %vm3652_vm10, 1.0, %v8505_v49  ;;  %v7651_v1 = vsel %vm3651_vm9, 1.0, %v8505_v49  ;;  %vm3653_vm13 = vcmp.lt.s32.totalorder %v3533_v57, 7 }
 0x252   : > { %5453 = vmatpush3.bf16.msra.mxu1 %v3415_v31  ;;  %5529 = vmatpush3.bf16.msra.mxu0 %v5773_v28  ;;  %v7645_v31 = vsel %vm3567_vm8, 1.0, %v8505_v49  ;;  %v7656_v14 = vsel %vm3564_vm11, 1.0, %v8505_v49  ;;  %vm3654_vm14 = vcmp.lt.s32.totalorder %v3534_v22, 7  ;;  %v3536_v19 = vand.u32 7, %v8506_v56  ;;  %v5783_v28 = vld [vmem:[%s8195_s4 + $0xf0] sm:$0xff]  }
 0x253   : > { %5454 = vmatprep.subr.bf16.mxu1 %v3424_v12  ;;  %5530 = vmatprep.subr.bf16.mxu0 %v5775_v24  ;;  %v7661_v47 = vsel %vm3563_vm12, 1.0, %v8505_v49  ;;  %vm7663_vm15 = vcmp.lt.s32.totalorder %v3535_v23, 7  ;;  %v3537_v61 = vand.u32 7, %v8509_v27  ;;  %v7674_v50 = vsel %vm3653_vm13, 1.0, %v8505_v49  ;;  %v5780_v12 = vld [vmem:[%s8195_s4 + $0x18] sm:$0xff]   ;;  %v5784_v24 = vld [vmem:[%s8195_s4 + $0x20] sm:$0xff]  }
 0x254   : > { %vm7679_vm0 = vcmp.lt.s32.totalorder %v3536_v19, 7  ;;  %vm7704_vm1 = vcmp.ge.s32.totalorder %v3536_v19, 1  ;;  %v7723_v13 = vsel %vm7663_vm15, 1.0, %v8505_v49  ;;  %v5785_v22 = vld [vmem:[%s8195_s4 + $0xb0] sm:$0xff]   ;;  %v5786_v27 = vld [vmem:[%s8195_s4 + $0x68] sm:$0xff]   ;;  %vm5826_vm8 = vmmov 0  }
 0x255   : > { %vm7725_vm2 = vcmp.lt.s32.totalorder %v3537_v61, 7  ;;  %vm7735_vm6 = vcmp.ge.s32.totalorder %v3537_v61, 1  ;;  %v7746_v54 = vsel %vm7679_vm0, 1.0, %v8505_v49  ;;  %v7751_v17 = vsel %vm7704_vm1, 1.0, %v8505_v49  ;;  %v5787_v61 = vld [vmem:[%s8195_s4 + $0xf8] sm:$0xff]  }
 0x256   : > { %5455 = vmatpush3.bf16.msra.mxu1 %v3416_v20  ;;  %5531 = vmatpush3.bf16.msra.mxu0 %v5777_v26  ;;  %v7677_v20 = vsel %vm3654_vm14, 1.0, %v8505_v49  ;;  %v7776_v39 = vsel %vm7725_vm2, 1.0, %v8505_v49  ;;  %v7790_v40 = vsel %vm7735_vm6, 1.0, %v8505_v49 }
 0x257   : > { %5456 = vmatprep.subr.bf16.mxu1 %v3425_v5  ;;  %5532 = vmatprep.subr.bf16.mxu0 %v5779_v45 }
 0x25a   : > { %5457 = vmatpush3.bf16.msra.mxu1 %v3417_v6  ;;  %v5778_v6 = vld [vmem:[%s8195_s4 + $0x58] sm:$0xff]  }
 0x25b   : > { %5482 = vmatprep.subr.bf16.mxu1 %v5766_v9 }
 0x25d   : > { %3499 = vmatmul.mubr.bf16.vlgmr.msra.gmra.mrb[128].mxu1 %v5750_v63 }
 0x25e   : > { %3506 = vmatprep.mubr.bf16.mxu1 %v5753_v37  ;;  %5483 = vmatpush3.bf16.msra.mxu1 %v5768_v46 }
 0x25f   : > { %5484 = vmatprep.subr.bf16.mxu1 %v5770_v29 }
 0x262   : > { %5485 = vmatpush3.bf16.msra.mxu1 %v5772_v55 }
 0x263   : > { %5486 = vmatprep.subr.bf16.mxu1 %v5774_v15 }
 0x265   : > { %3507 = vmatmul.mubr.bf16.gmra.mrb[132].mxu1 %v5755_v18 }
 0x266   : > { %3514 = vmatprep.mubr.bf16.mxu1 %v5756_v2  ;;  %5487 = vmatpush3.bf16.msra.mxu1 %v5776_v3  ;;  %v8514_v2 = vld [vmem:[#allocation8_spill] sm:$0xff]  ;;  %v5782_v3 = vld [vmem:[%s8195_s4 + $0x60] sm:$0xff]  }
 0x267   : > { %5488 = vmatprep.subr.bf16.mxu1 %v5778_v6 }
 0x26a   : > { %5489 = vmatpush3.bf16.msra.mxu1 %v5780_v12 }
 0x26b   : > { %5490 = vmatprep.subr.bf16.mxu1 %v5782_v3 }
 0x26d   : > { %3515 = vmatmul.mubr.bf16.gmra.mrb[136].mxu1 %v5758_v59  ;;  %v3538_v59 = vand.u32 7, %v8514_v2 }
 0x26e   : > { %3522 = vmatprep.mubr.bf16.mxu1 %v5759_v16  ;;  %v5781_v16 = vld [vmem:[%s8195_s4 + $0xa8] sm:$0xff]   ;;  %5491 = vmatpush3.bf16.msra.mxu1 %v5784_v24 }
 0x26f   : > { %vm7731_vm5 = vcmp.lt.s32.totalorder %v3538_v59, 7  ;;  %5533 = vmatpush3.bf16.msra.mxu0 %v5781_v16  ;;  %vm7783_vm7 = vcmp.ge.s32.totalorder %v3538_v59, 1  ;;  %5492 = vmatprep.subr.bf16.mxu1 %v5786_v27  ;;  %v5788_v59 = vld [vmem:[%s8195_s4 + $0x28] sm:$0xff]   ;;  %v5789_v16 = vld [vmem:[%s8195_s4 + $0xb8] sm:$0xff]   ;;  %v5791_v27 = vld [vmem:[%s8195_s4 + $0x30] sm:$0xff]  }
 0x270   : > { %v7781_v23 = vsel %vm7731_vm5, 1.0, %v8505_v49  ;;  %5534 = vmatprep.subr.bf16.mxu0 %v5783_v28 }
 0x272   : > { %5493 = vmatpush3.bf16.msra.mxu1 %v5788_v59 }
 0x273   : > { %5535 = vmatpush3.bf16.msra.mxu0 %v5785_v22 }
 0x274   : > { %5536 = vmatprep.subr.bf16.mxu0 %v5787_v61 }
 0x275   : > { %3523 = vmatmul.mubr.bf16.gmra.mrb[140].mxu1 %v5761_v62 }
 0x277   : > { %5537 = vmatpush3.bf16.msra.mxu0 %v5789_v16 }
 0x330   : > { %v5458_v48 = vpop.f32.mrb[128].mxu1 }
 0x331   : > { %v5459_v7 = vpop.f32.mrb[129].mxu1 }
 0x332   : > { %v7636_v25 = vadd.f32 %v5459_v7, %v5458_v48  ;;  %v5461_v51 = vpop.f32.mrb[130].mxu1 }
 0x333   : > { %v5462_v21 = vpop.f32.mrb[131].mxu1 }
 0x334   : > { %v7653_v8 = vadd.f32 %v5462_v21, %v5461_v51  ;;  %v8312_v30 = vrot.slane %v7636_v25, 1  ;;  %v3539_v38 = vrot.slane %v7636_v25, 7  ;;  %v7852_v3 = vmul.f32 0.0, %v7636_v25 }
 0x336   : > { %v3540_v11 = vrot.slane %v7653_v8, 7  ;;  %v3636_v10 = vrot.slane %v7653_v8, 1 }
 0x338   : > { %v5464_v5 = vpop.f32.mrb[132].mxu1  ;;  %v7696_v63 = vsel %vm826_vm3, %v8312_v30, %v3636_v10  ;;  %v7702_v37 = vsel %vm441_vm4, %v3539_v38, %v3540_v11 }
 0x339   : > { %v5465_v62 = vpop.f32.mrb[133].mxu1  ;;  %v7714_v34 = vmul.f32 %v7661_v47, %v7702_v37  ;;  %v7718_v0 = vmul.f32 %v7639_v42, %v7702_v37  ;;  %v7741_v55 = vmul.f32 %v7648_v58, %v7696_v63  ;;  %v7803_v56 = vmul.f32 %v7651_v1, %v7696_v63 }
 0x33a   : > { %v7729_v46 = vadd.f32 %v5465_v62, %v5464_v5  ;;  %v5467_v29 = vpop.f32.mrb[134].mxu1 }
 0x33b   : > { %v5468_v15 = vpop.f32.mrb[135].mxu1 }
 0x33c   : > { %v3541_v26 = vrot.slane %v7729_v46, 7  ;;  %v3637_v52 = vrot.slane %v7729_v46, 1  ;;  %v7764_v57 = vadd.f32 %v5468_v15, %v5467_v29  ;;  %v7768_v53 = vpack.c.bf16 %v7729_v46, %v7653_v8 }
 0x33e   : > { %v3542_v4 = vrot.slane %v7764_v57, 7  ;;  %v3638_v48 = vrot.slane %v7764_v57, 1  ;;  %v3552_v7 = vsel %vm441_vm4, %v3540_v11, %v3541_v26  ;;  %v3648_v51 = vsel %vm826_vm3, %v3636_v10, %v3637_v52 }
 0x33f   : > { %v7799_v21 = vmul.f32 %v7642_v41, %v3552_v7  ;;  %v7806_v19 = vmul.f32 %v7648_v58, %v3648_v51  ;;  %v7809_v36 = vmul.f32 %v7651_v1, %v3648_v51  ;;  %v3713_v43 = vmul.f32 %v7639_v42, %v3552_v7 }
 0x340   : > { %v5470_v11 = vpop.f32.mrb[136].mxu1  ;;  %v3551_v10 = vsel %vm441_vm4, %v3541_v26, %v3542_v4  ;;  %v7821_v6 = vmul.f32 %v7656_v14, %v3552_v7  ;;  %v3647_v1 = vsel %vm826_vm3, %v3637_v52, %v3638_v48  ;;  %v7855_v28 = vmul.f32 %v7674_v50, %v3648_v51  ;;  %v5790_v7 = vld [vmem:[%s8195_s4 + $0x70] sm:$0xff]  }
 0x341   : > { %8523 = vst [vmem:[#allocation9_spill] sm:$0xff] %v7809_v36  ;;  %v5471_v45 = vpop.f32.mrb[137].mxu1  ;;  %v7826_v12 = vmul.f32 %v7645_v31, %v3551_v10  ;;  %v3714_v5 = vmul.f32 %v7642_v41, %v3551_v10  ;;  %v7830_v18 = vmul.f32 %v7639_v42, %v3551_v10  ;;  %v7845_v42 = vsel %vm7783_vm7, 1.0, %v8505_v49  ;;  %5494 = vmatprep.subr.bf16.mxu1 %v5790_v7 }
 0x342   : > { %v7840_v62 = vadd.f32 %v5471_v45, %v5470_v11  ;;  %v5473_v9 = vpop.f32.mrb[138].mxu1  ;;  %v7858_v24 = vmul.f32 %v7677_v20, %v3647_v1  ;;  %v7874_v51 = vmul.f32 %v7656_v14, %v7702_v37  ;;  %v7884_v10 = vmul.f32 %v7648_v58, %v3647_v1  ;;  %5495 = vmatpush3.bf16.msra.mxu1 %v5791_v27 }
 0x343   : > { %v3720_v32 = vpack.c.bf16 %v3714_v5, %v3713_v43  ;;  %v5474_v15 = vpop.f32.mrb[139].mxu1  ;;  %v7896_v16 = vmul.f32 %v7674_v50, %v3647_v1 }
 0x344   : > { %v3543_v26 = vrot.slane %v7840_v62, 7  ;;  %v3639_v52 = vrot.slane %v7840_v62, 1  ;;  %v7862_v22 = vadd.f32 %v5474_v15, %v5473_v9  ;;  %v7866_v44 = vpack.c.bf16 %v7840_v62, %v7764_v57  ;;  %8524 = vst [vmem:[#allocation32_spill] sm:$0xff] %v7884_v10 }
 0x345   : > { %3881 = vrot.lane.b32.xlu1 %v3720_v32, %s5825_s23 }
 0x346   : > { %v3550_v43 = vsel %vm441_vm4, %v3542_v4, %v3543_v26  ;;  %v3544_v45 = vrot.slane %v7862_v22, 7  ;;  %v3640_v37 = vrot.slane %v7862_v22, 1  ;;  %v3646_v5 = vsel %vm826_vm3, %v3638_v48, %v3639_v52  ;;  %v5792_v4 = vld [vmem:[%s8195_s4 + $0x78] sm:$0xff]  }
 0x347   : > { %v7893_v59 = vmul.f32 %v7642_v41, %v3550_v43  ;;  %v7899_v58 = vmul.f32 %v7677_v20, %v3646_v5  ;;  %v7902_v9 = vmul.f32 %v7674_v50, %v3646_v5  ;;  %v7912_v1 = vmul.f32 %v7723_v13, %v3646_v5  ;;  %v5793_v5 = vld [vmem:[%s8195_s4 + $0x38] sm:$0xff]   ;;  %5496 = vmatprep.subr.bf16.mxu1 %v5792_v4 }
 0x348   : > { %v5476_v32 = vpop.f32.mrb[140].mxu1  ;;  %v3645_v48 = vsel %vm826_vm3, %v3639_v52, %v3640_v37  ;;  %v3549_v41 = vsel %vm441_vm4, %v3543_v26, %v3544_v45  ;;  %v7915_v15 = vmul.f32 %v7751_v17, %v3550_v43  ;;  %v7925_v52 = vmul.f32 %v7645_v31, %v3550_v43  ;;  %5497 = vmatpush3.bf16.msra.mxu1 %v5793_v5 }
 0x349   : > { %8525 = vst [vmem:[#allocation21_spill] sm:$0xff] %v7902_v9  ;;  %v5477_v50 = vpop.f32.mrb[141].mxu1  ;;  %3869 = vrot.lane.b32.xlu1 %v7768_v53, %s5825_s23  ;;  %v7922_v27 = vmul.f32 %v7677_v20, %v3645_v48  ;;  %v7928_v26 = vmul.f32 %v7751_v17, %v3549_v41  ;;  %v7938_v20 = vmul.f32 %v7746_v54, %v3645_v48  ;;  %v8527_v9 = vrot.slane %v7636_v25, 1 }
 0x34a   : > { %v7933_v11 = vadd.f32 %v5477_v50, %v5476_v32  ;;  %v5479_v61 = vpop.f32.mrb[142].mxu1  ;;  %v7947_v32 = vmul.f32 %v7645_v31, %v3549_v41 }
 0x34b   : > { %8526 = vst [vmem:[#allocation19_spill] sm:$0xff] %v7922_v27  ;;  %v5480_v33 = vpop.f32.mrb[143].mxu1  ;;  %v3721_v7 = vpack.c.bf16 %v7928_v26, %v7925_v52  ;;  %v3747_v52 = vmul.f32 %v7723_v13, %v3645_v48  ;;  %v7963_v26 = vmul.f32 %v7790_v40, %v3549_v41 }
 0x34c   : > { %v3545_v50 = vrot.slane %v7933_v11, 7  ;;  %v3641_v60 = vrot.slane %v7933_v11, 1  ;;  %v7953_v2 = vadd.f32 %v5480_v33, %v5479_v61  ;;  %v3634_v43 = vpack.c.bf16 %v7933_v11, %v7862_v22 }
 0x34d   : > { %3903 = vrot.lane.b32.xlu1 %v7768_v53, %s5825_s23 }
 0x34e   : > { %v3546_v33 = vrot.slane %v7953_v2, 7  ;;  %v3623_v61 = vmul.f32 0.0, %v7953_v2  ;;  %v3644_v29 = vsel %vm826_vm3, %v3640_v37, %v3641_v60  ;;  %v3642_v53 = vrot.slane %v7953_v2, 1 }
 0x34f   : > { %v3748_v48 = vmul.f32 %v7746_v54, %v3644_v29  ;;  %v3548_v4 = vsel %vm441_vm4, %v3544_v45, %v3545_v50  ;;  %v3826_v41 = vpack.c.bf16 %v7852_v3, %v7953_v2  ;;  %v7978_v31 = vmul.f32 %v7776_v39, %v3644_v29 }
 0x350   : > { %v3554_v5 = vsel %vm441_vm4, %v3546_v33, %v3539_v38  ;;  %v3631_v37 = vpack.c.bf16 %v7636_v25, %v3623_v61  ;;  %v3643_v30 = vsel %vm826_vm3, %v3641_v60, %v3642_v53  ;;  %v3650_v45 = vsel %vm826_vm3, %v3642_v53, %v8527_v9 }
 0x351   : > { %v8528_v3 = vpack.c.bf16 %v7806_v19, %v7803_v56  ;;  %v7996_v27 = vmul.f32 %v7656_v14, %v3554_v5  ;;  %v3711_v38 = vmul.f32 %v7661_v47, %v3554_v5  ;;  %v7999_v36 = vmul.f32 0.0, %v3554_v5 }
 0x352   : > { %v3753_v61 = vpack.c.bf16 %v3748_v48, %v3747_v52  ;;  %v8002_v60 = vmul.f32 %v7781_v23, %v3643_v30  ;;  %v3749_v10 = vmul.f32 %v7776_v39, %v3643_v30  ;;  %v3750_v9 = vmul.f32 %v7781_v23, %v3650_v45 }
 0x353   : > { %3891 = vrot.lane.b32.xlu1 %v8528_v3, %s5825_s23  ;;  %v3547_v53 = vsel %vm441_vm4, %v3545_v50, %v3546_v33  ;;  %v3719_v56 = vpack.c.bf16 %v7874_v51, %v3711_v38  ;;  %v8010_v14 = vmul.f32 %v7845_v42, %v3548_v4  ;;  %v3717_v47 = vmul.f32 %v7790_v40, %v3548_v4 }
 0x354   : > { %v3718_v19 = vmul.f32 %v7845_v42, %v3547_v53  ;;  %v3754_v52 = vpack.c.bf16 %v3750_v9, %v3749_v10  ;;  %v3683_v5 = vmul.f32 0.0, %v3650_v45  ;;  %v3595_v48 = vmul.f32 0.0, %v3547_v53 }
 0x355   : > { %v3694_v3 = vpack.c.bf16 %v8002_v60, %v7978_v31  ;;  %3879 = vrot.lane.b32.xlu0 %v3719_v56, %s5825_s23  ;;  %v8020_v51 = vmul.f32 %v7751_v17, %v3548_v4  ;;  %v3606_v50 = vpack.c.bf16 %v8010_v14, %v7963_v26  ;;  %v8025_v42 = vmul.f32 0.0, %v7696_v63  ;;  %v8542_v26 = vld [vmem:[#allocation19_spill] sm:$0xff]  ;;  %v8543_v14 = vld [vmem:[#allocation21_spill] sm:$0xff] }
 0x356   : > { %v3722_v23 = vpack.c.bf16 %v3718_v19, %v3717_v47  ;;  %v3691_v10 = vpack.c.bf16 %v7741_v55, %v3683_v5  ;;  %v3603_v33 = vpack.c.bf16 %v7996_v27, %v3595_v48  ;;  %v8030_v38 = vmul.f32 %v7790_v40, %v3547_v53  ;;  %v5796_v5 = vld [vmem:[%s8195_s4 + $0x110] sm:$0xff]  }
 0x357   : > { %3905 = vrot.lane.b32.xlu1 %v7866_v44, %s5825_s23  ;;  %v3726_v9 = vpack.c.bf16 %v7953_v2, %v7933_v11  ;;  %v3797_v17 = vpack.c.bf16 %v8020_v51, %v7947_v32  ;;  %v8037_v4 = vmul.f32 %v7723_v13, %v3644_v29  ;;  %v8040_v56 = vmul.f32 %v7746_v54, %v3643_v30  ;;  %v5794_v54 = vld [vmem:[%s8195_s4 + $0x100] sm:$0xff]   ;;  %v8540_v51 = vld [vmem:[#allocation9_spill] sm:$0xff] }
 0x358   : > { %v8043_v63 = vmul.f32 %v7776_v39, %v3650_v45  ;;  %v3798_v55 = vpack.c.bf16 %v7999_v36, %v8030_v38  ;;  %v8529_v40 = vpack.c.bf16 %v7899_v58, %v7896_v16  ;;  %5623 = vmatprep.subr.bf16.mxu1 %v5794_v54  ;;  %vm3911_vm4 = vcmask 523264  }
 0x359   : > { %3867 = vrot.lane.b32.xlu0 %v3631_v37, %s5825_s23  ;;  %v3861_v13 = vpack.c.bf16 %v8040_v56, %v8037_v4  ;;  %v8530_v58 = vpack.c.bf16 %v7821_v6, %v7714_v34  ;;  %v8533_v47 = vpack.c.bf16 %v7764_v57, %v7729_v46  ;;  %v5797_v46 = vld [vmem:[%s8195_s4 + $0x118] sm:$0xff]   ;;  %v8535_v57 = vpack.c.bf16 %v7799_v21, %v7718_v0 }
 0x35a   : > { %v3862_v30 = vpack.c.bf16 %v8025_v42, %v8043_v63 }
 0x35b   : > { %3893 = vrot.lane.b32.xlu1 %v8529_v40, %s5825_s23  ;;  %v8537_v40 = vpack.c.bf16 %v7915_v15, %v7826_v12  ;;  %v8538_v12 = vpack.c.bf16 %v7862_v22, %v7840_v62 }
 0x35d   : > { %3883 = vrot.lane.b32.xlu0 %v3721_v7, %s5825_s23 }
 0x35f   : > { %3895 = vrot.lane.b32.xlu1 %v3753_v61, %s5825_s23  ;;  %v8532_v61 = vpack.c.bf16 %v7893_v59, %v7830_v18  ;;  %v8534_v18 = vpack.c.bf16 %v7858_v24, %v7855_v28  ;;  %v8536_v24 = vpack.c.bf16 %v7938_v20, %v7912_v1 }
 0x361   : > { %3871 = vrot.lane.b32.xlu0 %v7866_v44, %s5825_s23  ;;  %v8531_v44 = vpack.c.bf16 %v7653_v8, %v7636_v25  ;;  %v5795_v25 = vld [vmem:[%s8195_s4 + $0x108] sm:$0xff]  }
 0x363   : > { %3897 = vrot.lane.b32.xlu1 %v3754_v52, %s5825_s23 }
 0x365   : > { %3885 = vrot.lane.b32.xlu0 %v3722_v23, %s5825_s23 }
 0x369   : > { %3873 = vrot.lane.b32.xlu0 %v3634_v43, %s5825_s23 }
 0x36d   : > { %3907 = vrot.lane.b32.xlu0 %v3634_v43, %s5825_s23 }
 0x371   : > { %3909 = vrot.lane.b32.xlu0 %v3826_v41, %s5825_s23  ;;  %s4969_s23 = sshll.u32 %s8546_s25, 4 }
 0x372   : > { %s278_s29 = scalar_lea.vmem %s8198_s7, %s4969_s23 }
 0x3b7   : > { %v3882_v39 = vpop.permute.xlu1 %3881 }
 0x3b8   : > { %v3934_v59 = vsel %vm3911_vm4, %v8534_v18, %v3882_v39 }
 0x3bb   : > { %v3870_v29 = vpop.permute.xlu1 %3869 }
 0x3bc   : > { %v3918_v28 = vsel %vm3911_vm4, %v8535_v57, %v3870_v29 }
 0x3bf   : > { %v3904_v16 = vpop.permute.xlu1 %3903 }
 0x3c0   : > { %v3962_v7 = vsel %vm3911_vm4, %v8530_v58, %v3904_v16 }
 0x3c1   : > { %4373 = vmatprep.mubr.bf16.mxu0 %v3962_v7 }
 0x3c5   : > { %v3892_v27 = vpop.permute.xlu1 %3891 }
 0x3c6   : > { %v3946_v37 = vsel %vm3911_vm4, %v8531_v44, %v3892_v27 }
 0x3c7   : > { %4374 = vmatmul.mubr.bf16.vlgmr.msra.gmra.mrb[160].mxu0 %v3946_v37  ;;  %v3880_v45 = vpop.permute.xlu0 %3879 }
 0x3c8   : > { %v3930_v41 = vsel %vm3911_vm4, %v3691_v10, %v3880_v45 }
 0x3c9   : > { %v3906_v43 = vpop.permute.xlu1 %3905  ;;  %4308 = vmatprep.mubr.bf16.mxu1 %v3930_v41 }
 0x3ca   : > { %v3966_v53 = vsel %vm3911_vm4, %v8532_v61, %v3906_v43 }
 0x3cb   : > { %4381 = vmatprep.mubr.bf16.mxu0 %v3966_v53  ;;  %v3868_v6 = vpop.permute.xlu0 %3867 }
 0x3cc   : > { %v3914_v8 = vsel %vm3911_vm4, %v3603_v33, %v3868_v6 }
 0x3cd   : > { %v3894_v34 = vpop.permute.xlu1 %3893  ;;  %4309 = vmatmul.mubr.bf16.vlgmr.msra.gmra.mrb[144].mxu1 %v3914_v8 }
 0x3ce   : > { %v3950_v19 = vsel %vm3911_vm4, %v8533_v47, %v3894_v34  ;;  %4316 = vmatprep.mubr.bf16.mxu1 %v3934_v59  ;;  %5624 = vmatpush3.bf16.msra.mxu1 %v5794_v54 }
 0x3cf   : > { %4382 = vmatmul.mubr.bf16.gmra.mrb[164].mxu0 %v3950_v19  ;;  %v3884_v52 = vpop.permute.xlu0 %3883  ;;  %5625 = vmatprep.subr.bf16.mxu1 %v5795_v25 }
 0x3d0   : > { %v3938_v23 = vsel %vm3911_vm4, %v8536_v24, %v3884_v52 }
 0x3d1   : > { %v3896_v1 = vpop.permute.xlu1 %3895 }
 0x3d2   : > { %5626 = vmatpush3.bf16.msra.mxu1 %v5795_v25  ;;  %v3954_v15 = vsel %vm3911_vm4, %v8538_v12, %v3896_v1 }
 0x3d3   : > { %v3872_v48 = vpop.permute.xlu0 %3871  ;;  %5627 = vmatprep.subr.bf16.mxu1 %v5796_v5 }
 0x3d4   : > { %v3922_v0 = vsel %vm3911_vm4, %v8537_v40, %v3872_v48 }
 0x3d5   : > { %4317 = vmatmul.mubr.bf16.gmra.mrb[148].mxu1 %v3918_v28  ;;  %v3898_v60 = vpop.permute.xlu1 %3897 }
 0x3d6   : > { %4324 = vmatprep.mubr.bf16.mxu1 %v3938_v23  ;;  %5628 = vmatpush3.bf16.msra.mxu1 %v5796_v5  ;;  %v3958_v22 = vsel %vm3911_vm4, %v3726_v9, %v3898_v60  ;;  %v4962_v60 = vld [vmem:[%s8196_s5] ss:$0 sm:$0xff] }
 0x3d7   : > { %v3886_v10 = vpop.permute.xlu0 %3885  ;;  %5629 = vmatprep.subr.bf16.mxu1 %v5797_v46 }
 0x3d8   : > { %v3942_v21 = vsel %vm3911_vm4, %v3694_v3, %v3886_v10  ;;  %v8539_v3 = vld [vmem:[#allocation32_spill] sm:$0xff] }
 0x3d9   : > { %v8541_v62 = vpack.c.bf16 %v8539_v3, %v8540_v51 }
 0x3da   : > { %5630 = vmatpush3.bf16.msra.mxu1 %v5797_v46 }
 0x3db   : > { %v3874_v33 = vpop.permute.xlu0 %3873  ;;  %5639 = vmatprep.subr.bf16.mxu1 %v8505_v49 }
 0x3dc   : > { %v3926_v31 = vsel %vm3911_vm4, %v3606_v50, %v3874_v33  ;;  %v8544_v50 = vpack.c.bf16 %v8542_v26, %v8543_v14  ;;  %v4963_v26 = vld [vmem:[%s8196_s5 + $0x1] ss:$0 sm:$0xff] }
 0x3dd   : > { %4325 = vmatmul.mubr.bf16.gmra.mrb[152].mxu1 %v3922_v0 }
 0x3de   : > { %4332 = vmatprep.mubr.bf16.mxu1 %v3942_v21 }
 0x3df   : > { %v3908_v20 = vpop.permute.xlu0 %3907 }
 0x3e0   : > { %v3970_v54 = vsel %vm3911_vm4, %v3797_v17, %v3908_v20 }
 0x3e1   : > { %4389 = vmatprep.mubr.bf16.mxu0 %v3970_v54 }
 0x3e2   : > { %4390 = vmatmul.mubr.bf16.gmra.mrb[168].mxu0 %v3954_v15 }
 0x3e3   : > { %v3910_v39 = vpop.permute.xlu0 %3909 }
 0x3e4   : > { %v3974_v32 = vsel %vm3911_vm4, %v3798_v55, %v3910_v39 }
 0x3e5   : > { %4333 = vmatmul.mubr.bf16.gmra.mrb[156].mxu1 %v3926_v31  ;;  %4397 = vmatprep.mubr.bf16.mxu0 %v3974_v32 }
 0x3e6   : > { %5631 = vmatprep.mubr.msk.bf16.mxu1 %vm3911_vm4, %v8541_v62 }
 0x3ea   : > { %4398 = vmatmul.mubr.bf16.gmra.mrb[172].mxu0 %v3958_v22 }
 0x3ed   : > { %5632 = vmatmul.mubr.msk.bf16.vlgmr.msra.gmra.mrb[160].mxu1 %vm3911_vm4, %v8544_v50 }
 0x3ee   : > { %5635 = vmatprep.mubr.msk.bf16.mxu1 %vm3911_vm4, %v3861_v13 }
 0x3f5   : > { %5636 = vmatmul.mubr.msk.bf16.gmra.mrb[164].mxu1 %vm3911_vm4, %v3862_v30 }
 0x3f6   : > { %5647 = vmatprep.mubr.msk.bf16.mxu1 %vm5826_vm8, %v8505_v49 }
 0x49a   : > { %v5538_v36 = vpop.f32.mrb[160].mxu0 }
 0x49b   : > { %v5539_v2 = vpop.f32.mrb[161].mxu0 }
 0x49c   : > { %v5540_v11 = vadd.f32 %v5539_v2, %v5538_v36  ;;  %v5541_v38 = vpop.f32.mrb[162].mxu0 }
 0x49d   : > { %v5542_v9 = vpop.f32.mrb[163].mxu0 }
 0x49e   : > { %v5543_v17 = vadd.f32 %v5542_v9, %v5541_v38 }
 0x4a0   : > { %v5498_v55 = vpop.f32.mrb[144].mxu1 }
 0x4a1   : > { %v5499_v16 = vpop.f32.mrb[145].mxu1 }
 0x4a2   : > { %v5544_v29 = vpop.f32.mrb[164].mxu0  ;;  %v5500_v56 = vadd.f32 %v5499_v16, %v5498_v55  ;;  %v5501_v58 = vpop.f32.mrb[146].mxu1 }
 0x4a3   : > { %v5545_v4 = vpop.f32.mrb[165].mxu0  ;;  %v5502_v42 = vpop.f32.mrb[147].mxu1 }
 0x4a4   : > { %v5546_v13 = vadd.f32 %v5545_v4, %v5544_v29  ;;  %v5547_v7 = vpop.f32.mrb[166].mxu0  ;;  %v5503_v30 = vadd.f32 %v5502_v42, %v5501_v58  ;;  %v4376_v44 = vadd.f32 %v5540_v11, %v5500_v56 }
 0x4a5   : > { %v5548_v63 = vpop.f32.mrb[167].mxu0 }
 0x4a6   : > { %v5549_v27 = vadd.f32 %v5548_v63, %v5547_v7  ;;  %v4379_v37 = vadd.f32 %v5543_v17, %v5503_v30 }
 0x4a8   : > { %v5504_v43 = vpop.f32.mrb[148].mxu1 }
 0x4a9   : > { %v5505_v45 = vpop.f32.mrb[149].mxu1 }
 0x4aa   : > { %v5506_v41 = vadd.f32 %v5505_v45, %v5504_v43  ;;  %v5507_v61 = vpop.f32.mrb[150].mxu1 }
 0x4ab   : > { %v5508_v53 = vpop.f32.mrb[151].mxu1 }
 0x4ac   : > { %v5509_v34 = vadd.f32 %v5508_v53, %v5507_v61  ;;  %v4384_v6 = vadd.f32 %v5546_v13, %v5506_v41 }
 0x4ae   : > { %v4387_v25 = vadd.f32 %v5549_v27, %v5509_v34 }
 0x4b0   : > { %v5510_v8 = vpop.f32.mrb[152].mxu1 }
 0x4b1   : > { %v5511_v47 = vpop.f32.mrb[153].mxu1 }
 0x4b2   : > { %v5512_v19 = vadd.f32 %v5511_v47, %v5510_v8  ;;  %v5513_v18 = vpop.f32.mrb[154].mxu1 }
 0x4b3   : > { %v5514_v59 = vpop.f32.mrb[155].mxu1 }
 0x4b4   : > { %v5515_v52 = vadd.f32 %v5514_v59, %v5513_v18 }
 0x4b5   : > { %v5550_v5 = vpop.f32.mrb[168].mxu0 }
 0x4b6   : > { %v5551_v48 = vpop.f32.mrb[169].mxu0 }
 0x4b7   : > { %v5552_v46 = vadd.f32 %v5551_v48, %v5550_v5  ;;  %v5553_v57 = vpop.f32.mrb[170].mxu0 }
 0x4b8   : > { %v5516_v28 = vpop.f32.mrb[156].mxu1  ;;  %v5554_v24 = vpop.f32.mrb[171].mxu0 }
 0x4b9   : > { %v5555_v23 = vadd.f32 %v5554_v24, %v5553_v57  ;;  %v5517_v10 = vpop.f32.mrb[157].mxu1  ;;  %v4392_v33 = vadd.f32 %v5552_v46, %v5512_v19 }
 0x4ba   : > { %v5518_v40 = vadd.f32 %v5517_v10, %v5516_v28  ;;  %v5519_v0 = vpop.f32.mrb[158].mxu1 }
 0x4bb   : > { %v5520_v21 = vpop.f32.mrb[159].mxu1  ;;  %v4395_v1 = vadd.f32 %v5555_v23, %v5515_v52 }
 0x4bc   : > { %v5521_v20 = vadd.f32 %v5520_v21, %v5519_v0 }
 0x4bd   : > { %v5556_v54 = vpop.f32.mrb[172].mxu0 }
 0x4be   : > { %v5557_v12 = vpop.f32.mrb[173].mxu0 }
 0x4bf   : > { %v5558_v15 = vadd.f32 %v5557_v12, %v5556_v54  ;;  %v5559_v39 = vpop.f32.mrb[174].mxu0 }
 0x4c0   : > { %v5560_v31 = vpop.f32.mrb[175].mxu0  ;;  %v5633_v32 = vpop.f32.mrb[160].mxu1 }
 0x4c1   : > { %v5561_v3 = vadd.f32 %v5560_v31, %v5559_v39  ;;  %v4449_v51 = vadd.f32 %v5633_v32, %v4384_v6  ;;  %v4440_v62 = vpop.f32.mrb[161].mxu1  ;;  %v4400_v22 = vadd.f32 %v5558_v15, %v5518_v40 }
 0x4c2   : > { %v4441_v14 = vadd.f32 %v4440_v62, %v4376_v44  ;;  %v5634_v50 = vpop.f32.mrb[162].mxu1 }
 0x4c3   : > { %v4478_v36 = vmul.f32 %v4962_v60, %v4449_v51  ;;  %v4452_v2 = vadd.f32 %v5634_v50, %v4387_v25  ;;  %v4443_v11 = vpop.f32.mrb[163].mxu1  ;;  %v4403_v38 = vadd.f32 %v5561_v3, %v5521_v20 }
 0x4c4   : > { %v4476_v9 = vmul.f32 %v4962_v60, %v4441_v14  ;;  %v4444_v17 = vadd.f32 %v4443_v11, %v4379_v37 }
 0x4c5   : > { %v4491_v55 = vadd.f32 %v4963_v26, %v4478_v36  ;;  %v4479_v29 = vmul.f32 %v4962_v60, %v4452_v2 }
 0x4c6   : > { %v4489_v16 = vadd.f32 %v4963_v26, %v4476_v9  ;;  %v4477_v4 = vmul.f32 %v4962_v60, %v4444_v17 }
 0x4c7   : > { %v4499_v56 = vmax.f32 %v4491_v55, 0.0  ;;  %v4492_v13 = vadd.f32 %v4963_v26, %v4479_v29 }
 0x4c8   : > { %v4497_v58 = vmax.f32 %v4489_v16, 0.0  ;;  %v4490_v7 = vadd.f32 %v4963_v26, %v4477_v4  ;;  %v5637_v42 = vpop.f32.mrb[164].mxu1 }
 0x4c9   : > { %v4500_v63 = vmax.f32 %v4492_v13, 0.0  ;;  %v4465_v30 = vadd.f32 %v5637_v42, %v4400_v22  ;;  %v4456_v27 = vpop.f32.mrb[165].mxu1  ;;  %v4507_v41 = vrot.slane %v4499_v56, 1 }
 0x4ca   : > { %v4498_v44 = vmax.f32 %v4490_v7, 0.0  ;;  %v4457_v43 = vadd.f32 %v4456_v27, %v4392_v33  ;;  %v5638_v45 = vpop.f32.mrb[166].mxu1  ;;  %v4505_v6 = vrot.slane %v4497_v58, 1 }
 0x4cb   : > { %v4508_v61 = vrot.slane %v4500_v63, 1  ;;  %v4482_v53 = vmul.f32 %v4962_v60, %v4465_v30  ;;  %v4468_v34 = vadd.f32 %v5638_v45, %v4403_v38  ;;  %v4459_v37 = vpop.f32.mrb[167].mxu1 }
 0x4cc   : > { %v4506_v25 = vrot.slane %v4498_v44, 1  ;;  %v4480_v8 = vmul.f32 %v4962_v60, %v4457_v43  ;;  %v4460_v47 = vadd.f32 %v4459_v37, %v4395_v1 }
 0x4cd   : > { %v4517_v19 = vsel %vm826_vm3, %v4507_v41, %v4508_v61  ;;  %v4495_v18 = vadd.f32 %v4963_v26, %v4482_v53  ;;  %v4483_v59 = vmul.f32 %v4962_v60, %v4468_v34 }
 0x4ce   : > { %v4518_v52 = vsel %vm826_vm3, %v4506_v25, %v4507_v41  ;;  %v4519_v5 = vsel %vm826_vm3, %v4505_v6, %v4506_v25  ;;  %v4523_v48 = vmax.f32 %v4499_v56, %v4517_v19  ;;  %v4493_v46 = vadd.f32 %v4963_v26, %v4480_v8 }
 0x4cf   : > { %v4521_v57 = vmax.f32 %v4497_v58, %v4519_v5  ;;  %v4522_v28 = vmax.f32 %v4498_v44, %v4518_v52  ;;  %v4503_v24 = vmax.f32 %v4495_v18, 0.0  ;;  %v4496_v23 = vadd.f32 %v4963_v26, %v4483_v59 }
 0x4d0   : > { %v4501_v10 = vmax.f32 %v4493_v46, 0.0  ;;  %v4481_v33 = vmul.f32 %v4962_v60, %v4460_v47 }
 0x4d1   : > { %v4529_v40 = vmax.f32 %v4521_v57, %v4522_v28  ;;  %v4530_v0 = vmax.f32 %v4522_v28, %v4523_v48  ;;  %v4504_v21 = vmax.f32 %v4496_v23, 0.0  ;;  %v4511_v54 = vrot.slane %v4503_v24, 1 }
 0x4d2   : > { %v4509_v1 = vrot.slane %v4501_v10, 1  ;;  %v4494_v20 = vadd.f32 %v4963_v26, %v4481_v33 }
 0x4d3   : > { %v4512_v12 = vrot.slane %v4504_v21, 1  ;;  %v4539_v15 = vpack.c.bf16 %v4530_v0, %v4529_v40 }
 0x4d4   : > { %v4516_v39 = vsel %vm826_vm3, %v4508_v61, %v4509_v1  ;;  %v4502_v31 = vmax.f32 %v4494_v20, 0.0 }
 0x4d5   : > { %v4513_v32 = vsel %vm826_vm3, %v4511_v54, %v4512_v12  ;;  %v4520_v3 = vsel %vm826_vm3, %v4512_v12, %v4505_v6  ;;  %5640 = vmatpush3.bf16.msra.mxu1 %v4539_v15  ;;  %v4524_v60 = vmax.f32 %v4500_v63, %v4516_v39 }
 0x4d6   : > { %v4527_v51 = vmax.f32 %v4503_v24, %v4513_v32  ;;  %v4528_v62 = vmax.f32 %v4504_v21, %v4520_v3  ;;  %v4510_v22 = vrot.slane %v4502_v31, 1  ;;  %5641 = vmatprep.subr.bf16.mxu1 %v8505_v49 }
 0x4d7   : > { %v4531_v26 = vmax.f32 %v4523_v48, %v4524_v60 }
 0x4d8   : > { %v4535_v14 = vmax.f32 %v4527_v51, %v4528_v62  ;;  %v4536_v50 = vmax.f32 %v4528_v62, %v4521_v57  ;;  %v4514_v36 = vsel %vm826_vm3, %v4510_v22, %v4511_v54  ;;  %v4515_v2 = vsel %vm826_vm3, %v4509_v1, %v4510_v22 }
 0x4d9   : > { %v4525_v11 = vmax.f32 %v4501_v10, %v4515_v2  ;;  %v4526_v38 = vmax.f32 %v4502_v31, %v4514_v36 }
 0x4da   : > { %v4542_v9 = vpack.c.bf16 %v4536_v50, %v4535_v14 }
 0x4db   : > { %v4533_v17 = vmax.f32 %v4525_v11, %v4526_v38  ;;  %v4534_v55 = vmax.f32 %v4526_v38, %v4527_v51  ;;  %v4532_v29 = vmax.f32 %v4524_v60, %v4525_v11 }
 0x4dd   : > { %v4540_v16 = vpack.c.bf16 %v4532_v29, %v4531_v26  ;;  %v4541_v4 = vpack.c.bf16 %v4534_v55, %v4533_v17 }
 0x4df   : > { %5642 = vmatpush3.bf16.msra.mxu1 %v4540_v16 }
 0x4e0   : > { %5643 = vmatprep.subr.bf16.mxu1 %v8505_v49 }
 0x4e3   : > { %5644 = vmatpush3.bf16.msra.mxu1 %v4541_v4 }
 0x4e4   : > { %5645 = vmatprep.subr.bf16.mxu1 %v8505_v49 }
 0x4e7   : > { %5646 = vmatpush3.bf16.msra.mxu1 %v4542_v9 }
 0x4ea   : > { %5648 = vmatmul.mubr.msk.bf16.vlgmr.msra.gmra.mrb[168].mxu1 %vm3911_vm4, %v5798_v35 }
 0x5bd   : > { %v4585_v56 = vpop.f32.mrb[168].mxu1 }
 0x5be   : > { %4592 = vst.msk [vmem:[%s278_s29] sm:$0xff] %vm3911_vm4, %v4585_v56  ;;  %v5649_v13 = vpop.f32.mrb[169].mxu1 }
 0x5bf   : > { %v4588_v58 = vpop.f32.mrb[170].mxu1 }
 0x5c0   : > { %4593 = vst.msk [vmem:[%s278_s29 + $0x8] sm:$0xff] %vm3911_vm4, %v4588_v58  ;;  %v5650_v49 = vpop.f32.mrb[171].mxu1 }
 0x5c1 PF: > { %s17_s24 = sadd.s32 1, %s5822_s24  }
 0x5c2   : > { %p14_p4 = scmp.ge.s32.totalorder %s17_s24, 4  }
 0x5c4   :  { %16 = sbr.rel (!%p14_p4) target bundleno = 1 (0x1), region = 78 }

</bundles_post_ra>
